<compile_context>
chip_gen: v7x
topology: tpu7x:2x2x1
jax: 0.10.0
libtpu: 0.0.40
codegen_flags: <defaults>
</compile_context>

<pallas_src>
import jax
import jax.numpy as jnp
from jax import lax
from jax.experimental import pallas as pl
from jax.experimental.pallas import tpu as pltpu


# ------------------------- config & sizes -------------------------
class Config:
    hidden_size = 32
    num_layers = 1          # kernel implements a single BiLSTM layer
    dropout_embed = 0.5     # identity in eval-mode forward
    use_cuda = False


NUM_EMBEDDINGS = 100
EMBEDDING_DIM = 16
PADDING_IDX = 0
LABEL_SIZE = 8
SEQ_LEN = 8
BATCH = 4
HIDDEN = Config.hidden_size
START_TAG = LABEL_SIZE - 2
STOP_TAG = LABEL_SIZE - 1


# ------------------------- fused Pallas kernel -------------------------
def _fused_bilstm_crf_kernel(tok_ref, mask_ref, emb_ref, wih_ref, whh_ref, b_ref,
                             wtag_ref, crf_ref,
                             dec_ref,
                             gx_scr, hf_scr, hb_scr):
    f32 = jnp.float32
    Bp, T = mask_ref.shape                       # padded batch (multiple of 8), seq len
    V, _E = emb_ref.shape
    H = whh_ref.shape[0]
    L = crf_ref.shape[1]
    start_tag, stop_tag = L - 2, L - 1
    H4 = 4 * H

    mask_v = mask_ref[...]                       # (Bp, T) f32 {0,1} — single vreg, sliced per step

    # ---- 1. batched embedding lookup + input projections (2 matmuls, time-major rows) ----
    tok = tok_ref[...]                                                   # (T*Bp, 1) int32
    onehot = (lax.broadcasted_iota(jnp.int32, (T * Bp, V), 1) == tok).astype(f32)
    e_all = jnp.dot(onehot, emb_ref[...], preferred_element_type=f32)    # (T*Bp, E)
    # gx for BOTH directions: [gates_fwd | gates_bwd] per row, staged in VMEM
    gx_scr[...] = jnp.dot(e_all, wih_ref[...], preferred_element_type=f32) + b_ref[...]

    # ---- 2. BiLSTM recurrence, forward and backward chains interleaved ----
    def lstm_step(gx_t, h, c, whh, m):
        gates = gx_t + jnp.dot(h, whh, preferred_element_type=f32)       # (Bp, 4H) i,f,g,o
        sg = jax.nn.sigmoid(gates)               # one EUP pass covers i/f/o lanes
        tg = jnp.tanh(gates)                     # one EUP pass covers g lanes
        c_new = (sg[:, H:2 * H] * c + sg[:, 0:H] * tg[:, 2 * H:3 * H]) * m
        h_new = sg[:, 3 * H:4 * H] * jnp.tanh(c_new) * m                 # mask gate == packed-seq
        return h_new, c_new

    whh_f = whh_ref[:, 0:H4]                     # (H, 4H)
    whh_b = whh_ref[:, H4:2 * H4]
    h_f = jnp.zeros((Bp, H), f32)
    c_f = jnp.zeros((Bp, H), f32)
    h_b = jnp.zeros((Bp, H), f32)
    c_b = jnp.zeros((Bp, H), f32)
    for s in range(T):
        tf, tb = s, T - 1 - s
        gx_f = gx_scr[tf * Bp:(tf + 1) * Bp, 0:H4]          # aligned (Bp, 4H) loads
        gx_b = gx_scr[tb * Bp:(tb + 1) * Bp, H4:2 * H4]
        h_f, c_f = lstm_step(gx_f, h_f, c_f, whh_f, mask_v[:, tf:tf + 1])
        h_b, c_b = lstm_step(gx_b, h_b, c_b, whh_b, mask_v[:, tb:tb + 1])
        hf_scr[tf * Bp:(tf + 1) * Bp, :] = h_f              # stage h for deferred hidden2tag
        hb_scr[tb * Bp:(tb + 1) * Bp, :] = h_b

    # ---- 3. hidden2tag, batched over all time steps (2 matmuls) ----
    wtag = wtag_ref[...]                                     # (L, 2H): [W_fwd^T | W_bwd^T]
    dn = (((1,), (1,)), ((), ()))                            # contract h's H with wtag's H
    feats_all = (lax.dot_general(hf_scr[...], wtag[:, 0:H], dn, preferred_element_type=f32)
                 + lax.dot_general(hb_scr[...], wtag[:, H:2 * H], dn, preferred_element_type=f32)
                 + crf_ref[L:L + 1, :])                      # (T*Bp, L), bias row of crf_ref

    # ---- 4. Viterbi forward recurrence ----
    # argmax_i(feats[b,j] + trans[i,j] + part[b,i]) == argmax_i(trans[i,j] + part[b,i]);
    # feats is added AFTER the reduction (identical result, no 3-D feats broadcast).
    trans = crf_ref[0:L, :]                                  # (L, L)
    trans_bc = jnp.broadcast_to(trans.reshape(1, L, L), (Bp, L, L))      # hoisted broadcast
    row_idx = lax.broadcasted_iota(jnp.int32, (Bp, L, L), 1)
    partition = feats_all[0:Bp, :] + trans[start_tag:start_tag + 1, :]   # (Bp, L)
    # back_points/dec_cols stay as short Python lists: persistent live set here is
    # ~20 vregs (weights/gx/h are dead or in VMEM), well under the 64-vreg file.
    back_points = []
    for t in range(1, T):
        scores = trans_bc + partition[:, :, None]            # (Bp, L, L)
        mx = jnp.max(scores, axis=1)                         # (Bp, L)
        bp = jnp.min(jnp.where(scores == mx[:, None, :], row_idx, L), axis=1)  # first-max index
        m_ok = mask_v[:, t:t + 1] > 0.0                      # (Bp, 1)
        back_points.append(jnp.where(m_ok, bp, 0))           # masked_fill_(pad, 0)
        partition = jnp.where(m_ok, feats_all[t * Bp:(t + 1) * Bp, :] + mx, partition)

    # termination: pointer = argmax_i(partition[:, i] + trans[i, STOP])
    last_values = trans_bc + partition[:, :, None]
    lv_mx = jnp.max(last_values, axis=1)
    last_bp = jnp.min(jnp.where(last_values == lv_mx[:, None, :], row_idx, L), axis=1)
    pointer0 = last_bp[:, stop_tag:stop_tag + 1]             # (Bp, 1) int32

    # ---- 5. backtracking (mirrors the reference pointer-chasing loop) ----
    lengths = jnp.sum(mask_v, axis=1, keepdims=True).astype(jnp.int32)   # (Bp, 1)
    lane_l = lax.broadcasted_iota(jnp.int32, (Bp, L), 1)
    dec_cols = [None] * T
    dec_cols[T - 1] = pointer0
    pointer = pointer0
    for idx in range(T - 2, -1, -1):
        gathered = jnp.sum(jnp.where(lane_l == pointer, back_points[idx], 0),
                           axis=1, keepdims=True)            # back_points[idx][b, pointer[b]]
        # at idx == length-1 the reference scatters the termination pointer
        pointer = jnp.where(lengths == (idx + 1), pointer0, gathered)
        dec_cols[idx] = pointer

    dec_ref[...] = jnp.concatenate(dec_cols, axis=1)         # (Bp, T), single store


# ------------------------- wrapper (= CRFParallel.forward) -------------------------
def _full_spec(shape):
    return pl.BlockSpec(shape, lambda i, _n=len(shape): (0,) * _n)


def crf_parallel_forward(params, tokens, lengths, mask_bt):
    """tokens: (T, B) int32; lengths: (B,) sorted descending; mask_bt: (B, T)."""
    del lengths  # packing is replaced by mask-gated recurrence (equivalent outputs)
    T, B = tokens.shape
    H, L, E, V = HIDDEN, LABEL_SIZE, EMBEDDING_DIM, NUM_EMBEDDINGS
    Bp = ((B + 7) // 8) * 8          # pad batch to a sublane multiple (free: 4 rows pad to 8 anyway)

    tok_p = jnp.full((T, Bp), PADDING_IDX, dtype=jnp.int32).at[:, :B].set(tokens.astype(jnp.int32))
    tok_flat = tok_p.reshape(T * Bp, 1)                                   # time-major rows
    mask_p = jnp.zeros((Bp, T), jnp.float32).at[:B, :].set(mask_bt.astype(jnp.float32))

    # pack parameters into few, dense inputs (8 DMAs total)
    w_ih = jnp.concatenate([params["w_ih_f"], params["w_ih_b"]], axis=1)  # (E, 8H)
    w_hh = jnp.concatenate([params["w_hh_f"], params["w_hh_b"]], axis=1)  # (H, 8H)
    bias = jnp.concatenate([params["b_f"], params["b_b"]], axis=1)        # (1, 8H)
    w_tag_t = jnp.transpose(params["w_tag"], (1, 0))                      # (L, 2H)
    crf = jnp.concatenate([params["transitions"], params["b_tag"]], axis=0)  # (L+1, L)

    decode_full = pl.pallas_call(
        _fused_bilstm_crf_kernel,
        out_shape=jax.ShapeDtypeStruct((Bp, T), jnp.int32),
        grid=(1,),
        in_specs=[
            _full_spec((T * Bp, 1)),          # tokens, time-major
            _full_spec((Bp, T)),              # mask
            _full_spec((V, E)),               # embedding table
            _full_spec((E, 8 * H)),           # [w_ih_f | w_ih_b]
            _full_spec((H, 8 * H)),           # [w_hh_f | w_hh_b]
            _full_spec((1, 8 * H)),           # [b_f | b_b]
            _full_spec((L, 2 * H)),           # hidden2tag weight, transposed
            _full_spec((L + 1, L)),           # [transitions ; b_tag]
        ],
        out_specs=_full_spec((Bp, T)),
        scratch_shapes=[
            pltpu.VMEM((T * Bp, 8 * H), jnp.float32),   # gx (both directions)
            pltpu.VMEM((T * Bp, H), jnp.float32),       # forward hidden states
            pltpu.VMEM((T * Bp, H), jnp.float32),       # backward hidden states
        ],
        compiler_params=pltpu.CompilerParams(dimension_semantics=("arbitrary",)),
    )(tok_flat, mask_p, params["embedding"], w_ih, w_hh, bias, w_tag_t, crf)

    path_score = None
    return path_score, decode_full[:B]


# ------------------------- parameter init (deterministic) -------------------------
def init_params(key):
    ks = jax.random.split(key, 12)
    p = {}
    emb = jax.random.normal(ks[0], (NUM_EMBEDDINGS, EMBEDDING_DIM), jnp.float32)
    emb = emb.at[PADDING_IDX].set(0.0)            # nn.Embedding padding_idx row
    p["embedding"] = emb

    scale = 1.0 / jnp.sqrt(jnp.float32(HIDDEN))

    def u(k, shape, s=scale):
        return jax.random.uniform(k, shape, jnp.float32, -s, s)

    # forward direction (weights stored as (in, 4H); gate order i,f,g,o)
    p["w_ih_f"] = u(ks[1], (EMBEDDING_DIM, 4 * HIDDEN))
    p["w_hh_f"] = u(ks[2], (HIDDEN, 4 * HIDDEN))
    p["b_f"] = u(ks[3], (1, 4 * HIDDEN)) + u(ks[4], (1, 4 * HIDDEN))   # b_ih + b_hh
    # reverse direction
    p["w_ih_b"] = u(ks[5], (EMBEDDING_DIM, 4 * HIDDEN))
    p["w_hh_b"] = u(ks[6], (HIDDEN, 4 * HIDDEN))
    p["b_b"] = u(ks[7], (1, 4 * HIDDEN)) + u(ks[8], (1, 4 * HIDDEN))
    # hidden2tag linear
    lin_scale = 1.0 / jnp.sqrt(jnp.float32(2 * HIDDEN))
    p["w_tag"] = u(ks[9], (2 * HIDDEN, LABEL_SIZE), lin_scale)
    p["b_tag"] = u(ks[10], (1, LABEL_SIZE), lin_scale)
    # CRF transitions (torch.randn then constrained columns/rows)
    trans = jax.random.normal(ks[11], (LABEL_SIZE, LABEL_SIZE), jnp.float32)
    trans = trans.at[:, START_TAG].set(-10000.0)
    trans = trans.at[STOP_TAG, :].set(-10000.0)
    p["transitions"] = trans
    return p


# ------------------------- demo -------------------------
if __name__ == "__main__":
    key = jax.random.PRNGKey(0)
    pkey, tkey = jax.random.split(key)
    params = init_params(pkey)

    # lengths sorted descending (pack_padded_sequence requirement)
    lengths = jnp.array([SEQ_LEN, SEQ_LEN - 1, SEQ_LEN - 3, SEQ_LEN - 5], dtype=jnp.int32)
    t_idx = jnp.arange(SEQ_LEN)
    mask_bt = (t_idx[None, :] < lengths[:, None]).astype(jnp.float32)   # (B, T)

    tokens_bt = jax.random.randint(tkey, (BATCH, SEQ_LEN), 1, NUM_EMBEDDINGS, dtype=jnp.int32)
    tokens_bt = jnp.where(mask_bt > 0, tokens_bt, PADDING_IDX)
    tokens = jnp.transpose(tokens_bt, (1, 0))                           # (T, B)

    path_score, best_path = crf_parallel_forward(params, tokens, lengths, mask_bt)
    best_path = jax.block_until_ready(best_path)
    assert best_path.shape == (BATCH, SEQ_LEN)
    assert best_path.dtype == jnp.int32
    assert path_score is None
    print("KERNEL_OK")
</pallas_src>

<mosaic_0001>
module attributes {stable_mosaic.version = 11 : i64} {
  func.func @_fused_bilstm_crf_kernel(%arg0: i32, %arg1: memref<64x1xi32, #tpu.memory_space<vmem>>, %arg2: memref<8x8xf32, #tpu.memory_space<vmem>>, %arg3: memref<100x16xf32, #tpu.memory_space<vmem>>, %arg4: memref<16x256xf32, #tpu.memory_space<vmem>>, %arg5: memref<32x256xf32, #tpu.memory_space<vmem>>, %arg6: memref<1x256xf32, #tpu.memory_space<vmem>>, %arg7: memref<8x64xf32, #tpu.memory_space<vmem>>, %arg8: memref<9x8xf32, #tpu.memory_space<vmem>>, %arg9: memref<8x8xi32, #tpu.memory_space<vmem>>, %arg10: memref<64x256xf32, #tpu.memory_space<vmem>>, %arg11: memref<64x32xf32, #tpu.memory_space<vmem>>, %arg12: memref<64x32xf32, #tpu.memory_space<vmem>>) attributes {dimension_semantics = [#tpu.dimension_semantics<arbitrary>], iteration_bounds = array<i64: 1>, scalar_prefetch = 0 : i64, scratch_operands = 3 : i64, tpu.core_type = #tpu.core_type<tc>, window_params = [{pipeline_mode = #tpu.pipeline_mode<synchronous>, transform_indices = @transform_0, window_bounds = array<i64: 64, 1>}, {pipeline_mode = #tpu.pipeline_mode<synchronous>, transform_indices = @transform_1, window_bounds = array<i64: 8, 8>}, {pipeline_mode = #tpu.pipeline_mode<synchronous>, transform_indices = @transform_2, window_bounds = array<i64: 100, 16>}, {pipeline_mode = #tpu.pipeline_mode<synchronous>, transform_indices = @transform_3, window_bounds = array<i64: 16, 256>}, {pipeline_mode = #tpu.pipeline_mode<synchronous>, transform_indices = @transform_4, window_bounds = array<i64: 32, 256>}, {pipeline_mode = #tpu.pipeline_mode<synchronous>, transform_indices = @transform_5, window_bounds = array<i64: 1, 256>}, {pipeline_mode = #tpu.pipeline_mode<synchronous>, transform_indices = @transform_6, window_bounds = array<i64: 8, 64>}, {pipeline_mode = #tpu.pipeline_mode<synchronous>, transform_indices = @transform_7, window_bounds = array<i64: 9, 8>}, {pipeline_mode = #tpu.pipeline_mode<synchronous>, transform_indices = @transform_8, window_bounds = array<i64: 8, 8>}]} {
    %c0 = arith.constant 0 : index
    %c0_0 = arith.constant 0 : index
    %0 = vector.load %arg2[%c0, %c0_0] : memref<8x8xf32, #tpu.memory_space<vmem>>, vector<8x8xf32>
    %c0_1 = arith.constant 0 : index
    %c0_2 = arith.constant 0 : index
    %1 = vector.load %arg1[%c0_1, %c0_2] : memref<64x1xi32, #tpu.memory_space<vmem>>, vector<64x1xi32>
    %2 = tpu.iota {dimensions = array<i32: 1>} : vector<64x100xi32>
    %3 = vector.broadcast %1 : vector<64x1xi32> to vector<64x100xi32>
    %4 = arith.cmpi eq, %2, %3 : vector<64x100xi32>
    %5 = arith.extui %4 : vector<64x100xi1> to vector<64x100xi32>
    %6 = arith.sitofp %5 : vector<64x100xi32> to vector<64x100xf32>
    %c0_3 = arith.constant 0 : index
    %c0_4 = arith.constant 0 : index
    %7 = vector.load %arg3[%c0_3, %c0_4] : memref<100x16xf32, #tpu.memory_space<vmem>>, vector<100x16xf32>
    %cst = arith.constant dense<0.000000e+00> : vector<64x16xf32>
    %8 = tpu.matmul %6, %7, %cst {dimension_numbers = #tpu.dot_dimension_numbers<[1], [0], [0], [1], [0, 0, 1, 1], [], []>} : vector<64x100xf32>, vector<100x16xf32>, vector<64x16xf32> -> vector<64x16xf32>
    %c0_5 = arith.constant 0 : index
    %c0_6 = arith.constant 0 : index
    %9 = vector.load %arg4[%c0_5, %c0_6] : memref<16x256xf32, #tpu.memory_space<vmem>>, vector<16x256xf32>
    %cst_7 = arith.constant dense<0.000000e+00> : vector<64x256xf32>
    %10 = tpu.matmul %8, %9, %cst_7 {dimension_numbers = #tpu.dot_dimension_numbers<[1], [0], [0], [1], [0, 0, 1, 1], [], []>} : vector<64x16xf32>, vector<16x256xf32>, vector<64x256xf32> -> vector<64x256xf32>
    %c0_8 = arith.constant 0 : index
    %c0_9 = arith.constant 0 : index
    %11 = vector.load %arg6[%c0_8, %c0_9] : memref<1x256xf32, #tpu.memory_space<vmem>>, vector<1x256xf32>
    %12 = vector.broadcast %11 : vector<1x256xf32> to vector<64x256xf32>
    %13 = arith.addf %10, %12 : vector<64x256xf32>
    %c0_10 = arith.constant 0 : index
    %c0_11 = arith.constant 0 : index
    %14 = vector.load %arg10[%c0_10, %c0_11] : memref<64x256xf32, #tpu.memory_space<vmem>>, vector<64x256xf32>
    tpu.vector_store %arg10[%c0_10, %c0_11], %13 {strides = array<i32>} : memref<64x256xf32, #tpu.memory_space<vmem>>, vector<64x256xf32>,
    %c0_12 = arith.constant 0 : index
    %c0_13 = arith.constant 0 : index
    %15 = vector.load %arg5[%c0_12, %c0_13] : memref<32x256xf32, #tpu.memory_space<vmem>>, vector<32x128xf32>
    %c0_14 = arith.constant 0 : index
    %c128 = arith.constant 128 : index
    %16 = vector.load %arg5[%c0_14, %c128] : memref<32x256xf32, #tpu.memory_space<vmem>>, vector<32x128xf32>
    %cst_15 = arith.constant 0.000000e+00 : f32
    %17 = vector.broadcast %cst_15 : f32 to vector<8x32xf32>
    %cst_16 = arith.constant 0.000000e+00 : f32
    %18 = vector.broadcast %cst_16 : f32 to vector<8x32xf32>
    %cst_17 = arith.constant 0.000000e+00 : f32
    %19 = vector.broadcast %cst_17 : f32 to vector<8x32xf32>
    %cst_18 = arith.constant 0.000000e+00 : f32
    %20 = vector.broadcast %cst_18 : f32 to vector<8x32xf32>
    %c0_19 = arith.constant 0 : index
    %c0_20 = arith.constant 0 : index
    %21 = vector.load %arg10[%c0_19, %c0_20] : memref<64x256xf32, #tpu.memory_space<vmem>>, vector<8x128xf32>
    %c56 = arith.constant 56 : index
    %c128_21 = arith.constant 128 : index
    %22 = vector.load %arg10[%c56, %c128_21] : memref<64x256xf32, #tpu.memory_space<vmem>>, vector<8x128xf32>
    %23 = vector.extract_strided_slice %0 {offsets = [0, 0], sizes = [8, 1], strides = [1, 1]} : vector<8x8xf32> to vector<8x1xf32>
    %cst_22 = arith.constant dense<0.000000e+00> : vector<8x128xf32>
    %24 = tpu.matmul %17, %15, %cst_22 {dimension_numbers = #tpu.dot_dimension_numbers<[1], [0], [0], [1], [0, 0, 1, 1], [], []>} : vector<8x32xf32>, vector<32x128xf32>, vector<8x128xf32> -> vector<8x128xf32>
    %25 = arith.addf %21, %24 : vector<8x128xf32>
    %26 = arith.negf %25 : vector<8x128xf32>
    %27 = math.exp %26 : vector<8x128xf32>
    %cst_23 = arith.constant 1.000000e+00 : f32
    %28 = vector.broadcast %cst_23 : f32 to vector<8x128xf32>
    %29 = arith.addf %28, %27 : vector<8x128xf32>
    %30 = arith.divf %28, %29 : vector<8x128xf32>
    %31 = math.tanh %25 : vector<8x128xf32>
    %32 = vector.extract_strided_slice %30 {offsets = [0, 32], sizes = [8, 32], strides = [1, 1]} : vector<8x128xf32> to vector<8x32xf32>
    %33 = arith.mulf %32, %18 : vector<8x32xf32>
    %34 = vector.extract_strided_slice %30 {offsets = [0, 0], sizes = [8, 32], strides = [1, 1]} : vector<8x128xf32> to vector<8x32xf32>
    %35 = vector.extract_strided_slice %31 {offsets = [0, 64], sizes = [8, 32], strides = [1, 1]} : vector<8x128xf32> to vector<8x32xf32>
    %36 = arith.mulf %34, %35 : vector<8x32xf32>
    %37 = arith.addf %33, %36 : vector<8x32xf32>
    %38 = vector.broadcast %23 : vector<8x1xf32> to vector<8x32xf32>
    %39 = arith.mulf %37, %38 : vector<8x32xf32>
    %40 = vector.extract_strided_slice %30 {offsets = [0, 96], sizes = [8, 32], strides = [1, 1]} : vector<8x128xf32> to vector<8x32xf32>
    %41 = math.tanh %39 : vector<8x32xf32>
    %42 = arith.mulf %40, %41 : vector<8x32xf32>
    %43 = vector.broadcast %23 : vector<8x1xf32> to vector<8x32xf32>
    %44 = arith.mulf %42, %43 : vector<8x32xf32>
    %45 = vector.extract_strided_slice %0 {offsets = [0, 7], sizes = [8, 1], strides = [1, 1]} : vector<8x8xf32> to vector<8x1xf32>
    %cst_24 = arith.constant dense<0.000000e+00> : vector<8x128xf32>
    %46 = tpu.matmul %19, %16, %cst_24 {dimension_numbers = #tpu.dot_dimension_numbers<[1], [0], [0], [1], [0, 0, 1, 1], [], []>} : vector<8x32xf32>, vector<32x128xf32>, vector<8x128xf32> -> vector<8x128xf32>
    %47 = arith.addf %22, %46 : vector<8x128xf32>
    %48 = arith.negf %47 : vector<8x128xf32>
    %49 = math.exp %48 : vector<8x128xf32>
    %cst_25 = arith.constant 1.000000e+00 : f32
    %50 = vector.broadcast %cst_25 : f32 to vector<8x128xf32>
    %51 = arith.addf %50, %49 : vector<8x128xf32>
    %52 = arith.divf %50, %51 : vector<8x128xf32>
    %53 = math.tanh %47 : vector<8x128xf32>
    %54 = vector.extract_strided_slice %52 {offsets = [0, 32], sizes = [8, 32], strides = [1, 1]} : vector<8x128xf32> to vector<8x32xf32>
    %55 = arith.mulf %54, %20 : vector<8x32xf32>
    %56 = vector.extract_strided_slice %52 {offsets = [0, 0], sizes = [8, 32], strides = [1, 1]} : vector<8x128xf32> to vector<8x32xf32>
    %57 = vector.extract_strided_slice %53 {offsets = [0, 64], sizes = [8, 32], strides = [1, 1]} : vector<8x128xf32> to vector<8x32xf32>
    %58 = arith.mulf %56, %57 : vector<8x32xf32>
    %59 = arith.addf %55, %58 : vector<8x32xf32>
    %60 = vector.broadcast %45 : vector<8x1xf32> to vector<8x32xf32>
    %61 = arith.mulf %59, %60 : vector<8x32xf32>
    %62 = vector.extract_strided_slice %52 {offsets = [0, 96], sizes = [8, 32], strides = [1, 1]} : vector<8x128xf32> to vector<8x32xf32>
    %63 = math.tanh %61 : vector<8x32xf32>
    %64 = arith.mulf %62, %63 : vector<8x32xf32>
    %65 = vector.broadcast %45 : vector<8x1xf32> to vector<8x32xf32>
    %66 = arith.mulf %64, %65 : vector<8x32xf32>
    %c0_26 = arith.constant 0 : index
    %c0_27 = arith.constant 0 : index
    %67 = vector.load %arg11[%c0_26, %c0_27] : memref<64x32xf32, #tpu.memory_space<vmem>>, vector<8x32xf32>
    tpu.vector_store %arg11[%c0_26, %c0_27], %44 {strides = array<i32>} : memref<64x32xf32, #tpu.memory_space<vmem>>, vector<8x32xf32>,
    %c56_28 = arith.constant 56 : index
    %c0_29 = arith.constant 0 : index
    %68 = vector.load %arg12[%c56_28, %c0_29] : memref<64x32xf32, #tpu.memory_space<vmem>>, vector<8x32xf32>
    tpu.vector_store %arg12[%c56_28, %c0_29], %66 {strides = array<i32>} : memref<64x32xf32, #tpu.memory_space<vmem>>, vector<8x32xf32>,
    %c8 = arith.constant 8 : index
    %c0_30 = arith.constant 0 : index
    %69 = vector.load %arg10[%c8, %c0_30] : memref<64x256xf32, #tpu.memory_space<vmem>>, vector<8x128xf32>
    %c48 = arith.constant 48 : index
    %c128_31 = arith.constant 128 : index
    %70 = vector.load %arg10[%c48, %c128_31] : memref<64x256xf32, #tpu.memory_space<vmem>>, vector<8x128xf32>
    %71 = vector.extract_strided_slice %0 {offsets = [0, 1], sizes = [8, 1], strides = [1, 1]} : vector<8x8xf32> to vector<8x1xf32>
    %cst_32 = arith.constant dense<0.000000e+00> : vector<8x128xf32>
    %72 = tpu.matmul %44, %15, %cst_32 {dimension_numbers = #tpu.dot_dimension_numbers<[1], [0], [0], [1], [0, 0, 1, 1], [], []>} : vector<8x32xf32>, vector<32x128xf32>, vector<8x128xf32> -> vector<8x128xf32>
    %73 = arith.addf %69, %72 : vector<8x128xf32>
    %74 = arith.negf %73 : vector<8x128xf32>
    %75 = math.exp %74 : vector<8x128xf32>
    %cst_33 = arith.constant 1.000000e+00 : f32
    %76 = vector.broadcast %cst_33 : f32 to vector<8x128xf32>
    %77 = arith.addf %76, %75 : vector<8x128xf32>
    %78 = arith.divf %76, %77 : vector<8x128xf32>
    %79 = math.tanh %73 : vector<8x128xf32>
    %80 = vector.extract_strided_slice %78 {offsets = [0, 32], sizes = [8, 32], strides = [1, 1]} : vector<8x128xf32> to vector<8x32xf32>
    %81 = arith.mulf %80, %39 : vector<8x32xf32>
    %82 = vector.extract_strided_slice %78 {offsets = [0, 0], sizes = [8, 32], strides = [1, 1]} : vector<8x128xf32> to vector<8x32xf32>
    %83 = vector.extract_strided_slice %79 {offsets = [0, 64], sizes = [8, 32], strides = [1, 1]} : vector<8x128xf32> to vector<8x32xf32>
    %84 = arith.mulf %82, %83 : vector<8x32xf32>
    %85 = arith.addf %81, %84 : vector<8x32xf32>
    %86 = vector.broadcast %71 : vector<8x1xf32> to vector<8x32xf32>
    %87 = arith.mulf %85, %86 : vector<8x32xf32>
    %88 = vector.extract_strided_slice %78 {offsets = [0, 96], sizes = [8, 32], strides = [1, 1]} : vector<8x128xf32> to vector<8x32xf32>
    %89 = math.tanh %87 : vector<8x32xf32>
    %90 = arith.mulf %88, %89 : vector<8x32xf32>
    %91 = vector.broadcast %71 : vector<8x1xf32> to vector<8x32xf32>
    %92 = arith.mulf %90, %91 : vector<8x32xf32>
    %93 = vector.extract_strided_slice %0 {offsets = [0, 6], sizes = [8, 1], strides = [1, 1]} : vector<8x8xf32> to vector<8x1xf32>
    %cst_34 = arith.constant dense<0.000000e+00> : vector<8x128xf32>
    %94 = tpu.matmul %66, %16, %cst_34 {dimension_numbers = #tpu.dot_dimension_numbers<[1], [0], [0], [1], [0, 0, 1, 1], [], []>} : vector<8x32xf32>, vector<32x128xf32>, vector<8x128xf32> -> vector<8x128xf32>
    %95 = arith.addf %70, %94 : vector<8x128xf32>
    %96 = arith.negf %95 : vector<8x128xf32>
    %97 = math.exp %96 : vector<8x128xf32>
    %cst_35 = arith.constant 1.000000e+00 : f32
    %98 = vector.broadcast %cst_35 : f32 to vector<8x128xf32>
    %99 = arith.addf %98, %97 : vector<8x128xf32>
    %100 = arith.divf %98, %99 : vector<8x128xf32>
    %101 = math.tanh %95 : vector<8x128xf32>
    %102 = vector.extract_strided_slice %100 {offsets = [0, 32], sizes = [8, 32], strides = [1, 1]} : vector<8x128xf32> to vector<8x32xf32>
    %103 = arith.mulf %102, %61 : vector<8x32xf32>
    %104 = vector.extract_strided_slice %100 {offsets = [0, 0], sizes = [8, 32], strides = [1, 1]} : vector<8x128xf32> to vector<8x32xf32>
    %105 = vector.extract_strided_slice %101 {offsets = [0, 64], sizes = [8, 32], strides = [1, 1]} : vector<8x128xf32> to vector<8x32xf32>
    %106 = arith.mulf %104, %105 : vector<8x32xf32>
    %107 = arith.addf %103, %106 : vector<8x32xf32>
    %108 = vector.broadcast %93 : vector<8x1xf32> to vector<8x32xf32>
    %109 = arith.mulf %107, %108 : vector<8x32xf32>
    %110 = vector.extract_strided_slice %100 {offsets = [0, 96], sizes = [8, 32], strides = [1, 1]} : vector<8x128xf32> to vector<8x32xf32>
    %111 = math.tanh %109 : vector<8x32xf32>
    %112 = arith.mulf %110, %111 : vector<8x32xf32>
    %113 = vector.broadcast %93 : vector<8x1xf32> to vector<8x32xf32>
    %114 = arith.mulf %112, %113 : vector<8x32xf32>
    %c8_36 = arith.constant 8 : index
    %c0_37 = arith.constant 0 : index
    %115 = vector.load %arg11[%c8_36, %c0_37] : memref<64x32xf32, #tpu.memory_space<vmem>>, vector<8x32xf32>
    tpu.vector_store %arg11[%c8_36, %c0_37], %92 {strides = array<i32>} : memref<64x32xf32, #tpu.memory_space<vmem>>, vector<8x32xf32>,
    %c48_38 = arith.constant 48 : index
    %c0_39 = arith.constant 0 : index
    %116 = vector.load %arg12[%c48_38, %c0_39] : memref<64x32xf32, #tpu.memory_space<vmem>>, vector<8x32xf32>
    tpu.vector_store %arg12[%c48_38, %c0_39], %114 {strides = array<i32>} : memref<64x32xf32, #tpu.memory_space<vmem>>, vector<8x32xf32>,
    %c16 = arith.constant 16 : index
    %c0_40 = arith.constant 0 : index
    %117 = vector.load %arg10[%c16, %c0_40] : memref<64x256xf32, #tpu.memory_space<vmem>>, vector<8x128xf32>
    %c40 = arith.constant 40 : index
    %c128_41 = arith.constant 128 : index
    %118 = vector.load %arg10[%c40, %c128_41] : memref<64x256xf32, #tpu.memory_space<vmem>>, vector<8x128xf32>
    %119 = vector.extract_strided_slice %0 {offsets = [0, 2], sizes = [8, 1], strides = [1, 1]} : vector<8x8xf32> to vector<8x1xf32>
    %cst_42 = arith.constant dense<0.000000e+00> : vector<8x128xf32>
    %120 = tpu.matmul %92, %15, %cst_42 {dimension_numbers = #tpu.dot_dimension_numbers<[1], [0], [0], [1], [0, 0, 1, 1], [], []>} : vector<8x32xf32>, vector<32x128xf32>, vector<8x128xf32> -> vector<8x128xf32>
    %121 = arith.addf %117, %120 : vector<8x128xf32>
    %122 = arith.negf %121 : vector<8x128xf32>
    %123 = math.exp %122 : vector<8x128xf32>
    %cst_43 = arith.constant 1.000000e+00 : f32
    %124 = vector.broadcast %cst_43 : f32 to vector<8x128xf32>
    %125 = arith.addf %124, %123 : vector<8x128xf32>
    %126 = arith.divf %124, %125 : vector<8x128xf32>
    %127 = math.tanh %121 : vector<8x128xf32>
    %128 = vector.extract_strided_slice %126 {offsets = [0, 32], sizes = [8, 32], strides = [1, 1]} : vector<8x128xf32> to vector<8x32xf32>
    %129 = arith.mulf %128, %87 : vector<8x32xf32>
    %130 = vector.extract_strided_slice %126 {offsets = [0, 0], sizes = [8, 32], strides = [1, 1]} : vector<8x128xf32> to vector<8x32xf32>
    %131 = vector.extract_strided_slice %127 {offsets = [0, 64], sizes = [8, 32], strides = [1, 1]} : vector<8x128xf32> to vector<8x32xf32>
    %132 = arith.mulf %130, %131 : vector<8x32xf32>
    %133 = arith.addf %129, %132 : vector<8x32xf32>
    %134 = vector.broadcast %119 : vector<8x1xf32> to vector<8x32xf32>
    %135 = arith.mulf %133, %134 : vector<8x32xf32>
    %136 = vector.extract_strided_slice %126 {offsets = [0, 96], sizes = [8, 32], strides = [1, 1]} : vector<8x128xf32> to vector<8x32xf32>
    %137 = math.tanh %135 : vector<8x32xf32>
    %138 = arith.mulf %136, %137 : vector<8x32xf32>
    %139 = vector.broadcast %119 : vector<8x1xf32> to vector<8x32xf32>
    %140 = arith.mulf %138, %139 : vector<8x32xf32>
    %141 = vector.extract_strided_slice %0 {offsets = [0, 5], sizes = [8, 1], strides = [1, 1]} : vector<8x8xf32> to vector<8x1xf32>
    %cst_44 = arith.constant dense<0.000000e+00> : vector<8x128xf32>
    %142 = tpu.matmul %114, %16, %cst_44 {dimension_numbers = #tpu.dot_dimension_numbers<[1], [0], [0], [1], [0, 0, 1, 1], [], []>} : vector<8x32xf32>, vector<32x128xf32>, vector<8x128xf32> -> vector<8x128xf32>
    %143 = arith.addf %118, %142 : vector<8x128xf32>
    %144 = arith.negf %143 : vector<8x128xf32>
    %145 = math.exp %144 : vector<8x128xf32>
    %cst_45 = arith.constant 1.000000e+00 : f32
    %146 = vector.broadcast %cst_45 : f32 to vector<8x128xf32>
    %147 = arith.addf %146, %145 : vector<8x128xf32>
    %148 = arith.divf %146, %147 : vector<8x128xf32>
    %149 = math.tanh %143 : vector<8x128xf32>
    %150 = vector.extract_strided_slice %148 {offsets = [0, 32], sizes = [8, 32], strides = [1, 1]} : vector<8x128xf32> to vector<8x32xf32>
    %151 = arith.mulf %150, %109 : vector<8x32xf32>
    %152 = vector.extract_strided_slice %148 {offsets = [0, 0], sizes = [8, 32], strides = [1, 1]} : vector<8x128xf32> to vector<8x32xf32>
    %153 = vector.extract_strided_slice %149 {offsets = [0, 64], sizes = [8, 32], strides = [1, 1]} : vector<8x128xf32> to vector<8x32xf32>
    %154 = arith.mulf %152, %153 : vector<8x32xf32>
    %155 = arith.addf %151, %154 : vector<8x32xf32>
    %156 = vector.broadcast %141 : vector<8x1xf32> to vector<8x32xf32>
    %157 = arith.mulf %155, %156 : vector<8x32xf32>
    %158 = vector.extract_strided_slice %148 {offsets = [0, 96], sizes = [8, 32], strides = [1, 1]} : vector<8x128xf32> to vector<8x32xf32>
    %159 = math.tanh %157 : vector<8x32xf32>
    %160 = arith.mulf %158, %159 : vector<8x32xf32>
    %161 = vector.broadcast %141 : vector<8x1xf32> to vector<8x32xf32>
    %162 = arith.mulf %160, %161 : vector<8x32xf32>
    %c16_46 = arith.constant 16 : index
    %c0_47 = arith.constant 0 : index
    %163 = vector.load %arg11[%c16_46, %c0_47] : memref<64x32xf32, #tpu.memory_space<vmem>>, vector<8x32xf32>
    tpu.vector_store %arg11[%c16_46, %c0_47], %140 {strides = array<i32>} : memref<64x32xf32, #tpu.memory_space<vmem>>, vector<8x32xf32>,
    %c40_48 = arith.constant 40 : index
    %c0_49 = arith.constant 0 : index
    %164 = vector.load %arg12[%c40_48, %c0_49] : memref<64x32xf32, #tpu.memory_space<vmem>>, vector<8x32xf32>
    tpu.vector_store %arg12[%c40_48, %c0_49], %162 {strides = array<i32>} : memref<64x32xf32, #tpu.memory_space<vmem>>, vector<8x32xf32>,
    %c24 = arith.constant 24 : index
    %c0_50 = arith.constant 0 : index
    %165 = vector.load %arg10[%c24, %c0_50] : memref<64x256xf32, #tpu.memory_space<vmem>>, vector<8x128xf32>
    %c32 = arith.constant 32 : index
    %c128_51 = arith.constant 128 : index
    %166 = vector.load %arg10[%c32, %c128_51] : memref<64x256xf32, #tpu.memory_space<vmem>>, vector<8x128xf32>
    %167 = vector.extract_strided_slice %0 {offsets = [0, 3], sizes = [8, 1], strides = [1, 1]} : vector<8x8xf32> to vector<8x1xf32>
    %cst_52 = arith.constant dense<0.000000e+00> : vector<8x128xf32>
    %168 = tpu.matmul %140, %15, %cst_52 {dimension_numbers = #tpu.dot_dimension_numbers<[1], [0], [0], [1], [0, 0, 1, 1], [], []>} : vector<8x32xf32>, vector<32x128xf32>, vector<8x128xf32> -> vector<8x128xf32>
    %169 = arith.addf %165, %168 : vector<8x128xf32>
    %170 = arith.negf %169 : vector<8x128xf32>
    %171 = math.exp %170 : vector<8x128xf32>
    %cst_53 = arith.constant 1.000000e+00 : f32
    %172 = vector.broadcast %cst_53 : f32 to vector<8x128xf32>
    %173 = arith.addf %172, %171 : vector<8x128xf32>
    %174 = arith.divf %172, %173 : vector<8x128xf32>
    %175 = math.tanh %169 : vector<8x128xf32>
    %176 = vector.extract_strided_slice %174 {offsets = [0, 32], sizes = [8, 32], strides = [1, 1]} : vector<8x128xf32> to vector<8x32xf32>
    %177 = arith.mulf %176, %135 : vector<8x32xf32>
    %178 = vector.extract_strided_slice %174 {offsets = [0, 0], sizes = [8, 32], strides = [1, 1]} : vector<8x128xf32> to vector<8x32xf32>
    %179 = vector.extract_strided_slice %175 {offsets = [0, 64], sizes = [8, 32], strides = [1, 1]} : vector<8x128xf32> to vector<8x32xf32>
    %180 = arith.mulf %178, %179 : vector<8x32xf32>
    %181 = arith.addf %177, %180 : vector<8x32xf32>
    %182 = vector.broadcast %167 : vector<8x1xf32> to vector<8x32xf32>
    %183 = arith.mulf %181, %182 : vector<8x32xf32>
    %184 = vector.extract_strided_slice %174 {offsets = [0, 96], sizes = [8, 32], strides = [1, 1]} : vector<8x128xf32> to vector<8x32xf32>
    %185 = math.tanh %183 : vector<8x32xf32>
    %186 = arith.mulf %184, %185 : vector<8x32xf32>
    %187 = vector.broadcast %167 : vector<8x1xf32> to vector<8x32xf32>
    %188 = arith.mulf %186, %187 : vector<8x32xf32>
    %189 = vector.extract_strided_slice %0 {offsets = [0, 4], sizes = [8, 1], strides = [1, 1]} : vector<8x8xf32> to vector<8x1xf32>
    %cst_54 = arith.constant dense<0.000000e+00> : vector<8x128xf32>
    %190 = tpu.matmul %162, %16, %cst_54 {dimension_numbers = #tpu.dot_dimension_numbers<[1], [0], [0], [1], [0, 0, 1, 1], [], []>} : vector<8x32xf32>, vector<32x128xf32>, vector<8x128xf32> -> vector<8x128xf32>
    %191 = arith.addf %166, %190 : vector<8x128xf32>
    %192 = arith.negf %191 : vector<8x128xf32>
    %193 = math.exp %192 : vector<8x128xf32>
    %cst_55 = arith.constant 1.000000e+00 : f32
    %194 = vector.broadcast %cst_55 : f32 to vector<8x128xf32>
    %195 = arith.addf %194, %193 : vector<8x128xf32>
    %196 = arith.divf %194, %195 : vector<8x128xf32>
    %197 = math.tanh %191 : vector<8x128xf32>
    %198 = vector.extract_strided_slice %196 {offsets = [0, 32], sizes = [8, 32], strides = [1, 1]} : vector<8x128xf32> to vector<8x32xf32>
    %199 = arith.mulf %198, %157 : vector<8x32xf32>
    %200 = vector.extract_strided_slice %196 {offsets = [0, 0], sizes = [8, 32], strides = [1, 1]} : vector<8x128xf32> to vector<8x32xf32>
    %201 = vector.extract_strided_slice %197 {offsets = [0, 64], sizes = [8, 32], strides = [1, 1]} : vector<8x128xf32> to vector<8x32xf32>
    %202 = arith.mulf %200, %201 : vector<8x32xf32>
    %203 = arith.addf %199, %202 : vector<8x32xf32>
    %204 = vector.broadcast %189 : vector<8x1xf32> to vector<8x32xf32>
    %205 = arith.mulf %203, %204 : vector<8x32xf32>
    %206 = vector.extract_strided_slice %196 {offsets = [0, 96], sizes = [8, 32], strides = [1, 1]} : vector<8x128xf32> to vector<8x32xf32>
    %207 = math.tanh %205 : vector<8x32xf32>
    %208 = arith.mulf %206, %207 : vector<8x32xf32>
    %209 = vector.broadcast %189 : vector<8x1xf32> to vector<8x32xf32>
    %210 = arith.mulf %208, %209 : vector<8x32xf32>
    %c24_56 = arith.constant 24 : index
    %c0_57 = arith.constant 0 : index
    %211 = vector.load %arg11[%c24_56, %c0_57] : memref<64x32xf32, #tpu.memory_space<vmem>>, vector<8x32xf32>
    tpu.vector_store %arg11[%c24_56, %c0_57], %188 {strides = array<i32>} : memref<64x32xf32, #tpu.memory_space<vmem>>, vector<8x32xf32>,
    %c32_58 = arith.constant 32 : index
    %c0_59 = arith.constant 0 : index
    %212 = vector.load %arg12[%c32_58, %c0_59] : memref<64x32xf32, #tpu.memory_space<vmem>>, vector<8x32xf32>
    tpu.vector_store %arg12[%c32_58, %c0_59], %210 {strides = array<i32>} : memref<64x32xf32, #tpu.memory_space<vmem>>, vector<8x32xf32>,
    %c32_60 = arith.constant 32 : index
    %c0_61 = arith.constant 0 : index
    %213 = vector.load %arg10[%c32_60, %c0_61] : memref<64x256xf32, #tpu.memory_space<vmem>>, vector<8x128xf32>
    %c24_62 = arith.constant 24 : index
    %c128_63 = arith.constant 128 : index
    %214 = vector.load %arg10[%c24_62, %c128_63] : memref<64x256xf32, #tpu.memory_space<vmem>>, vector<8x128xf32>
    %215 = vector.extract_strided_slice %0 {offsets = [0, 4], sizes = [8, 1], strides = [1, 1]} : vector<8x8xf32> to vector<8x1xf32>
    %cst_64 = arith.constant dense<0.000000e+00> : vector<8x128xf32>
    %216 = tpu.matmul %188, %15, %cst_64 {dimension_numbers = #tpu.dot_dimension_numbers<[1], [0], [0], [1], [0, 0, 1, 1], [], []>} : vector<8x32xf32>, vector<32x128xf32>, vector<8x128xf32> -> vector<8x128xf32>
    %217 = arith.addf %213, %216 : vector<8x128xf32>
    %218 = arith.negf %217 : vector<8x128xf32>
    %219 = math.exp %218 : vector<8x128xf32>
    %cst_65 = arith.constant 1.000000e+00 : f32
    %220 = vector.broadcast %cst_65 : f32 to vector<8x128xf32>
    %221 = arith.addf %220, %219 : vector<8x128xf32>
    %222 = arith.divf %220, %221 : vector<8x128xf32>
    %223 = math.tanh %217 : vector<8x128xf32>
    %224 = vector.extract_strided_slice %222 {offsets = [0, 32], sizes = [8, 32], strides = [1, 1]} : vector<8x128xf32> to vector<8x32xf32>
    %225 = arith.mulf %224, %183 : vector<8x32xf32>
    %226 = vector.extract_strided_slice %222 {offsets = [0, 0], sizes = [8, 32], strides = [1, 1]} : vector<8x128xf32> to vector<8x32xf32>
    %227 = vector.extract_strided_slice %223 {offsets = [0, 64], sizes = [8, 32], strides = [1, 1]} : vector<8x128xf32> to vector<8x32xf32>
    %228 = arith.mulf %226, %227 : vector<8x32xf32>
    %229 = arith.addf %225, %228 : vector<8x32xf32>
    %230 = vector.broadcast %215 : vector<8x1xf32> to vector<8x32xf32>
    %231 = arith.mulf %229, %230 : vector<8x32xf32>
    %232 = vector.extract_strided_slice %222 {offsets = [0, 96], sizes = [8, 32], strides = [1, 1]} : vector<8x128xf32> to vector<8x32xf32>
    %233 = math.tanh %231 : vector<8x32xf32>
    %234 = arith.mulf %232, %233 : vector<8x32xf32>
    %235 = vector.broadcast %215 : vector<8x1xf32> to vector<8x32xf32>
    %236 = arith.mulf %234, %235 : vector<8x32xf32>
    %237 = vector.extract_strided_slice %0 {offsets = [0, 3], sizes = [8, 1], strides = [1, 1]} : vector<8x8xf32> to vector<8x1xf32>
    %cst_66 = arith.constant dense<0.000000e+00> : vector<8x128xf32>
    %238 = tpu.matmul %210, %16, %cst_66 {dimension_numbers = #tpu.dot_dimension_numbers<[1], [0], [0], [1], [0, 0, 1, 1], [], []>} : vector<8x32xf32>, vector<32x128xf32>, vector<8x128xf32> -> vector<8x128xf32>
    %239 = arith.addf %214, %238 : vector<8x128xf32>
    %240 = arith.negf %239 : vector<8x128xf32>
    %241 = math.exp %240 : vector<8x128xf32>
    %cst_67 = arith.constant 1.000000e+00 : f32
    %242 = vector.broadcast %cst_67 : f32 to vector<8x128xf32>
    %243 = arith.addf %242, %241 : vector<8x128xf32>
    %244 = arith.divf %242, %243 : vector<8x128xf32>
    %245 = math.tanh %239 : vector<8x128xf32>
    %246 = vector.extract_strided_slice %244 {offsets = [0, 32], sizes = [8, 32], strides = [1, 1]} : vector<8x128xf32> to vector<8x32xf32>
    %247 = arith.mulf %246, %205 : vector<8x32xf32>
    %248 = vector.extract_strided_slice %244 {offsets = [0, 0], sizes = [8, 32], strides = [1, 1]} : vector<8x128xf32> to vector<8x32xf32>
    %249 = vector.extract_strided_slice %245 {offsets = [0, 64], sizes = [8, 32], strides = [1, 1]} : vector<8x128xf32> to vector<8x32xf32>
    %250 = arith.mulf %248, %249 : vector<8x32xf32>
    %251 = arith.addf %247, %250 : vector<8x32xf32>
    %252 = vector.broadcast %237 : vector<8x1xf32> to vector<8x32xf32>
    %253 = arith.mulf %251, %252 : vector<8x32xf32>
    %254 = vector.extract_strided_slice %244 {offsets = [0, 96], sizes = [8, 32], strides = [1, 1]} : vector<8x128xf32> to vector<8x32xf32>
    %255 = math.tanh %253 : vector<8x32xf32>
    %256 = arith.mulf %254, %255 : vector<8x32xf32>
    %257 = vector.broadcast %237 : vector<8x1xf32> to vector<8x32xf32>
    %258 = arith.mulf %256, %257 : vector<8x32xf32>
    %c32_68 = arith.constant 32 : index
    %c0_69 = arith.constant 0 : index
    %259 = vector.load %arg11[%c32_68, %c0_69] : memref<64x32xf32, #tpu.memory_space<vmem>>, vector<8x32xf32>
    tpu.vector_store %arg11[%c32_68, %c0_69], %236 {strides = array<i32>} : memref<64x32xf32, #tpu.memory_space<vmem>>, vector<8x32xf32>,
    %c24_70 = arith.constant 24 : index
    %c0_71 = arith.constant 0 : index
    %260 = vector.load %arg12[%c24_70, %c0_71] : memref<64x32xf32, #tpu.memory_space<vmem>>, vector<8x32xf32>
    tpu.vector_store %arg12[%c24_70, %c0_71], %258 {strides = array<i32>} : memref<64x32xf32, #tpu.memory_space<vmem>>, vector<8x32xf32>,
    %c40_72 = arith.constant 40 : index
    %c0_73 = arith.constant 0 : index
    %261 = vector.load %arg10[%c40_72, %c0_73] : memref<64x256xf32, #tpu.memory_space<vmem>>, vector<8x128xf32>
    %c16_74 = arith.constant 16 : index
    %c128_75 = arith.constant 128 : index
    %262 = vector.load %arg10[%c16_74, %c128_75] : memref<64x256xf32, #tpu.memory_space<vmem>>, vector<8x128xf32>
    %263 = vector.extract_strided_slice %0 {offsets = [0, 5], sizes = [8, 1], strides = [1, 1]} : vector<8x8xf32> to vector<8x1xf32>
    %cst_76 = arith.constant dense<0.000000e+00> : vector<8x128xf32>
    %264 = tpu.matmul %236, %15, %cst_76 {dimension_numbers = #tpu.dot_dimension_numbers<[1], [0], [0], [1], [0, 0, 1, 1], [], []>} : vector<8x32xf32>, vector<32x128xf32>, vector<8x128xf32> -> vector<8x128xf32>
    %265 = arith.addf %261, %264 : vector<8x128xf32>
    %266 = arith.negf %265 : vector<8x128xf32>
    %267 = math.exp %266 : vector<8x128xf32>
    %cst_77 = arith.constant 1.000000e+00 : f32
    %268 = vector.broadcast %cst_77 : f32 to vector<8x128xf32>
    %269 = arith.addf %268, %267 : vector<8x128xf32>
    %270 = arith.divf %268, %269 : vector<8x128xf32>
    %271 = math.tanh %265 : vector<8x128xf32>
    %272 = vector.extract_strided_slice %270 {offsets = [0, 32], sizes = [8, 32], strides = [1, 1]} : vector<8x128xf32> to vector<8x32xf32>
    %273 = arith.mulf %272, %231 : vector<8x32xf32>
    %274 = vector.extract_strided_slice %270 {offsets = [0, 0], sizes = [8, 32], strides = [1, 1]} : vector<8x128xf32> to vector<8x32xf32>
    %275 = vector.extract_strided_slice %271 {offsets = [0, 64], sizes = [8, 32], strides = [1, 1]} : vector<8x128xf32> to vector<8x32xf32>
    %276 = arith.mulf %274, %275 : vector<8x32xf32>
    %277 = arith.addf %273, %276 : vector<8x32xf32>
    %278 = vector.broadcast %263 : vector<8x1xf32> to vector<8x32xf32>
    %279 = arith.mulf %277, %278 : vector<8x32xf32>
    %280 = vector.extract_strided_slice %270 {offsets = [0, 96], sizes = [8, 32], strides = [1, 1]} : vector<8x128xf32> to vector<8x32xf32>
    %281 = math.tanh %279 : vector<8x32xf32>
    %282 = arith.mulf %280, %281 : vector<8x32xf32>
    %283 = vector.broadcast %263 : vector<8x1xf32> to vector<8x32xf32>
    %284 = arith.mulf %282, %283 : vector<8x32xf32>
    %285 = vector.extract_strided_slice %0 {offsets = [0, 2], sizes = [8, 1], strides = [1, 1]} : vector<8x8xf32> to vector<8x1xf32>
    %cst_78 = arith.constant dense<0.000000e+00> : vector<8x128xf32>
    %286 = tpu.matmul %258, %16, %cst_78 {dimension_numbers = #tpu.dot_dimension_numbers<[1], [0], [0], [1], [0, 0, 1, 1], [], []>} : vector<8x32xf32>, vector<32x128xf32>, vector<8x128xf32> -> vector<8x128xf32>
    %287 = arith.addf %262, %286 : vector<8x128xf32>
    %288 = arith.negf %287 : vector<8x128xf32>
    %289 = math.exp %288 : vector<8x128xf32>
    %cst_79 = arith.constant 1.000000e+00 : f32
    %290 = vector.broadcast %cst_79 : f32 to vector<8x128xf32>
    %291 = arith.addf %290, %289 : vector<8x128xf32>
    %292 = arith.divf %290, %291 : vector<8x128xf32>
    %293 = math.tanh %287 : vector<8x128xf32>
    %294 = vector.extract_strided_slice %292 {offsets = [0, 32], sizes = [8, 32], strides = [1, 1]} : vector<8x128xf32> to vector<8x32xf32>
    %295 = arith.mulf %294, %253 : vector<8x32xf32>
    %296 = vector.extract_strided_slice %292 {offsets = [0, 0], sizes = [8, 32], strides = [1, 1]} : vector<8x128xf32> to vector<8x32xf32>
    %297 = vector.extract_strided_slice %293 {offsets = [0, 64], sizes = [8, 32], strides = [1, 1]} : vector<8x128xf32> to vector<8x32xf32>
    %298 = arith.mulf %296, %297 : vector<8x32xf32>
    %299 = arith.addf %295, %298 : vector<8x32xf32>
    %300 = vector.broadcast %285 : vector<8x1xf32> to vector<8x32xf32>
    %301 = arith.mulf %299, %300 : vector<8x32xf32>
    %302 = vector.extract_strided_slice %292 {offsets = [0, 96], sizes = [8, 32], strides = [1, 1]} : vector<8x128xf32> to vector<8x32xf32>
    %303 = math.tanh %301 : vector<8x32xf32>
    %304 = arith.mulf %302, %303 : vector<8x32xf32>
    %305 = vector.broadcast %285 : vector<8x1xf32> to vector<8x32xf32>
    %306 = arith.mulf %304, %305 : vector<8x32xf32>
    %c40_80 = arith.constant 40 : index
    %c0_81 = arith.constant 0 : index
    %307 = vector.load %arg11[%c40_80, %c0_81] : memref<64x32xf32, #tpu.memory_space<vmem>>, vector<8x32xf32>
    tpu.vector_store %arg11[%c40_80, %c0_81], %284 {strides = array<i32>} : memref<64x32xf32, #tpu.memory_space<vmem>>, vector<8x32xf32>,
    %c16_82 = arith.constant 16 : index
    %c0_83 = arith.constant 0 : index
    %308 = vector.load %arg12[%c16_82, %c0_83] : memref<64x32xf32, #tpu.memory_space<vmem>>, vector<8x32xf32>
    tpu.vector_store %arg12[%c16_82, %c0_83], %306 {strides = array<i32>} : memref<64x32xf32, #tpu.memory_space<vmem>>, vector<8x32xf32>,
    %c48_84 = arith.constant 48 : index
    %c0_85 = arith.constant 0 : index
    %309 = vector.load %arg10[%c48_84, %c0_85] : memref<64x256xf32, #tpu.memory_space<vmem>>, vector<8x128xf32>
    %c8_86 = arith.constant 8 : index
    %c128_87 = arith.constant 128 : index
    %310 = vector.load %arg10[%c8_86, %c128_87] : memref<64x256xf32, #tpu.memory_space<vmem>>, vector<8x128xf32>
    %311 = vector.extract_strided_slice %0 {offsets = [0, 6], sizes = [8, 1], strides = [1, 1]} : vector<8x8xf32> to vector<8x1xf32>
    %cst_88 = arith.constant dense<0.000000e+00> : vector<8x128xf32>
    %312 = tpu.matmul %284, %15, %cst_88 {dimension_numbers = #tpu.dot_dimension_numbers<[1], [0], [0], [1], [0, 0, 1, 1], [], []>} : vector<8x32xf32>, vector<32x128xf32>, vector<8x128xf32> -> vector<8x128xf32>
    %313 = arith.addf %309, %312 : vector<8x128xf32>
    %314 = arith.negf %313 : vector<8x128xf32>
    %315 = math.exp %314 : vector<8x128xf32>
    %cst_89 = arith.constant 1.000000e+00 : f32
    %316 = vector.broadcast %cst_89 : f32 to vector<8x128xf32>
    %317 = arith.addf %316, %315 : vector<8x128xf32>
    %318 = arith.divf %316, %317 : vector<8x128xf32>
    %319 = math.tanh %313 : vector<8x128xf32>
    %320 = vector.extract_strided_slice %318 {offsets = [0, 32], sizes = [8, 32], strides = [1, 1]} : vector<8x128xf32> to vector<8x32xf32>
    %321 = arith.mulf %320, %279 : vector<8x32xf32>
    %322 = vector.extract_strided_slice %318 {offsets = [0, 0], sizes = [8, 32], strides = [1, 1]} : vector<8x128xf32> to vector<8x32xf32>
    %323 = vector.extract_strided_slice %319 {offsets = [0, 64], sizes = [8, 32], strides = [1, 1]} : vector<8x128xf32> to vector<8x32xf32>
    %324 = arith.mulf %322, %323 : vector<8x32xf32>
    %325 = arith.addf %321, %324 : vector<8x32xf32>
    %326 = vector.broadcast %311 : vector<8x1xf32> to vector<8x32xf32>
    %327 = arith.mulf %325, %326 : vector<8x32xf32>
    %328 = vector.extract_strided_slice %318 {offsets = [0, 96], sizes = [8, 32], strides = [1, 1]} : vector<8x128xf32> to vector<8x32xf32>
    %329 = math.tanh %327 : vector<8x32xf32>
    %330 = arith.mulf %328, %329 : vector<8x32xf32>
    %331 = vector.broadcast %311 : vector<8x1xf32> to vector<8x32xf32>
    %332 = arith.mulf %330, %331 : vector<8x32xf32>
    %333 = vector.extract_strided_slice %0 {offsets = [0, 1], sizes = [8, 1], strides = [1, 1]} : vector<8x8xf32> to vector<8x1xf32>
    %cst_90 = arith.constant dense<0.000000e+00> : vector<8x128xf32>
    %334 = tpu.matmul %306, %16, %cst_90 {dimension_numbers = #tpu.dot_dimension_numbers<[1], [0], [0], [1], [0, 0, 1, 1], [], []>} : vector<8x32xf32>, vector<32x128xf32>, vector<8x128xf32> -> vector<8x128xf32>
    %335 = arith.addf %310, %334 : vector<8x128xf32>
    %336 = arith.negf %335 : vector<8x128xf32>
    %337 = math.exp %336 : vector<8x128xf32>
    %cst_91 = arith.constant 1.000000e+00 : f32
    %338 = vector.broadcast %cst_91 : f32 to vector<8x128xf32>
    %339 = arith.addf %338, %337 : vector<8x128xf32>
    %340 = arith.divf %338, %339 : vector<8x128xf32>
    %341 = math.tanh %335 : vector<8x128xf32>
    %342 = vector.extract_strided_slice %340 {offsets = [0, 32], sizes = [8, 32], strides = [1, 1]} : vector<8x128xf32> to vector<8x32xf32>
    %343 = arith.mulf %342, %301 : vector<8x32xf32>
    %344 = vector.extract_strided_slice %340 {offsets = [0, 0], sizes = [8, 32], strides = [1, 1]} : vector<8x128xf32> to vector<8x32xf32>
    %345 = vector.extract_strided_slice %341 {offsets = [0, 64], sizes = [8, 32], strides = [1, 1]} : vector<8x128xf32> to vector<8x32xf32>
    %346 = arith.mulf %344, %345 : vector<8x32xf32>
    %347 = arith.addf %343, %346 : vector<8x32xf32>
    %348 = vector.broadcast %333 : vector<8x1xf32> to vector<8x32xf32>
    %349 = arith.mulf %347, %348 : vector<8x32xf32>
    %350 = vector.extract_strided_slice %340 {offsets = [0, 96], sizes = [8, 32], strides = [1, 1]} : vector<8x128xf32> to vector<8x32xf32>
    %351 = math.tanh %349 : vector<8x32xf32>
    %352 = arith.mulf %350, %351 : vector<8x32xf32>
    %353 = vector.broadcast %333 : vector<8x1xf32> to vector<8x32xf32>
    %354 = arith.mulf %352, %353 : vector<8x32xf32>
    %c48_92 = arith.constant 48 : index
    %c0_93 = arith.constant 0 : index
    %355 = vector.load %arg11[%c48_92, %c0_93] : memref<64x32xf32, #tpu.memory_space<vmem>>, vector<8x32xf32>
    tpu.vector_store %arg11[%c48_92, %c0_93], %332 {strides = array<i32>} : memref<64x32xf32, #tpu.memory_space<vmem>>, vector<8x32xf32>,
    %c8_94 = arith.constant 8 : index
    %c0_95 = arith.constant 0 : index
    %356 = vector.load %arg12[%c8_94, %c0_95] : memref<64x32xf32, #tpu.memory_space<vmem>>, vector<8x32xf32>
    tpu.vector_store %arg12[%c8_94, %c0_95], %354 {strides = array<i32>} : memref<64x32xf32, #tpu.memory_space<vmem>>, vector<8x32xf32>,
    %c56_96 = arith.constant 56 : index
    %c0_97 = arith.constant 0 : index
    %357 = vector.load %arg10[%c56_96, %c0_97] : memref<64x256xf32, #tpu.memory_space<vmem>>, vector<8x128xf32>
    %c0_98 = arith.constant 0 : index
    %c128_99 = arith.constant 128 : index
    %358 = vector.load %arg10[%c0_98, %c128_99] : memref<64x256xf32, #tpu.memory_space<vmem>>, vector<8x128xf32>
    %359 = vector.extract_strided_slice %0 {offsets = [0, 7], sizes = [8, 1], strides = [1, 1]} : vector<8x8xf32> to vector<8x1xf32>
    %cst_100 = arith.constant dense<0.000000e+00> : vector<8x128xf32>
    %360 = tpu.matmul %332, %15, %cst_100 {dimension_numbers = #tpu.dot_dimension_numbers<[1], [0], [0], [1], [0, 0, 1, 1], [], []>} : vector<8x32xf32>, vector<32x128xf32>, vector<8x128xf32> -> vector<8x128xf32>
    %361 = arith.addf %357, %360 : vector<8x128xf32>
    %362 = arith.negf %361 : vector<8x128xf32>
    %363 = math.exp %362 : vector<8x128xf32>
    %cst_101 = arith.constant 1.000000e+00 : f32
    %364 = vector.broadcast %cst_101 : f32 to vector<8x128xf32>
    %365 = arith.addf %364, %363 : vector<8x128xf32>
    %366 = arith.divf %364, %365 : vector<8x128xf32>
    %367 = math.tanh %361 : vector<8x128xf32>
    %368 = vector.extract_strided_slice %366 {offsets = [0, 32], sizes = [8, 32], strides = [1, 1]} : vector<8x128xf32> to vector<8x32xf32>
    %369 = arith.mulf %368, %327 : vector<8x32xf32>
    %370 = vector.extract_strided_slice %366 {offsets = [0, 0], sizes = [8, 32], strides = [1, 1]} : vector<8x128xf32> to vector<8x32xf32>
    %371 = vector.extract_strided_slice %367 {offsets = [0, 64], sizes = [8, 32], strides = [1, 1]} : vector<8x128xf32> to vector<8x32xf32>
    %372 = arith.mulf %370, %371 : vector<8x32xf32>
    %373 = arith.addf %369, %372 : vector<8x32xf32>
    %374 = vector.broadcast %359 : vector<8x1xf32> to vector<8x32xf32>
    %375 = arith.mulf %373, %374 : vector<8x32xf32>
    %376 = vector.extract_strided_slice %366 {offsets = [0, 96], sizes = [8, 32], strides = [1, 1]} : vector<8x128xf32> to vector<8x32xf32>
    %377 = math.tanh %375 : vector<8x32xf32>
    %378 = arith.mulf %376, %377 : vector<8x32xf32>
    %379 = vector.broadcast %359 : vector<8x1xf32> to vector<8x32xf32>
    %380 = arith.mulf %378, %379 : vector<8x32xf32>
    %381 = vector.extract_strided_slice %0 {offsets = [0, 0], sizes = [8, 1], strides = [1, 1]} : vector<8x8xf32> to vector<8x1xf32>
    %cst_102 = arith.constant dense<0.000000e+00> : vector<8x128xf32>
    %382 = tpu.matmul %354, %16, %cst_102 {dimension_numbers = #tpu.dot_dimension_numbers<[1], [0], [0], [1], [0, 0, 1, 1], [], []>} : vector<8x32xf32>, vector<32x128xf32>, vector<8x128xf32> -> vector<8x128xf32>
    %383 = arith.addf %358, %382 : vector<8x128xf32>
    %384 = arith.negf %383 : vector<8x128xf32>
    %385 = math.exp %384 : vector<8x128xf32>
    %cst_103 = arith.constant 1.000000e+00 : f32
    %386 = vector.broadcast %cst_103 : f32 to vector<8x128xf32>
    %387 = arith.addf %386, %385 : vector<8x128xf32>
    %388 = arith.divf %386, %387 : vector<8x128xf32>
    %389 = math.tanh %383 : vector<8x128xf32>
    %390 = vector.extract_strided_slice %388 {offsets = [0, 32], sizes = [8, 32], strides = [1, 1]} : vector<8x128xf32> to vector<8x32xf32>
    %391 = arith.mulf %390, %349 : vector<8x32xf32>
    %392 = vector.extract_strided_slice %388 {offsets = [0, 0], sizes = [8, 32], strides = [1, 1]} : vector<8x128xf32> to vector<8x32xf32>
    %393 = vector.extract_strided_slice %389 {offsets = [0, 64], sizes = [8, 32], strides = [1, 1]} : vector<8x128xf32> to vector<8x32xf32>
    %394 = arith.mulf %392, %393 : vector<8x32xf32>
    %395 = arith.addf %391, %394 : vector<8x32xf32>
    %396 = vector.broadcast %381 : vector<8x1xf32> to vector<8x32xf32>
    %397 = arith.mulf %395, %396 : vector<8x32xf32>
    %398 = vector.extract_strided_slice %388 {offsets = [0, 96], sizes = [8, 32], strides = [1, 1]} : vector<8x128xf32> to vector<8x32xf32>
    %399 = math.tanh %397 : vector<8x32xf32>
    %400 = arith.mulf %398, %399 : vector<8x32xf32>
    %401 = vector.broadcast %381 : vector<8x1xf32> to vector<8x32xf32>
    %402 = arith.mulf %400, %401 : vector<8x32xf32>
    %c56_104 = arith.constant 56 : index
    %c0_105 = arith.constant 0 : index
    %403 = vector.load %arg11[%c56_104, %c0_105] : memref<64x32xf32, #tpu.memory_space<vmem>>, vector<8x32xf32>
    tpu.vector_store %arg11[%c56_104, %c0_105], %380 {strides = array<i32>} : memref<64x32xf32, #tpu.memory_space<vmem>>, vector<8x32xf32>,
    %c0_106 = arith.constant 0 : index
    %c0_107 = arith.constant 0 : index
    %404 = vector.load %arg12[%c0_106, %c0_107] : memref<64x32xf32, #tpu.memory_space<vmem>>, vector<8x32xf32>
    tpu.vector_store %arg12[%c0_106, %c0_107], %402 {strides = array<i32>} : memref<64x32xf32, #tpu.memory_space<vmem>>, vector<8x32xf32>,
    %c0_108 = arith.constant 0 : index
    %c0_109 = arith.constant 0 : index
    %405 = vector.load %arg7[%c0_108, %c0_109] : memref<8x64xf32, #tpu.memory_space<vmem>>, vector<8x64xf32>
    %c0_110 = arith.constant 0 : index
    %c0_111 = arith.constant 0 : index
    %406 = vector.load %arg11[%c0_110, %c0_111] : memref<64x32xf32, #tpu.memory_space<vmem>>, vector<64x32xf32>
    %407 = vector.extract_strided_slice %405 {offsets = [0, 0], sizes = [8, 32], strides = [1, 1]} : vector<8x64xf32> to vector<8x32xf32>
    %cst_112 = arith.constant dense<0.000000e+00> : vector<64x8xf32>
    %408 = tpu.matmul %406, %407, %cst_112 {dimension_numbers = #tpu.dot_dimension_numbers<[1], [1], [0], [0], [0, 0, 1, 0], [], []>} : vector<64x32xf32>, vector<8x32xf32>, vector<64x8xf32> -> vector<64x8xf32>
    %c0_113 = arith.constant 0 : index
    %c0_114 = arith.constant 0 : index
    %409 = vector.load %arg12[%c0_113, %c0_114] : memref<64x32xf32, #tpu.memory_space<vmem>>, vector<64x32xf32>
    %410 = vector.extract_strided_slice %405 {offsets = [0, 32], sizes = [8, 32], strides = [1, 1]} : vector<8x64xf32> to vector<8x32xf32>
    %cst_115 = arith.constant dense<0.000000e+00> : vector<64x8xf32>
    %411 = tpu.matmul %409, %410, %cst_115 {dimension_numbers = #tpu.dot_dimension_numbers<[1], [1], [0], [0], [0, 0, 1, 0], [], []>} : vector<64x32xf32>, vector<8x32xf32>, vector<64x8xf32> -> vector<64x8xf32>
    %412 = arith.addf %408, %411 : vector<64x8xf32>
    %c8_116 = arith.constant 8 : index
    %c0_117 = arith.constant 0 : index
    %413 = vector.load %arg8[%c8_116, %c0_117] : memref<9x8xf32, #tpu.memory_space<vmem>>, vector<1x8xf32>
    %414 = vector.broadcast %413 : vector<1x8xf32> to vector<64x8xf32>
    %415 = arith.addf %412, %414 : vector<64x8xf32>
    %c0_118 = arith.constant 0 : index
    %c0_119 = arith.constant 0 : index
    %416 = vector.load %arg8[%c0_118, %c0_119] : memref<9x8xf32, #tpu.memory_space<vmem>>, vector<8x8xf32>
    %417 = vector.shape_cast %416 : vector<8x8xf32> to vector<1x8x8xf32>
    %418 = vector.shape_cast %417 : vector<1x8x8xf32> to vector<1x8x8xf32>
    %419 = vector.broadcast %418 : vector<1x8x8xf32> to vector<8x8x8xf32>
    %420 = tpu.iota {dimensions = array<i32: 1>} : vector<8x8x8xi32>
    %421 = vector.extract_strided_slice %415 {offsets = [0, 0], sizes = [8, 8], strides = [1, 1]} : vector<64x8xf32> to vector<8x8xf32>
    %422 = vector.extract_strided_slice %416 {offsets = [6, 0], sizes = [1, 8], strides = [1, 1]} : vector<8x8xf32> to vector<1x8xf32>
    %423 = vector.broadcast %422 : vector<1x8xf32> to vector<8x8xf32>
    %424 = arith.addf %421, %423 : vector<8x8xf32>
    %425 = vector.shape_cast %424 : vector<8x8xf32> to vector<8x8x1xf32>
    %426 = vector.broadcast %425 : vector<8x8x1xf32> to vector<8x8x8xf32>
    %427 = arith.addf %419, %426 : vector<8x8x8xf32>
    %cst_120 = arith.constant dense<0xFF800000> : vector<8x8xf32>
    %428 = vector.multi_reduction <maximumf>, %427, %cst_120 [1] : vector<8x8x8xf32> to vector<8x8xf32>
    %429 = vector.shape_cast %428 : vector<8x8xf32> to vector<8x1x8xf32>
    %430 = vector.broadcast %429 : vector<8x1x8xf32> to vector<8x8x8xf32>
    %431 = arith.cmpf oeq, %427, %430 : vector<8x8x8xf32>
    %c8_i32 = arith.constant 8 : i32
    %432 = vector.broadcast %c8_i32 : i32 to vector<8x8x8xi32>
    %433 = arith.select %431, %420, %432 : vector<8x8x8xi1>, vector<8x8x8xi32>
    %cst_121 = arith.constant dense<2147483647> : vector<8x8xi32>
    %434 = vector.multi_reduction <minsi>, %433, %cst_121 [1] : vector<8x8x8xi32> to vector<8x8xi32>
    %435 = vector.extract_strided_slice %0 {offsets = [0, 1], sizes = [8, 1], strides = [1, 1]} : vector<8x8xf32> to vector<8x1xf32>
    %cst_122 = arith.constant 0.000000e+00 : f32
    %436 = vector.broadcast %cst_122 : f32 to vector<8x1xf32>
    %437 = arith.cmpf ogt, %435, %436 : vector<8x1xf32>
    %c0_i32 = arith.constant 0 : i32
    %438 = vector.shape_cast %437 : vector<8x1xi1> to vector<8x1xi1>
    %439 = vector.broadcast %438 : vector<8x1xi1> to vector<8x8xi1>
    %440 = vector.broadcast %c0_i32 : i32 to vector<8x8xi32>
    %441 = arith.select %439, %434, %440 : vector<8x8xi1>, vector<8x8xi32>
    %442 = vector.extract_strided_slice %415 {offsets = [8, 0], sizes = [8, 8], strides = [1, 1]} : vector<64x8xf32> to vector<8x8xf32>
    %443 = arith.addf %442, %428 : vector<8x8xf32>
    %444 = vector.shape_cast %437 : vector<8x1xi1> to vector<8x1xi1>
    %445 = vector.broadcast %444 : vector<8x1xi1> to vector<8x8xi1>
    %446 = arith.select %445, %443, %424 : vector<8x8xi1>, vector<8x8xf32>
    %447 = vector.shape_cast %446 : vector<8x8xf32> to vector<8x8x1xf32>
    %448 = vector.broadcast %447 : vector<8x8x1xf32> to vector<8x8x8xf32>
    %449 = arith.addf %419, %448 : vector<8x8x8xf32>
    %cst_123 = arith.constant dense<0xFF800000> : vector<8x8xf32>
    %450 = vector.multi_reduction <maximumf>, %449, %cst_123 [1] : vector<8x8x8xf32> to vector<8x8xf32>
    %451 = vector.shape_cast %450 : vector<8x8xf32> to vector<8x1x8xf32>
    %452 = vector.broadcast %451 : vector<8x1x8xf32> to vector<8x8x8xf32>
    %453 = arith.cmpf oeq, %449, %452 : vector<8x8x8xf32>
    %c8_i32_124 = arith.constant 8 : i32
    %454 = vector.broadcast %c8_i32_124 : i32 to vector<8x8x8xi32>
    %455 = arith.select %453, %420, %454 : vector<8x8x8xi1>, vector<8x8x8xi32>
    %cst_125 = arith.constant dense<2147483647> : vector<8x8xi32>
    %456 = vector.multi_reduction <minsi>, %455, %cst_125 [1] : vector<8x8x8xi32> to vector<8x8xi32>
    %457 = vector.extract_strided_slice %0 {offsets = [0, 2], sizes = [8, 1], strides = [1, 1]} : vector<8x8xf32> to vector<8x1xf32>
    %cst_126 = arith.constant 0.000000e+00 : f32
    %458 = vector.broadcast %cst_126 : f32 to vector<8x1xf32>
    %459 = arith.cmpf ogt, %457, %458 : vector<8x1xf32>
    %c0_i32_127 = arith.constant 0 : i32
    %460 = vector.shape_cast %459 : vector<8x1xi1> to vector<8x1xi1>
    %461 = vector.broadcast %460 : vector<8x1xi1> to vector<8x8xi1>
    %462 = vector.broadcast %c0_i32_127 : i32 to vector<8x8xi32>
    %463 = arith.select %461, %456, %462 : vector<8x8xi1>, vector<8x8xi32>
    %464 = vector.extract_strided_slice %415 {offsets = [16, 0], sizes = [8, 8], strides = [1, 1]} : vector<64x8xf32> to vector<8x8xf32>
    %465 = arith.addf %464, %450 : vector<8x8xf32>
    %466 = vector.shape_cast %459 : vector<8x1xi1> to vector<8x1xi1>
    %467 = vector.broadcast %466 : vector<8x1xi1> to vector<8x8xi1>
    %468 = arith.select %467, %465, %446 : vector<8x8xi1>, vector<8x8xf32>
    %469 = vector.shape_cast %468 : vector<8x8xf32> to vector<8x8x1xf32>
    %470 = vector.broadcast %469 : vector<8x8x1xf32> to vector<8x8x8xf32>
    %471 = arith.addf %419, %470 : vector<8x8x8xf32>
    %cst_128 = arith.constant dense<0xFF800000> : vector<8x8xf32>
    %472 = vector.multi_reduction <maximumf>, %471, %cst_128 [1] : vector<8x8x8xf32> to vector<8x8xf32>
    %473 = vector.shape_cast %472 : vector<8x8xf32> to vector<8x1x8xf32>
    %474 = vector.broadcast %473 : vector<8x1x8xf32> to vector<8x8x8xf32>
    %475 = arith.cmpf oeq, %471, %474 : vector<8x8x8xf32>
    %c8_i32_129 = arith.constant 8 : i32
    %476 = vector.broadcast %c8_i32_129 : i32 to vector<8x8x8xi32>
    %477 = arith.select %475, %420, %476 : vector<8x8x8xi1>, vector<8x8x8xi32>
    %cst_130 = arith.constant dense<2147483647> : vector<8x8xi32>
    %478 = vector.multi_reduction <minsi>, %477, %cst_130 [1] : vector<8x8x8xi32> to vector<8x8xi32>
    %479 = vector.extract_strided_slice %0 {offsets = [0, 3], sizes = [8, 1], strides = [1, 1]} : vector<8x8xf32> to vector<8x1xf32>
    %cst_131 = arith.constant 0.000000e+00 : f32
    %480 = vector.broadcast %cst_131 : f32 to vector<8x1xf32>
    %481 = arith.cmpf ogt, %479, %480 : vector<8x1xf32>
    %c0_i32_132 = arith.constant 0 : i32
    %482 = vector.shape_cast %481 : vector<8x1xi1> to vector<8x1xi1>
    %483 = vector.broadcast %482 : vector<8x1xi1> to vector<8x8xi1>
    %484 = vector.broadcast %c0_i32_132 : i32 to vector<8x8xi32>
    %485 = arith.select %483, %478, %484 : vector<8x8xi1>, vector<8x8xi32>
    %486 = vector.extract_strided_slice %415 {offsets = [24, 0], sizes = [8, 8], strides = [1, 1]} : vector<64x8xf32> to vector<8x8xf32>
    %487 = arith.addf %486, %472 : vector<8x8xf32>
    %488 = vector.shape_cast %481 : vector<8x1xi1> to vector<8x1xi1>
    %489 = vector.broadcast %488 : vector<8x1xi1> to vector<8x8xi1>
    %490 = arith.select %489, %487, %468 : vector<8x8xi1>, vector<8x8xf32>
    %491 = vector.shape_cast %490 : vector<8x8xf32> to vector<8x8x1xf32>
    %492 = vector.broadcast %491 : vector<8x8x1xf32> to vector<8x8x8xf32>
    %493 = arith.addf %419, %492 : vector<8x8x8xf32>
    %cst_133 = arith.constant dense<0xFF800000> : vector<8x8xf32>
    %494 = vector.multi_reduction <maximumf>, %493, %cst_133 [1] : vector<8x8x8xf32> to vector<8x8xf32>
    %495 = vector.shape_cast %494 : vector<8x8xf32> to vector<8x1x8xf32>
    %496 = vector.broadcast %495 : vector<8x1x8xf32> to vector<8x8x8xf32>
    %497 = arith.cmpf oeq, %493, %496 : vector<8x8x8xf32>
    %c8_i32_134 = arith.constant 8 : i32
    %498 = vector.broadcast %c8_i32_134 : i32 to vector<8x8x8xi32>
    %499 = arith.select %497, %420, %498 : vector<8x8x8xi1>, vector<8x8x8xi32>
    %cst_135 = arith.constant dense<2147483647> : vector<8x8xi32>
    %500 = vector.multi_reduction <minsi>, %499, %cst_135 [1] : vector<8x8x8xi32> to vector<8x8xi32>
    %501 = vector.extract_strided_slice %0 {offsets = [0, 4], sizes = [8, 1], strides = [1, 1]} : vector<8x8xf32> to vector<8x1xf32>
    %cst_136 = arith.constant 0.000000e+00 : f32
    %502 = vector.broadcast %cst_136 : f32 to vector<8x1xf32>
    %503 = arith.cmpf ogt, %501, %502 : vector<8x1xf32>
    %c0_i32_137 = arith.constant 0 : i32
    %504 = vector.shape_cast %503 : vector<8x1xi1> to vector<8x1xi1>
    %505 = vector.broadcast %504 : vector<8x1xi1> to vector<8x8xi1>
    %506 = vector.broadcast %c0_i32_137 : i32 to vector<8x8xi32>
    %507 = arith.select %505, %500, %506 : vector<8x8xi1>, vector<8x8xi32>
    %508 = vector.extract_strided_slice %415 {offsets = [32, 0], sizes = [8, 8], strides = [1, 1]} : vector<64x8xf32> to vector<8x8xf32>
    %509 = arith.addf %508, %494 : vector<8x8xf32>
    %510 = vector.shape_cast %503 : vector<8x1xi1> to vector<8x1xi1>
    %511 = vector.broadcast %510 : vector<8x1xi1> to vector<8x8xi1>
    %512 = arith.select %511, %509, %490 : vector<8x8xi1>, vector<8x8xf32>
    %513 = vector.shape_cast %512 : vector<8x8xf32> to vector<8x8x1xf32>
    %514 = vector.broadcast %513 : vector<8x8x1xf32> to vector<8x8x8xf32>
    %515 = arith.addf %419, %514 : vector<8x8x8xf32>
    %cst_138 = arith.constant dense<0xFF800000> : vector<8x8xf32>
    %516 = vector.multi_reduction <maximumf>, %515, %cst_138 [1] : vector<8x8x8xf32> to vector<8x8xf32>
    %517 = vector.shape_cast %516 : vector<8x8xf32> to vector<8x1x8xf32>
    %518 = vector.broadcast %517 : vector<8x1x8xf32> to vector<8x8x8xf32>
    %519 = arith.cmpf oeq, %515, %518 : vector<8x8x8xf32>
    %c8_i32_139 = arith.constant 8 : i32
    %520 = vector.broadcast %c8_i32_139 : i32 to vector<8x8x8xi32>
    %521 = arith.select %519, %420, %520 : vector<8x8x8xi1>, vector<8x8x8xi32>
    %cst_140 = arith.constant dense<2147483647> : vector<8x8xi32>
    %522 = vector.multi_reduction <minsi>, %521, %cst_140 [1] : vector<8x8x8xi32> to vector<8x8xi32>
    %523 = vector.extract_strided_slice %0 {offsets = [0, 5], sizes = [8, 1], strides = [1, 1]} : vector<8x8xf32> to vector<8x1xf32>
    %cst_141 = arith.constant 0.000000e+00 : f32
    %524 = vector.broadcast %cst_141 : f32 to vector<8x1xf32>
    %525 = arith.cmpf ogt, %523, %524 : vector<8x1xf32>
    %c0_i32_142 = arith.constant 0 : i32
    %526 = vector.shape_cast %525 : vector<8x1xi1> to vector<8x1xi1>
    %527 = vector.broadcast %526 : vector<8x1xi1> to vector<8x8xi1>
    %528 = vector.broadcast %c0_i32_142 : i32 to vector<8x8xi32>
    %529 = arith.select %527, %522, %528 : vector<8x8xi1>, vector<8x8xi32>
    %530 = vector.extract_strided_slice %415 {offsets = [40, 0], sizes = [8, 8], strides = [1, 1]} : vector<64x8xf32> to vector<8x8xf32>
    %531 = arith.addf %530, %516 : vector<8x8xf32>
    %532 = vector.shape_cast %525 : vector<8x1xi1> to vector<8x1xi1>
    %533 = vector.broadcast %532 : vector<8x1xi1> to vector<8x8xi1>
    %534 = arith.select %533, %531, %512 : vector<8x8xi1>, vector<8x8xf32>
    %535 = vector.shape_cast %534 : vector<8x8xf32> to vector<8x8x1xf32>
    %536 = vector.broadcast %535 : vector<8x8x1xf32> to vector<8x8x8xf32>
    %537 = arith.addf %419, %536 : vector<8x8x8xf32>
    %cst_143 = arith.constant dense<0xFF800000> : vector<8x8xf32>
    %538 = vector.multi_reduction <maximumf>, %537, %cst_143 [1] : vector<8x8x8xf32> to vector<8x8xf32>
    %539 = vector.shape_cast %538 : vector<8x8xf32> to vector<8x1x8xf32>
    %540 = vector.broadcast %539 : vector<8x1x8xf32> to vector<8x8x8xf32>
    %541 = arith.cmpf oeq, %537, %540 : vector<8x8x8xf32>
    %c8_i32_144 = arith.constant 8 : i32
    %542 = vector.broadcast %c8_i32_144 : i32 to vector<8x8x8xi32>
    %543 = arith.select %541, %420, %542 : vector<8x8x8xi1>, vector<8x8x8xi32>
    %cst_145 = arith.constant dense<2147483647> : vector<8x8xi32>
    %544 = vector.multi_reduction <minsi>, %543, %cst_145 [1] : vector<8x8x8xi32> to vector<8x8xi32>
    %545 = vector.extract_strided_slice %0 {offsets = [0, 6], sizes = [8, 1], strides = [1, 1]} : vector<8x8xf32> to vector<8x1xf32>
    %cst_146 = arith.constant 0.000000e+00 : f32
    %546 = vector.broadcast %cst_146 : f32 to vector<8x1xf32>
    %547 = arith.cmpf ogt, %545, %546 : vector<8x1xf32>
    %c0_i32_147 = arith.constant 0 : i32
    %548 = vector.shape_cast %547 : vector<8x1xi1> to vector<8x1xi1>
    %549 = vector.broadcast %548 : vector<8x1xi1> to vector<8x8xi1>
    %550 = vector.broadcast %c0_i32_147 : i32 to vector<8x8xi32>
    %551 = arith.select %549, %544, %550 : vector<8x8xi1>, vector<8x8xi32>
    %552 = vector.extract_strided_slice %415 {offsets = [48, 0], sizes = [8, 8], strides = [1, 1]} : vector<64x8xf32> to vector<8x8xf32>
    %553 = arith.addf %552, %538 : vector<8x8xf32>
    %554 = vector.shape_cast %547 : vector<8x1xi1> to vector<8x1xi1>
    %555 = vector.broadcast %554 : vector<8x1xi1> to vector<8x8xi1>
    %556 = arith.select %555, %553, %534 : vector<8x8xi1>, vector<8x8xf32>
    %557 = vector.shape_cast %556 : vector<8x8xf32> to vector<8x8x1xf32>
    %558 = vector.broadcast %557 : vector<8x8x1xf32> to vector<8x8x8xf32>
    %559 = arith.addf %419, %558 : vector<8x8x8xf32>
    %cst_148 = arith.constant dense<0xFF800000> : vector<8x8xf32>
    %560 = vector.multi_reduction <maximumf>, %559, %cst_148 [1] : vector<8x8x8xf32> to vector<8x8xf32>
    %561 = vector.shape_cast %560 : vector<8x8xf32> to vector<8x1x8xf32>
    %562 = vector.broadcast %561 : vector<8x1x8xf32> to vector<8x8x8xf32>
    %563 = arith.cmpf oeq, %559, %562 : vector<8x8x8xf32>
    %c8_i32_149 = arith.constant 8 : i32
    %564 = vector.broadcast %c8_i32_149 : i32 to vector<8x8x8xi32>
    %565 = arith.select %563, %420, %564 : vector<8x8x8xi1>, vector<8x8x8xi32>
    %cst_150 = arith.constant dense<2147483647> : vector<8x8xi32>
    %566 = vector.multi_reduction <minsi>, %565, %cst_150 [1] : vector<8x8x8xi32> to vector<8x8xi32>
    %567 = vector.extract_strided_slice %0 {offsets = [0, 7], sizes = [8, 1], strides = [1, 1]} : vector<8x8xf32> to vector<8x1xf32>
    %cst_151 = arith.constant 0.000000e+00 : f32
    %568 = vector.broadcast %cst_151 : f32 to vector<8x1xf32>
    %569 = arith.cmpf ogt, %567, %568 : vector<8x1xf32>
    %c0_i32_152 = arith.constant 0 : i32
    %570 = vector.shape_cast %569 : vector<8x1xi1> to vector<8x1xi1>
    %571 = vector.broadcast %570 : vector<8x1xi1> to vector<8x8xi1>
    %572 = vector.broadcast %c0_i32_152 : i32 to vector<8x8xi32>
    %573 = arith.select %571, %566, %572 : vector<8x8xi1>, vector<8x8xi32>
    %574 = vector.extract_strided_slice %415 {offsets = [56, 0], sizes = [8, 8], strides = [1, 1]} : vector<64x8xf32> to vector<8x8xf32>
    %575 = arith.addf %574, %560 : vector<8x8xf32>
    %576 = vector.shape_cast %569 : vector<8x1xi1> to vector<8x1xi1>
    %577 = vector.broadcast %576 : vector<8x1xi1> to vector<8x8xi1>
    %578 = arith.select %577, %575, %556 : vector<8x8xi1>, vector<8x8xf32>
    %579 = vector.shape_cast %578 : vector<8x8xf32> to vector<8x8x1xf32>
    %580 = vector.broadcast %579 : vector<8x8x1xf32> to vector<8x8x8xf32>
    %581 = arith.addf %419, %580 : vector<8x8x8xf32>
    %cst_153 = arith.constant dense<0xFF800000> : vector<8x8xf32>
    %582 = vector.multi_reduction <maximumf>, %581, %cst_153 [1] : vector<8x8x8xf32> to vector<8x8xf32>
    %583 = vector.shape_cast %582 : vector<8x8xf32> to vector<8x1x8xf32>
    %584 = vector.broadcast %583 : vector<8x1x8xf32> to vector<8x8x8xf32>
    %585 = arith.cmpf oeq, %581, %584 : vector<8x8x8xf32>
    %c8_i32_154 = arith.constant 8 : i32
    %586 = vector.broadcast %c8_i32_154 : i32 to vector<8x8x8xi32>
    %587 = arith.select %585, %420, %586 : vector<8x8x8xi1>, vector<8x8x8xi32>
    %cst_155 = arith.constant dense<2147483647> : vector<8x8xi32>
    %588 = vector.multi_reduction <minsi>, %587, %cst_155 [1] : vector<8x8x8xi32> to vector<8x8xi32>
    %589 = vector.extract_strided_slice %588 {offsets = [0, 7], sizes = [8, 1], strides = [1, 1]} : vector<8x8xi32> to vector<8x1xi32>
    %cst_156 = arith.constant dense<0.000000e+00> : vector<8xf32>
    %590 = vector.multi_reduction <add>, %0, %cst_156 [1] : vector<8x8xf32> to vector<8xf32>
    %591 = vector.shape_cast %590 : vector<8xf32> to vector<8x1xf32>
    %592 = arith.fptosi %591 : vector<8x1xf32> to vector<8x1xi32>
    %593 = tpu.iota {dimensions = array<i32: 1>} : vector<8x8xi32>
    %594 = vector.broadcast %589 : vector<8x1xi32> to vector<8x8xi32>
    %595 = arith.cmpi eq, %593, %594 : vector<8x8xi32>
    %c0_i32_157 = arith.constant 0 : i32
    %596 = vector.broadcast %c0_i32_157 : i32 to vector<8x8xi32>
    %597 = arith.select %595, %573, %596 : vector<8x8xi1>, vector<8x8xi32>
    %cst_158 = arith.constant dense<0> : vector<8xi32>
    %598 = vector.multi_reduction <add>, %597, %cst_158 [1] : vector<8x8xi32> to vector<8xi32>
    %599 = vector.shape_cast %598 : vector<8xi32> to vector<8x1xi32>
    %c7_i32 = arith.constant 7 : i32
    %600 = vector.broadcast %c7_i32 : i32 to vector<8x1xi32>
    %601 = arith.cmpi eq, %592, %600 : vector<8x1xi32>
    %602 = arith.select %601, %589, %599 : vector<8x1xi1>, vector<8x1xi32>
    %603 = vector.broadcast %602 : vector<8x1xi32> to vector<8x8xi32>
    %604 = arith.cmpi eq, %593, %603 : vector<8x8xi32>
    %c0_i32_159 = arith.constant 0 : i32
    %605 = vector.broadcast %c0_i32_159 : i32 to vector<8x8xi32>
    %606 = arith.select %604, %551, %605 : vector<8x8xi1>, vector<8x8xi32>
    %cst_160 = arith.constant dense<0> : vector<8xi32>
    %607 = vector.multi_reduction <add>, %606, %cst_160 [1] : vector<8x8xi32> to vector<8xi32>
    %608 = vector.shape_cast %607 : vector<8xi32> to vector<8x1xi32>
    %c6_i32 = arith.constant 6 : i32
    %609 = vector.broadcast %c6_i32 : i32 to vector<8x1xi32>
    %610 = arith.cmpi eq, %592, %609 : vector<8x1xi32>
    %611 = arith.select %610, %589, %608 : vector<8x1xi1>, vector<8x1xi32>
    %612 = vector.broadcast %611 : vector<8x1xi32> to vector<8x8xi32>
    %613 = arith.cmpi eq, %593, %612 : vector<8x8xi32>
    %c0_i32_161 = arith.constant 0 : i32
    %614 = vector.broadcast %c0_i32_161 : i32 to vector<8x8xi32>
    %615 = arith.select %613, %529, %614 : vector<8x8xi1>, vector<8x8xi32>
    %cst_162 = arith.constant dense<0> : vector<8xi32>
    %616 = vector.multi_reduction <add>, %615, %cst_162 [1] : vector<8x8xi32> to vector<8xi32>
    %617 = vector.shape_cast %616 : vector<8xi32> to vector<8x1xi32>
    %c5_i32 = arith.constant 5 : i32
    %618 = vector.broadcast %c5_i32 : i32 to vector<8x1xi32>
    %619 = arith.cmpi eq, %592, %618 : vector<8x1xi32>
    %620 = arith.select %619, %589, %617 : vector<8x1xi1>, vector<8x1xi32>
    %621 = vector.broadcast %620 : vector<8x1xi32> to vector<8x8xi32>
    %622 = arith.cmpi eq, %593, %621 : vector<8x8xi32>
    %c0_i32_163 = arith.constant 0 : i32
    %623 = vector.broadcast %c0_i32_163 : i32 to vector<8x8xi32>
    %624 = arith.select %622, %507, %623 : vector<8x8xi1>, vector<8x8xi32>
    %cst_164 = arith.constant dense<0> : vector<8xi32>
    %625 = vector.multi_reduction <add>, %624, %cst_164 [1] : vector<8x8xi32> to vector<8xi32>
    %626 = vector.shape_cast %625 : vector<8xi32> to vector<8x1xi32>
    %c4_i32 = arith.constant 4 : i32
    %627 = vector.broadcast %c4_i32 : i32 to vector<8x1xi32>
    %628 = arith.cmpi eq, %592, %627 : vector<8x1xi32>
    %629 = arith.select %628, %589, %626 : vector<8x1xi1>, vector<8x1xi32>
    %630 = vector.broadcast %629 : vector<8x1xi32> to vector<8x8xi32>
    %631 = arith.cmpi eq, %593, %630 : vector<8x8xi32>
    %c0_i32_165 = arith.constant 0 : i32
    %632 = vector.broadcast %c0_i32_165 : i32 to vector<8x8xi32>
    %633 = arith.select %631, %485, %632 : vector<8x8xi1>, vector<8x8xi32>
    %cst_166 = arith.constant dense<0> : vector<8xi32>
    %634 = vector.multi_reduction <add>, %633, %cst_166 [1] : vector<8x8xi32> to vector<8xi32>
    %635 = vector.shape_cast %634 : vector<8xi32> to vector<8x1xi32>
    %c3_i32 = arith.constant 3 : i32
    %636 = vector.broadcast %c3_i32 : i32 to vector<8x1xi32>
    %637 = arith.cmpi eq, %592, %636 : vector<8x1xi32>
    %638 = arith.select %637, %589, %635 : vector<8x1xi1>, vector<8x1xi32>
    %639 = vector.broadcast %638 : vector<8x1xi32> to vector<8x8xi32>
    %640 = arith.cmpi eq, %593, %639 : vector<8x8xi32>
    %c0_i32_167 = arith.constant 0 : i32
    %641 = vector.broadcast %c0_i32_167 : i32 to vector<8x8xi32>
    %642 = arith.select %640, %463, %641 : vector<8x8xi1>, vector<8x8xi32>
    %cst_168 = arith.constant dense<0> : vector<8xi32>
    %643 = vector.multi_reduction <add>, %642, %cst_168 [1] : vector<8x8xi32> to vector<8xi32>
    %644 = vector.shape_cast %643 : vector<8xi32> to vector<8x1xi32>
    %c2_i32 = arith.constant 2 : i32
    %645 = vector.broadcast %c2_i32 : i32 to vector<8x1xi32>
    %646 = arith.cmpi eq, %592, %645 : vector<8x1xi32>
    %647 = arith.select %646, %589, %644 : vector<8x1xi1>, vector<8x1xi32>
    %648 = vector.broadcast %647 : vector<8x1xi32> to vector<8x8xi32>
    %649 = arith.cmpi eq, %593, %648 : vector<8x8xi32>
    %c0_i32_169 = arith.constant 0 : i32
    %650 = vector.broadcast %c0_i32_169 : i32 to vector<8x8xi32>
    %651 = arith.select %649, %441, %650 : vector<8x8xi1>, vector<8x8xi32>
    %cst_170 = arith.constant dense<0> : vector<8xi32>
    %652 = vector.multi_reduction <add>, %651, %cst_170 [1] : vector<8x8xi32> to vector<8xi32>
    %653 = vector.shape_cast %652 : vector<8xi32> to vector<8x1xi32>
    %c1_i32 = arith.constant 1 : i32
    %654 = vector.broadcast %c1_i32 : i32 to vector<8x1xi32>
    %655 = arith.cmpi eq, %592, %654 : vector<8x1xi32>
    %656 = arith.select %655, %589, %653 : vector<8x1xi1>, vector<8x1xi32>
    %657 = tpu.concatenate %656, %647, %638, %629, %620, %611, %602, %589 in 1 : vector<8x1xi32>, vector<8x1xi32>, vector<8x1xi32>, vector<8x1xi32>, vector<8x1xi32>, vector<8x1xi32>, vector<8x1xi32>, vector<8x1xi32> -> vector<8x8xi32>
    %c0_171 = arith.constant 0 : index
    %c0_172 = arith.constant 0 : index
    %658 = vector.load %arg9[%c0_171, %c0_172] : memref<8x8xi32, #tpu.memory_space<vmem>>, vector<8x8xi32>
    tpu.vector_store %arg9[%c0_171, %c0_172], %657 {strides = array<i32>} : memref<8x8xi32, #tpu.memory_space<vmem>>, vector<8x8xi32>,
    return
  }
  func.func @transform_0(%arg0: i32) -> (i32, i32) {
    %c0_i32 = arith.constant 0 : i32
    %c0_i32_0 = arith.constant 0 : i32
    %c0_i32_1 = arith.constant 0 : i32
    return %c0_i32, %c0_i32_0 : i32, i32
  }
  func.func @transform_1(%arg0: i32) -> (i32, i32) {
    %c0_i32 = arith.constant 0 : i32
    %c0_i32_0 = arith.constant 0 : i32
    %c0_i32_1 = arith.constant 0 : i32
    return %c0_i32, %c0_i32_0 : i32, i32
  }
  func.func @transform_2(%arg0: i32) -> (i32, i32) {
    %c0_i32 = arith.constant 0 : i32
    %c0_i32_0 = arith.constant 0 : i32
    %c0_i32_1 = arith.constant 0 : i32
    return %c0_i32, %c0_i32_0 : i32, i32
  }
  func.func @transform_3(%arg0: i32) -> (i32, i32) {
    %c0_i32 = arith.constant 0 : i32
    %c0_i32_0 = arith.constant 0 : i32
    %c0_i32_1 = arith.constant 0 : i32
    return %c0_i32, %c0_i32_0 : i32, i32
  }
  func.func @transform_4(%arg0: i32) -> (i32, i32) {
    %c0_i32 = arith.constant 0 : i32
    %c0_i32_0 = arith.constant 0 : i32
    %c0_i32_1 = arith.constant 0 : i32
    return %c0_i32, %c0_i32_0 : i32, i32
  }
  func.func @transform_5(%arg0: i32) -> (i32, i32) {
    %c0_i32 = arith.constant 0 : i32
    %c0_i32_0 = arith.constant 0 : i32
    %c0_i32_1 = arith.constant 0 : i32
    return %c0_i32, %c0_i32_0 : i32, i32
  }
  func.func @transform_6(%arg0: i32) -> (i32, i32) {
    %c0_i32 = arith.constant 0 : i32
    %c0_i32_0 = arith.constant 0 : i32
    %c0_i32_1 = arith.constant 0 : i32
    return %c0_i32, %c0_i32_0 : i32, i32
  }
  func.func @transform_7(%arg0: i32) -> (i32, i32) {
    %c0_i32 = arith.constant 0 : i32
    %c0_i32_0 = arith.constant 0 : i32
    %c0_i32_1 = arith.constant 0 : i32
    return %c0_i32, %c0_i32_0 : i32, i32
  }
  func.func @transform_8(%arg0: i32) -> (i32, i32) {
    %c0_i32 = arith.constant 0 : i32
    %c0_i32_0 = arith.constant 0 : i32
    %c0_i32_1 = arith.constant 0 : i32
    return %c0_i32, %c0_i32_0 : i32, i32
  }
}

</mosaic_0001>

<bundles_post_ra>
// kernel: tpu_custom_call.1
= control target key start
LH: loop header
LB: loop body
LE: loop exit
PB: predicated region body
PF: predicated region fallthrough
CT: control target
= control target key end

     0   :  { %v5370_v2 = vmov 0   ;;  %v5371_v9 = vmov 0.0   ;;  %s6939_s0 = inlined_call_operand.vmem [shape: s32[64,1], index: 0, kind: input, shape index: {}]   ;;  %s6940_s1 = inlined_call_operand.vmem [shape: f32[8,8], index: 1, kind: input, shape index: {}]   ;;  %s6941_s2 = inlined_call_operand.vmem [shape: f32[100,16], index: 2, kind: input, shape index: {}]   ;;  %s6942_s3 = inlined_call_operand.vmem [shape: f32[16,256], index: 3, kind: input, shape index: {}]   ;;  %s6943_s4 = inlined_call_operand.vmem [shape: f32[32,256], index: 4, kind: input, shape index: {}]   ;;  %s6944_s5 = inlined_call_operand.vmem [shape: f32[1,256], index: 5, kind: input, shape index: {}]   ;;  %s6945_s6 = inlined_call_operand.vmem [shape: f32[8,64], index: 6, kind: input, shape index: {}]   ;;  %s6946_s7 = inlined_call_operand.vmem [shape: f32[9,8], index: 7, kind: input, shape index: {}]   ;;  %s6947_s8 = inlined_call_operand.hbm [shape: s32[8,8], index: 8, kind: output, shape index: {}]  }
   0x1   :  { %v33_v0 = vld [vmem:[%s6939_s0 + $0x10] sm:$0xff]  ;;  %v31_v1 = vld [vmem:[%s6939_s0] sm:$0xff]  ;;  %5194 = vset.pattern.permute.xlu1 %v5370_v2  ;;  %5193 = vset.pattern.permute.xlu0 %v5370_v2  ;;  %v34_v3 = vld [vmem:[%s6939_s0 + $0x18] sm:$0xff] }
   0x2   :  { %48 = vperm.xlu1 %5194, %v33_v0   ;;  %42 = vperm.xlu0 %5193, %v31_v1   ;;  %v32_v4 = vld [vmem:[%s6939_s0 + $0x8] sm:$0xff]  ;;  %v89_v5 = vld [vmem:[%s6941_s2] sm:$0xff]  ;;  %v91_v7 = vld [vmem:[%s6941_s2 + $0x10] sm:$0xff] }
   0x3   :  { %v90_v6 = vld [vmem:[%s6941_s2 + $0x8] sm:$0xff]  ;;  %v92_v8 = vld [vmem:[%s6941_s2 + $0x18] sm:$0xff]  ;;  %359 = vmatprep.mubr.f32.mxu1 %v5371_v9  ;;  %v93_v12 = vld [vmem:[%s6941_s2 + $0x20] sm:$0xff] }
   0x4   :  { %v5035_v10 = vpack.c.bf16 %v90_v6, %v89_v5  ;;  %v5039_v11 = vpack.c.bf16 %v92_v8, %v91_v7  ;;  %v94_v13 = vld [vmem:[%s6941_s2 + $0x28] sm:$0xff]  ;;  %v35_v15 = vld [vmem:[%s6939_s0 + $0x20] sm:$0xff] }
   0x5   :  { %v36_v14 = vld [vmem:[%s6939_s0 + $0x28] sm:$0xff] }
   0x6   :  { %51 = vperm.xlu1 %5194, %v34_v3   ;;  %45 = vperm.xlu0 %5193, %v32_v4  }
   0x7   :  { %5036 = vmatprep.subr.bf16.mxu0 %v5035_v10 }
   0x8   :  { %13 = vsyncpa [#allocation6], 0  ;;  %5038 = vmatpush3.bf16.msra.mxu0 %v5035_v10  ;;  %v5043_v16 = vpack.c.bf16 %v94_v13, %v93_v12  ;;  %v95_v17 = vld [vmem:[%s6941_s2 + $0x30] sm:$0xff]  ;;  %v96_v18 = vld [vmem:[%s6941_s2 + $0x38] sm:$0xff]  ;;  %vm127_vm0 = vcmask 1043456   ;;  %v39_v35 = vlaneseq  ;;  %vm102_vm1 = vcmask 818176  }
   0x9   :  { %5040 = vmatprep.subr.bf16.mxu0 %v5039_v11  ;;  %v38_v19 = vld [vmem:[%s6939_s0 + $0x38] sm:$0xff]  ;;  %v37_v20 = vld [vmem:[%s6939_s0 + $0x30] sm:$0xff]  ;;  %v5047_v21 = vpack.c.bf16 %v96_v18, %v95_v17  ;;  %v97_v22 = vld [vmem:[%s6941_s2 + $0x40] sm:$0xff]  ;;  %v5372_v53 = vmov 0.0|0.0   ;;  %vm252_vm10 = vcmask 130048   ;;  %vm5373_vm11 = vmmov 0  }
   0xa   :  { %57 = vperm.xlu1 %5194, %v36_v14   ;;  %54 = vperm.xlu0 %5193, %v35_v15   ;;  %v98_v23 = vld [vmem:[%s6941_s2 + $0x48] sm:$0xff]  ;;  %v99_v25 = vld [vmem:[%s6941_s2 + $0x50] sm:$0xff]  ;;  %v100_v26 = vld [vmem:[%s6941_s2 + $0x58] sm:$0xff]  ;;  %v5516_v36 = vand.u32 127, %v39_v35  ;;  %v5374_v13 = vmov 7   ;;  %v5625_v14 = vshrl.u32 %v39_v35, 7 }
   0xb   :  { %v5051_v24 = vpack.c.bf16 %v98_v23, %v97_v22  ;;  %v237_v27 = vld [vmem:[%s6942_s3 + $0x8] sm:$0xff]  ;;  %v239_v28 = vld [vmem:[%s6942_s3 + $0x18] sm:$0xff]  ;;  %v236_v29 = vld [vmem:[%s6942_s3] sm:$0xff]  ;;  %v5055_v30 = vpack.c.bf16 %v100_v26, %v99_v25  ;;  %s5376_s26 = smov 32   ;;  %vm6948_vm12 = vcmask 261120   ;;  %s5383_s29 = smov 96  }
   0xc   :  { %5042 = vmatpush3.bf16.msra.mxu0 %v5039_v11  ;;  %v5059_v31 = vpack.c.bf16 %v239_v28, %v237_v27  ;;  %v238_v32 = vld [vmem:[%s6942_s3 + $0x10] sm:$0xff]  ;;  %v101_v34 = vld [vmem:[%s6941_s2 + $0x60] sm:$0xf]  ;;  %v410_v54 = vld [vmem:[%s6943_s4 + $0x8] sm:$0xff]  ;;  %v5628_v15 = vsub.s32 1, %v5625_v14  ;;  %v5634_v17 = vsub.s32 0, %v5625_v14 }
   0xd   :  { %5044 = vmatprep.subr.bf16.mxu0 %v5043_v16  ;;  %v5061_v33 = vpack.c.bf16 %v238_v32, %v236_v29  ;;  %v411_v55 = vld [vmem:[%s6943_s4 + $0x18] sm:$0xff]  ;;  %v406_v58 = vld [vmem:[%s6943_s4] sm:$0xff]  ;;  %v407_v59 = vld [vmem:[%s6943_s4 + $0x10] sm:$0xff]  ;;  %vm2494_vm14 = vcmask 64512   ;;  %s5385_s20 = smov 1   ;;  %s5386_s0 = smov 3  }
   0xe   :  { %63 = vperm.xlu1 %5194, %v38_v19   ;;  %60 = vperm.xlu0 %5193, %v37_v20   ;;  %v5551_v56 = vpack.c.bf16 %v411_v55, %v410_v54  ;;  %v412_v61 = vld [vmem:[%s6943_s4 + $0x28] sm:$0xff]  ;;  %v413_v62 = vld [vmem:[%s6943_s4 + $0x38] sm:$0xff]  ;;  %v5568_v63 = vpack.c.bf16 %v407_v59, %v406_v58  ;;  %v408_v3 = vld [vmem:[%s6943_s4 + $0x20] sm:$0xff]  ;;  %s5387_s21 = smov 4   ;;  %s5388_s22 = smov 5  }
   0xf   :  { %5159 = vmatprep.subr.bf16.mxu1 %v5059_v31  ;;  %v5571_v1 = vpack.c.bf16 %v413_v62, %v412_v61  ;;  %v409_v4 = vld [vmem:[%s6943_s4 + $0x30] sm:$0xff]  ;;  %v5620_v12 = vld [vmem:[%s6940_s1] sm:$0xff]  ;;  %s5389_s4 = smov 6   ;;  %s5390_s23 = smov 2  }
  0x10   :  { %5046 = vmatpush3.bf16.msra.mxu0 %v5043_v16  ;;  %5160 = vmatpush1.bf16.msra.mxu1 %v5061_v33  ;;  %v5584_v6 = vpack.c.bf16 %v409_v4, %v408_v3  ;;  %v240_v16 = vld [vmem:[%s6944_s5] sm:$0x3]  ;;  %s5375_s5 = smov 64   ;;  %s5391_s24 = smov [#allocation5]  }
  0x11   :  { %5048 = vmatprep.subr.bf16.mxu0 %v5047_v21  ;;  %5063 = vmatprep.subr.bf16.mxu1 %v5372_v53  ;;  %v249_v18 = vrot.slane %v240_v16, %v5628_v15  ;;  %s4592_s25 = sshll.u32 %s5391_s24, 4  ;;  %s4593_s25 = int_to_ptr.vmem [resolvable:$true] %s4592_s25 }
  0x12   :  { %5195 = vset.pattern.permute.xlu1 %v5374_v13  ;;  %p5351_p1 = scmp.lt.s32.totalorder %s4593_s25, %s4593_s25 }
  0x13   :  { %612 = vperm.xlu1 %5195, %v5620_v12  }
  0x14   :  { %5050 = vmatpush3.bf16.msra.mxu0 %v5047_v21  ;;  %v245_v21 = vrot.slane %v240_v16, %v5634_v17 }
  0x15   :  { %5052 = vmatprep.subr.bf16.mxu0 %v5051_v24 }
  0x18   :  { %5054 = vmatpush3.bf16.msra.mxu0 %v5051_v24 }
  0x19   :  { %5056 = vmatprep.subr.bf16.mxu0 %v5055_v30 }
  0x1c   :  { %5058 = vmatpush3.bf16.msra.mxu0 %v5055_v30 }
  0x1d   :  { %4817 = vmatprep.subr.msk.mxu0 %vm127_vm0, %v101_v34 }
  0x20   :  { %4818 = vmatpush3.msk.msra.mxu0 %vm127_vm0, %v101_v34 }
  0x21   :  { %5060 = vmatprep.subr.bf16.mxu0 %v5059_v31 }
  0x81   :  { %v49_v37 = vpop.permute.xlu1 %48  ;;  %v43_v38 = vpop.permute.xlu0 %42 }
  0x82   :  { %vm65_vm2 = vcmp.eq.s32.totalorder %v5516_v36, %v43_v38  ;;  %vm67_vm3 = vcmp.eq.s32.totalorder %v5516_v36, %v49_v37 }
  0x83   :  { %v4600_v39 = vsel %vm65_vm2, 1.0, %v5371_v9  ;;  %v4602_v42 = vsel %vm67_vm3, 1.0, %v5371_v9 }
  0x84   :  { %4819 = vmatprep.mubr.msk.f32.mxu0 %vm102_vm1, %v4600_v39 }
  0x85   :  { %v52_v40 = vpop.permute.xlu1 %51  ;;  %v46_v41 = vpop.permute.xlu0 %45 }
  0x86   :  { %vm66_vm4 = vcmp.eq.s32.totalorder %v5516_v36, %v46_v41  ;;  %vm68_vm5 = vcmp.eq.s32.totalorder %v5516_v36, %v52_v40 }
  0x87   :  { %v4601_v43 = vsel %vm66_vm4, 1.0, %v5371_v9  ;;  %v4603_v46 = vsel %vm68_vm5, 1.0, %v5371_v9  ;;  %vm2653_vm5 = vcmask 1041409  }
  0x88   :  { %4820 = vmatmul.mubr.msk.f32.vlgmr.msra.gmra.mrb[0].mxu0 %vm102_vm1, %v4601_v43 }
  0x89   :  { %v58_v44 = vpop.permute.xlu1 %57  ;;  %4822 = vmatprep.mubr.msk.f32.mxu0 %vm102_vm1, %v4602_v42  ;;  %v55_v45 = vpop.permute.xlu0 %54  ;;  %5062 = vmatpush1.bf16.msra.mxu0 %v5061_v33 }
  0x8a   :  { %vm69_vm6 = vcmp.eq.s32.totalorder %v5516_v36, %v55_v45  ;;  %vm70_vm7 = vcmp.eq.s32.totalorder %v5516_v36, %v58_v44  ;;  %5069 = vmatprep.subr.bf16.mxu0 %v5372_v53 }
  0x8b   :  { %v4604_v47 = vsel %vm69_vm6, 1.0, %v5371_v9  ;;  %v4605_v50 = vsel %vm70_vm7, 1.0, %v5371_v9 }
  0x8c   :  { %4823 = vmatmul.mubr.msk.f32.gmra.mrb[2].mxu0 %vm102_vm1, %v4603_v46 }
  0x8d   :  { %v64_v48 = vpop.permute.xlu1 %63  ;;  %4825 = vmatprep.mubr.msk.f32.mxu0 %vm102_vm1, %v4604_v47  ;;  %v61_v49 = vpop.permute.xlu0 %60 }
  0x8e   :  { %vm71_vm8 = vcmp.eq.s32.totalorder %v5516_v36, %v61_v49  ;;  %vm72_vm9 = vcmp.eq.s32.totalorder %v5516_v36, %v64_v48 }
  0x8f   :  { %v4606_v51 = vsel %vm71_vm8, 1.0, %v5371_v9  ;;  %v4607_v52 = vsel %vm72_vm9, 1.0, %v5371_v9  ;;  %vm2655_vm9 = vcmask 1042434  }
  0x90   :  { %4826 = vmatmul.mubr.msk.f32.gmra.mrb[4].mxu0 %vm102_vm1, %v4605_v50 }
  0x91   :  { %4828 = vmatprep.mubr.msk.f32.mxu0 %vm102_vm1, %v4606_v51 }
  0x94   :  { %4829 = vmatmul.mubr.msk.f32.gmra.mrb[6].mxu0 %vm102_vm1, %v4607_v52 }
  0x95   :  { %341 = vmatprep.mubr.f32.mxu0 %v5371_v9 }
 0x15b   :  { %v4821_v57 = vpop.f32.mrb[0].mxu0 }
 0x15c   :  { %v197_v60 = vpop.f32.mrb[1].mxu0 }
 0x15d   :  { %4617 = vmatmul.mubr.msk.f32.vlgmr.msra.gmra.mrb[8].mxu0 %vm252_vm10, %v197_v60 }
 0x15e   :  { %347 = vmatprep.mubr.f32.mxu0 %v5371_v9  ;;  %5071 = vmatpush3.bf16.msra.mxu0 %v5551_v56 }
 0x15f   :  { %v4824_v0 = vpop.f32.mrb[2].mxu0  ;;  %5072 = vmatprep.subr.bf16.mxu0 %v5372_v53 }
 0x160   :  { %v207_v5 = vpop.f32.mrb[3].mxu0  ;;  %4620 = vmatmul.mubr.msk.f32.vlgmr.msra.gmra.mrb[0].mxu1 %vm252_vm10, %v4824_v0 }
 0x161   :  { %4618 = vmatmul.mubr.msk.f32.gmra.mrb[10].mxu0 %vm252_vm10, %v4821_v57  ;;  %365 = vmatprep.mubr.f32.mxu1 %v5371_v9 }
 0x162   :  { %353 = vmatprep.mubr.f32.mxu0 %v5371_v9  ;;  %5065 = vmatpush3.bf16.msra.mxu1 %v5568_v63 }
 0x163   :  { %v4827_v7 = vpop.f32.mrb[4].mxu0  ;;  %5074 = vmatpush3.bf16.msra.mxu0 %v5571_v1  ;;  %5066 = vmatprep.subr.bf16.mxu1 %v5372_v53 }
 0x164   :  { %v217_v8 = vpop.f32.mrb[5].mxu0  ;;  %5081 = vmatprep.subr.bf16.mxu0 %v5372_v53 }
 0x165   :  { %4619 = vmatmul.mubr.msk.f32.gmra.mrb[12].mxu0 %vm252_vm10, %v207_v5  ;;  %4621 = vmatmul.mubr.msk.f32.gmra.mrb[2].mxu1 %vm252_vm10, %v217_v8 }
 0x166   :  { %371 = vmatprep.mubr.f32.mxu1 %v5371_v9  ;;  %5068 = vmatpush3.bf16.msra.mxu1 %v5584_v6 }
 0x167   :  { %v4830_v10 = vpop.f32.mrb[6].mxu0  ;;  %4850 = vmatprep.mubr.msk.f32.mxu0 %vm5373_vm11, %v5371_v9  ;;  %5075 = vmatprep.subr.bf16.mxu1 %v5372_v53 }
 0x168   :  { %v227_v11 = vpop.f32.mrb[7].mxu0 }
 0x169   :  { %4622 = vmatmul.mubr.msk.f32.gmra.mrb[4].mxu1 %vm252_vm10, %v4827_v7  ;;  %4851 = vmatmul.mubr.f32.vlgmr.msra.gmra.mrb[14].mxu0 %v5371_v9 }
 0x16a   :  { %377 = vmatprep.mubr.f32.mxu1 %v5371_v9  ;;  %5083 = vmatpush3.bf16.msra.mxu0 %v5551_v56 }
 0x16b   :  { %5084 = vmatprep.subr.bf16.mxu0 %v5372_v53  ;;  %4872 = vmatprep.mubr.msk.f32.mxu0 %vm5373_vm11, %v5371_v9 }
 0x16d   :  { %4623 = vmatmul.mubr.msk.f32.gmra.mrb[6].mxu1 %vm252_vm10, %v227_v11  ;;  %v5668_v11 = vpop.permute.xlu1 %612 }
 0x16e   :  { %383 = vmatprep.mubr.f32.mxu1 %v5371_v9  ;;  %5086 = vmatpush3.bf16.msra.mxu0 %v5571_v1 }
 0x16f   :  { %5093 = vmatprep.subr.bf16.mxu0 %v5372_v53 }
 0x171   :  { %4624 = vmatmul.mubr.msk.f32.gmra.mrb[8].mxu1 %vm252_vm10, %v4830_v10 }
 0x172   :  { %4839 = vmatprep.mubr.msk.f32.mxu1 %vm5373_vm11, %v5371_v9 }
 0x175   :  { %4840 = vmatmul.mubr.f32.vlgmr.msra.gmra.mrb[10].mxu1 %v5371_v9 }
 0x176   :  { %5077 = vmatpush3.bf16.msra.mxu1 %v5568_v63  ;;  %4861 = vmatprep.mubr.msk.f32.mxu1 %vm5373_vm11, %v5371_v9 }
 0x177   :  { %5078 = vmatprep.subr.bf16.mxu1 %v5372_v53 }
 0x17a   :  { %5080 = vmatpush3.bf16.msra.mxu1 %v5584_v6 }
 0x17b   :  { %5087 = vmatprep.subr.bf16.mxu1 %v5372_v53 }
 0x230   :  { %v343_v19 = vpop.f32.mrb[8].mxu0 }
 0x231   :  { %v345_v20 = vpop.f32.mrb[9].mxu0  ;;  %v344_v55 = vadd.f32 %v343_v19, %v245_v21 }
 0x232   :  { %v5638_v22 = vadd.f32 %v345_v20, %v249_v18 }
 0x233   :  { %v361_v23 = vpop.f32.mrb[0].mxu1 }
 0x234   :  { %v5640_v24 = vadd.f32 %v361_v23, %v245_v21  ;;  %v349_v25 = vpop.f32.mrb[10].mxu0  ;;  %v363_v26 = vpop.f32.mrb[1].mxu1 }
 0x235   :  { %v5642_v27 = vadd.f32 %v349_v25, %v245_v21  ;;  %v5644_v28 = vadd.f32 %v363_v26, %v249_v18  ;;  %v351_v29 = vpop.f32.mrb[11].mxu0 }
 0x236   :  { %v5646_v30 = vadd.f32 %v351_v29, %v249_v18 }
 0x238   :  { %v355_v31 = vpop.f32.mrb[12].mxu0  ;;  %v367_v32 = vpop.f32.mrb[2].mxu1 }
 0x239   :  { %v5648_v33 = vadd.f32 %v355_v31, %v245_v21  ;;  %v5650_v34 = vadd.f32 %v367_v32, %v245_v21  ;;  %v357_v35 = vpop.f32.mrb[13].mxu0  ;;  %v369_v37 = vpop.f32.mrb[3].mxu1 }
 0x23a   :  { %v5652_v38 = vadd.f32 %v357_v35, %v249_v18  ;;  %v5654_v39 = vadd.f32 %v369_v37, %v249_v18 }
 0x23c   :  { %v373_v40 = vpop.f32.mrb[4].mxu1  ;;  %v588_v41 = vpop.f32.mrb[14].mxu0 }
 0x23d   :  { %v5656_v42 = vadd.f32 %v373_v40, %v245_v21  ;;  %v375_v43 = vpop.f32.mrb[5].mxu1  ;;  %v4852_v44 = vpop.f32.mrb[15].mxu0 }
 0x23e   :  { %v5658_v45 = vadd.f32 %v375_v43, %v249_v18 }
 0x240   :  { %v379_v46 = vpop.f32.mrb[6].mxu1 }
 0x241   :  { %v5660_v47 = vadd.f32 %v379_v46, %v245_v21  ;;  %v381_v48 = vpop.f32.mrb[7].mxu1 }
 0x242   :  { %v5662_v49 = vadd.f32 %v381_v48, %v249_v18 }
 0x244   :  { %v385_v50 = vpop.f32.mrb[8].mxu1 }
 0x245   :  { %v5664_v51 = vadd.f32 %v385_v50, %v245_v21  ;;  %v387_v52 = vpop.f32.mrb[9].mxu1  ;;  %v5377_v50 = vmov 6  }
 0x246   :  { %v388_v54 = vadd.f32 %v387_v52, %v249_v18  ;;  %5196 = vset.pattern.permute.xlu1 %v5377_v50 }
 0x248   :  { %v592_v57 = vadd.f32 %v588_v41, %v388_v54  ;;  %v486_v58 = vpop.f32.mrb[10].mxu1 }
 0x249   :  { %v490_v59 = vadd.f32 %v486_v58, %v344_v55  ;;  %v4841_v60 = vpop.f32.mrb[11].mxu1 }
 0x24a   :  { %5212 = vtanh.f32 %v592_v57  ;;  %v4626_v62 = vmul.f32 -1.442695, %v592_v57 }
 0x24b   :  { %v4625_v26 = vmul.f32 -1.442695, %v490_v59 }
 0x24c   :  { %5214 = vpow2.f32 %v4626_v62 }
 0x254   :  { %v5213_v61 = vpop.eup %5212 }
 0x255   :  { %602 = vrot.lane.b32.xlu0 %v5213_v61, %s5375_s5 }
 0x256   :  { %v5215_v0 = vpop.eup %5214 }
 0x257   :  { %v596_v3 = vadd.f32 1.0, %v5215_v0 }
 0x259   :  { %5216 = vrcp.f32 %v596_v3 }
 0x263   :  { %v5217_v4 = vpop.eup %5216 }
 0x264   :  { %v600_v8 = vmul.f32 0.0, %v5217_v4 }
 0x2c7   :  { %v603_v5 = vpop.permute.xlu0 %602 }
 0x2c8   :  { %v605_v7 = vmul.f32 %v5217_v4, %v603_v5 }
 0x2ca   :  { %607 = vrot.lane.b32.xlu0 %v605_v7, %s5376_s26 }
 0x33c   :  { %v608_v10 = vpop.permute.xlu0 %607 }
 0x33d   :  { %v610_v16 = vadd.f32 %v608_v10, %v600_v8 }
 0x33f   :  { %v5671_v18 = vmul.f32 %v5668_v11, %v610_v16 }
 0x341   :  { %5218 = vtanh.f32 %v5671_v18 }
 0x342   :  { %5220 = vtanh.f32 %v490_v59 }
 0x343   :  { %5222 = vpow2.f32 %v4625_v26 }
 0x34b   :  { %v5219_v19 = vpop.eup %5218 }
 0x34c   :  { %618 = vrot.lane.b32.xlu1 %v5219_v19, %s5375_s5  ;;  %v5221_v25 = vpop.eup %5220 }
 0x34d   :  { %v5223_v29 = vpop.eup %5222 }
 0x34e   :  { %v494_v31 = vadd.f32 1.0, %v5223_v29 }
 0x350   :  { %5224 = vrcp.f32 %v494_v31 }
 0x35a   :  { %v5225_v35 = vpop.eup %5224 }
 0x35b   :  { %v498_v43 = vmul.f32 0.0, %v5225_v35 }
 0x3be   :  { %v619_v20 = vpop.permute.xlu1 %618 }
 0x3bf   :  { %v621_v21 = vmul.f32 %v5217_v4, %v619_v20 }
 0x3c1   :  { %v622_v23 = vmul.f32 %v621_v21, %v5668_v11 }
 0x3c3   :  { %629 = vrot.lane.b32.xlu0 %v622_v23, %s5376_s26 }
 0x3c7   :  { %500 = vrot.lane.b32.xlu0 %v5221_v25, %s5375_s5 }
 0x3cb   :  { %511 = vperm.xlu0 %5193, %v5620_v12  }
 0x435   :  { %v630_v32 = vpop.permute.xlu0 %629 }
 0x436   :  { %632 = vst.msk [vmem:[#allocation4 + $0x38] sm:$0xff] %vm6948_vm12, %v630_v32  ;;  %4873 = vmatmul.mubr.msk.f32.vlgmr.msra.gmra.mrb[16].mxu0 %vm6948_vm12, %v630_v32 }
 0x437   :  { %5095 = vmatpush3.bf16.msra.mxu0 %v5551_v56  ;;  %4894 = vmatprep.mubr.msk.f32.mxu0 %vm5373_vm11, %v5371_v9 }
 0x438   :  { %5096 = vmatprep.subr.bf16.mxu0 %v5372_v53 }
 0x439   :  { %v501_v37 = vpop.permute.xlu0 %500 }
 0x43a   :  { %v503_v40 = vmul.f32 %v5225_v35, %v501_v37  ;;  %v5379_v37 = vmov 1  }
 0x43b   :  { %5098 = vmatpush3.bf16.msra.mxu0 %v5571_v1  ;;  %5198 = vset.pattern.permute.xlu0 %v5379_v37 }
 0x43c   :  { %505 = vrot.lane.b32.xlu0 %v503_v40, %s5376_s26  ;;  %5105 = vmatprep.subr.bf16.mxu0 %v5372_v53 }
 0x44a   :  { %v5688_v41 = vpop.permute.xlu0 %511 }
 0x4ae   :  { %v506_v44 = vpop.permute.xlu0 %505 }
 0x4af   :  { %v508_v46 = vadd.f32 %v506_v44, %v498_v43 }
 0x4b1   :  { %v5691_v48 = vmul.f32 %v5688_v41, %v508_v46 }
 0x4b3   :  { %5226 = vtanh.f32 %v5691_v48 }
 0x4bd   :  { %v5227_v52 = vpop.eup %5226 }
 0x4be   :  { %517 = vrot.lane.b32.xlu0 %v5227_v52, %s5375_s5 }
 0x509   :  { %v806_v54 = vpop.f32.mrb[16].mxu0 }
 0x50a   :  { %v810_v55 = vadd.f32 %v806_v54, %v5662_v49  ;;  %v4874_v57 = vpop.f32.mrb[17].mxu0 }
 0x50c   :  { %5228 = vtanh.f32 %v810_v55  ;;  %v4630_v62 = vmul.f32 -1.442695, %v810_v55 }
 0x50e   :  { %5230 = vpow2.f32 %v4630_v62 }
 0x516   :  { %v5229_v58 = vpop.eup %5228 }
 0x517   :  { %820 = vrot.lane.b32.xlu1 %v5229_v58, %s5375_s5 }
 0x518   :  { %v5231_v0 = vpop.eup %5230 }
 0x519   :  { %v814_v3 = vadd.f32 1.0, %v5231_v0 }
 0x51b   :  { %830 = vperm.xlu1 %5196, %v5620_v12   ;;  %5232 = vrcp.f32 %v814_v3 }
 0x525   :  { %v5233_v4 = vpop.eup %5232 }
 0x526   :  { %v818_v10 = vmul.f32 %v5233_v4, %v5671_v18 }
 0x530   :  { %v518_v59 = vpop.permute.xlu0 %517 }
 0x531   :  { %v520_v60 = vmul.f32 %v5225_v35, %v518_v59 }
 0x533   :  { %v521_v61 = vmul.f32 %v520_v60, %v5688_v41 }
 0x535   :  { %624 = vrot.lane.b32.xlu0 %v521_v61, %s5376_s26 }
 0x589   :  { %v821_v49 = vpop.permute.xlu1 %820 }
 0x58a   :  { %v823_v5 = vmul.f32 %v5233_v4, %v821_v49 }
 0x58c   :  { %825 = vrot.lane.b32.xlu1 %v823_v5, %s5376_s26 }
 0x59a   :  { %v5710_v8 = vpop.permute.xlu1 %830 }
 0x5a7   :  { %v625_v7 = vpop.permute.xlu0 %624 }
 0x5a8   :  { %627 = vst.msk [vmem:[#allocation3] sm:$0xff] %vm6948_vm12, %v625_v7  ;;  %4862 = vmatmul.mubr.msk.f32.vlgmr.msra.gmra.mrb[12].mxu1 %vm6948_vm12, %v625_v7 }
 0x5a9   :  { %5089 = vmatpush3.bf16.msra.mxu1 %v5568_v63  ;;  %4883 = vmatprep.mubr.msk.f32.mxu1 %vm5373_vm11, %v5371_v9 }
 0x5aa   :  { %5090 = vmatprep.subr.bf16.mxu1 %v5372_v53 }
 0x5ad   :  { %5092 = vmatpush3.bf16.msra.mxu1 %v5584_v6 }
 0x5ae   :  { %5099 = vmatprep.subr.bf16.mxu1 %v5372_v53 }
 0x5fe   :  { %v826_v16 = vpop.permute.xlu1 %825 }
 0x5ff   :  { %v828_v19 = vadd.f32 %v826_v16, %v818_v10 }
 0x601   :  { %v833_v20 = vmul.f32 %v5710_v8, %v828_v19 }
 0x603   :  { %5234 = vtanh.f32 %v833_v20 }
 0x60d   :  { %v5235_v21 = vpop.eup %5234 }
 0x60e   :  { %836 = vrot.lane.b32.xlu1 %v5235_v21, %s5375_s5 }
 0x67b   :  { %v703_v23 = vpop.f32.mrb[12].mxu1 }
 0x67c   :  { %v707_v25 = vadd.f32 %v703_v23, %v5642_v27  ;;  %v4863_v26 = vpop.f32.mrb[13].mxu1  ;;  %v5378_v27 = vmov 5  }
 0x67d   :  { %5197 = vset.pattern.permute.xlu1 %v5378_v27 }
 0x67e   :  { %5236 = vtanh.f32 %v707_v25  ;;  %v4628_v54 = vmul.f32 -1.442695, %v707_v25 }
 0x680   :  { %v837_v29 = vpop.permute.xlu1 %836 }
 0x681   :  { %v839_v31 = vmul.f32 %v5233_v4, %v837_v29 }
 0x683   :  { %v840_v32 = vmul.f32 %v839_v31, %v5710_v8 }
 0x685   :  { %847 = vrot.lane.b32.xlu1 %v840_v32, %s5376_s26 }
 0x688   :  { %v5237_v18 = vpop.eup %5236 }
 0x689   :  { %717 = vrot.lane.b32.xlu0 %v5237_v18, %s5375_s5 }
 0x68d   :  { %727 = vperm.xlu0 %5198, %v5620_v12  }
 0x6f7   :  { %v848_v35 = vpop.permute.xlu1 %847 }
 0x6f8   :  { %850 = vst.msk [vmem:[#allocation4 + $0x30] sm:$0xff] %vm6948_vm12, %v848_v35  ;;  %4895 = vmatmul.mubr.msk.f32.vlgmr.msra.gmra.mrb[18].mxu0 %vm6948_vm12, %v848_v35 }
 0x6f9   :  { %5107 = vmatpush3.bf16.msra.mxu0 %v5551_v56  ;;  %4916 = vmatprep.mubr.msk.f32.mxu0 %vm5373_vm11, %v5371_v9 }
 0x6fa   :  { %5108 = vmatprep.subr.bf16.mxu0 %v5372_v53 }
 0x6fb   :  { %v718_v62 = vpop.permute.xlu0 %717 }
 0x6fd   :  { %5110 = vmatpush3.bf16.msra.mxu0 %v5571_v1 }
 0x6fe   :  { %5117 = vmatprep.subr.bf16.mxu0 %v5372_v53 }
 0x70c   :  { %v5741_v21 = vpop.permute.xlu0 %727 }
 0x7cb   :  { %v1024_v40 = vpop.f32.mrb[18].mxu0 }
 0x7cc   :  { %v1028_v43 = vadd.f32 %v1024_v40, %v5658_v45  ;;  %v4896_v44 = vpop.f32.mrb[19].mxu0 }
 0x7cd   :  { %v5380_v44 = vmov 2  }
 0x7ce   :  { %5238 = vtanh.f32 %v1028_v43  ;;  %v4634_v52 = vmul.f32 -1.442695, %v1028_v43 }
 0x7d0   :  { %5240 = vpow2.f32 %v4634_v52 }
 0x7d1   :  { %5242 = vpow2.f32 %v4628_v54 }
 0x7d8   :  { %v5239_v46 = vpop.eup %5238 }
 0x7d9   :  { %1038 = vrot.lane.b32.xlu1 %v5239_v46, %s5375_s5  ;;  %v5381_v46 = vmov 4  }
 0x7da   :  { %v5241_v55 = vpop.eup %5240  ;;  %5199 = vset.pattern.permute.xlu0 %v5381_v46 }
 0x7db   :  { %v1032_v57 = vadd.f32 1.0, %v5241_v55  ;;  %v5243_v58 = vpop.eup %5242 }
 0x7dc   :  { %v711_v59 = vadd.f32 1.0, %v5243_v58 }
 0x7dd   :  { %1048 = vperm.xlu1 %5197, %v5620_v12   ;;  %5244 = vrcp.f32 %v1032_v57 }
 0x7de   :  { %5246 = vrcp.f32 %v711_v59 }
 0x7e1   :  { %5200 = vset.pattern.permute.xlu1 %v5380_v44 }
 0x7e7   :  { %v5245_v60 = vpop.eup %5244 }
 0x7e8   :  { %v5247_v0 = vpop.eup %5246  ;;  %v1036_v49 = vmul.f32 %v5245_v60, %v833_v20 }
 0x7e9   :  { %v720_v3 = vmul.f32 %v5247_v0, %v718_v62  ;;  %v715_v16 = vmul.f32 %v5247_v0, %v5691_v48 }
 0x84b   :  { %v1039_v61 = vpop.permute.xlu1 %1038 }
 0x84c   :  { %v1041_v45 = vmul.f32 %v5245_v60, %v1039_v61 }
 0x84e   :  { %1043 = vrot.lane.b32.xlu1 %v1041_v45, %s5376_s26 }
 0x852   :  { %722 = vrot.lane.b32.xlu1 %v720_v3, %s5376_s26 }
 0x85c   :  { %v5735_v4 = vpop.permute.xlu1 %1048 }
 0x8c0   :  { %v1044_v5 = vpop.permute.xlu1 %1043 }
 0x8c1   :  { %v1046_v7 = vadd.f32 %v1044_v5, %v1036_v49 }
 0x8c3   :  { %v5738_v10 = vmul.f32 %v5735_v4, %v1046_v7 }
 0x8c4   :  { %v723_v19 = vpop.permute.xlu1 %722 }
 0x8c5   :  { %5248 = vtanh.f32 %v5738_v10  ;;  %v725_v23 = vadd.f32 %v723_v19, %v715_v16 }
 0x8c7   :  { %v5745_v25 = vmul.f32 %v5741_v21, %v725_v23 }
 0x8c9   :  { %5250 = vtanh.f32 %v5745_v25 }
 0x8cf   :  { %v5249_v26 = vpop.eup %5248 }
 0x8d0   :  { %1054 = vrot.lane.b32.xlu0 %v5249_v26, %s5375_s5 }
 0x8d3   :  { %v5251_v20 = vpop.eup %5250 }
 0x8d4   :  { %733 = vrot.lane.b32.xlu1 %v5251_v20, %s5375_s5 }
 0x942   :  { %v1055_v29 = vpop.permute.xlu0 %1054 }
 0x943   :  { %v1057_v31 = vmul.f32 %v5245_v60, %v1055_v29 }
 0x945   :  { %v1058_v48 = vmul.f32 %v1057_v31, %v5735_v4 }
 0x946   :  { %v734_v32 = vpop.permute.xlu1 %733 }
 0x947   :  { %v736_v18 = vmul.f32 %v5247_v0, %v734_v32  ;;  %1065 = vrot.lane.b32.xlu0 %v1058_v48, %s5376_s26 }
 0x949   :  { %v737_v35 = vmul.f32 %v736_v18, %v5741_v21 }
 0x94b   :  { %842 = vrot.lane.b32.xlu1 %v737_v35, %s5376_s26 }
 0x9b9   :  { %v1066_v40 = vpop.permute.xlu0 %1065 }
 0x9ba   :  { %1068 = vst.msk [vmem:[#allocation4 + $0x28] sm:$0xff] %vm6948_vm12, %v1066_v40  ;;  %4917 = vmatmul.mubr.msk.f32.vlgmr.msra.gmra.mrb[20].mxu0 %vm6948_vm12, %v1066_v40 }
 0x9bb   :  { %5119 = vmatpush3.bf16.msra.mxu0 %v5551_v56  ;;  %4938 = vmatprep.mubr.msk.f32.mxu0 %vm5373_vm11, %v5371_v9 }
 0x9bc   :  { %5120 = vmatprep.subr.bf16.mxu0 %v5372_v53 }
 0x9bd   :  { %v843_v43 = vpop.permute.xlu1 %842 }
 0x9be   :  { %845 = vst.msk [vmem:[#allocation3 + $0x8] sm:$0xff] %vm6948_vm12, %v843_v43  ;;  %4884 = vmatmul.mubr.msk.f32.vlgmr.msra.gmra.mrb[14].mxu1 %vm6948_vm12, %v843_v43 }
 0x9bf   :  { %5101 = vmatpush3.bf16.msra.mxu1 %v5568_v63  ;;  %5122 = vmatpush3.bf16.msra.mxu0 %v5571_v1 }
 0x9c0   :  { %5102 = vmatprep.subr.bf16.mxu1 %v5372_v53  ;;  %4905 = vmatprep.mubr.msk.f32.mxu1 %vm5373_vm11, %v5371_v9 }
 0x9c1   :  { %5129 = vmatprep.subr.bf16.mxu0 %v5372_v53 }
 0x9c3   :  { %5104 = vmatpush3.bf16.msra.mxu1 %v5584_v6 }
 0x9c4   :  { %5111 = vmatprep.subr.bf16.mxu1 %v5372_v53 }
 0xa8d   :  { %v1242_v52 = vpop.f32.mrb[20].mxu0 }
 0xa8e   :  { %v1246_v54 = vadd.f32 %v1242_v52, %v5654_v39  ;;  %v4918_v55 = vpop.f32.mrb[21].mxu0 }
 0xa90   :  { %5252 = vtanh.f32 %v1246_v54  ;;  %v4638_v45 = vmul.f32 -1.442695, %v1246_v54 }
 0xa91   :  { %v921_v57 = vpop.f32.mrb[14].mxu1 }
 0xa92   :  { %v925_v58 = vadd.f32 %v921_v57, %v5648_v33  ;;  %v4885_v59 = vpop.f32.mrb[15].mxu1 }
 0xa94   :  { %5254 = vtanh.f32 %v925_v58  ;;  %v4632_v39 = vmul.f32 -1.442695, %v925_v58 }
 0xa95   :  { %5256 = vpow2.f32 %v4638_v45 }
 0xa96   :  { %5258 = vpow2.f32 %v4632_v39 }
 0xa9a   :  { %v5253_v60 = vpop.eup %5252 }
 0xa9b   :  { %1256 = vrot.lane.b32.xlu0 %v5253_v60, %s5375_s5 }
 0xa9e   :  { %v5255_v61 = vpop.eup %5254 }
 0xa9f   :  { %935 = vrot.lane.b32.xlu1 %v5255_v61, %s5375_s5  ;;  %1266 = vperm.xlu0 %5199, %v5620_v12   ;;  %v5257_v62 = vpop.eup %5256  ;;  %v5382_v61 = vmov 3  }
 0xaa0   :  { %v1250_v0 = vadd.f32 1.0, %v5257_v62  ;;  %v5259_v33 = vpop.eup %5258 }
 0xaa1   :  { %v929_v3 = vadd.f32 1.0, %v5259_v33 }
 0xaa2   :  { %5260 = vrcp.f32 %v1250_v0 }
 0xaa3   :  { %945 = vperm.xlu1 %5200, %v5620_v12   ;;  %5203 = vset.pattern.permute.xlu0 %v5380_v44  ;;  %5262 = vrcp.f32 %v929_v3 }
 0xaa7   :  { %5201 = vset.pattern.permute.xlu1 %v5382_v61 }
 0xaac   :  { %v5261_v49 = vpop.eup %5260 }
 0xaad   :  { %v5263_v16 = vpop.eup %5262  ;;  %v1254_v29 = vmul.f32 %v5261_v49, %v5738_v10 }
 0xaae   :  { %v933_v18 = vmul.f32 %v5263_v16, %v5745_v25 }
 0xb0d   :  { %v1257_v5 = vpop.permute.xlu0 %1256 }
 0xb0e   :  { %v1259_v7 = vmul.f32 %v5261_v49, %v1257_v5 }
 0xb10   :  { %1261 = vrot.lane.b32.xlu1 %v1259_v7, %s5376_s26 }
 0xb11   :  { %v936_v19 = vpop.permute.xlu1 %935 }
 0xb12   :  { %v938_v23 = vmul.f32 %v5263_v16, %v936_v19 }
 0xb14   :  { %940 = vrot.lane.b32.xlu0 %v938_v23, %s5376_s26 }
 0xb1e   :  { %v5781_v20 = vpop.permute.xlu0 %1266 }
 0xb22   :  { %v5779_v26 = vpop.permute.xlu1 %945 }
 0xb82   :  { %v1262_v31 = vpop.permute.xlu1 %1261 }
 0xb83   :  { %v1264_v48 = vadd.f32 %v1262_v31, %v1254_v29 }
 0xb85   :  { %v5785_v32 = vmul.f32 %v5781_v20, %v1264_v48 }
 0xb86   :  { %v941_v35 = vpop.permute.xlu0 %940 }
 0xb87   :  { %5264 = vtanh.f32 %v5785_v32  ;;  %v943_v40 = vadd.f32 %v941_v35, %v933_v18 }
 0xb89   :  { %v5790_v43 = vmul.f32 %v5779_v26, %v943_v40 }
 0xb8b   :  { %5266 = vtanh.f32 %v5790_v43 }
 0xb91   :  { %v5265_v44 = vpop.eup %5264 }
 0xb92   :  { %1272 = vrot.lane.b32.xlu1 %v5265_v44, %s5375_s5 }
 0xb95   :  { %v5267_v10 = vpop.eup %5266 }
 0xb96   :  { %951 = vrot.lane.b32.xlu0 %v5267_v10, %s5375_s5 }
 0xc04   :  { %v1273_v52 = vpop.permute.xlu1 %1272 }
 0xc05   :  { %v1275_v54 = vmul.f32 %v5261_v49, %v1273_v52 }
 0xc07   :  { %v1276_v55 = vmul.f32 %v1275_v54, %v5781_v20 }
 0xc08   :  { %v952_v25 = vpop.permute.xlu0 %951 }
 0xc09   :  { %v954_v57 = vmul.f32 %v5263_v16, %v952_v25  ;;  %1283 = vrot.lane.b32.xlu1 %v1276_v55, %s5376_s26 }
 0xc0b   :  { %v955_v58 = vmul.f32 %v954_v57, %v5779_v26 }
 0xc0d   :  { %1060 = vrot.lane.b32.xlu0 %v955_v58, %s5376_s26 }
 0xc7b   :  { %v1284_v59 = vpop.permute.xlu1 %1283 }
 0xc7c   :  { %1286 = vst.msk [vmem:[#allocation4 + $0x20] sm:$0xff] %vm6948_vm12, %v1284_v59  ;;  %4939 = vmatmul.mubr.msk.f32.vlgmr.msra.gmra.mrb[22].mxu0 %vm6948_vm12, %v1284_v59 }
 0xc7d   :  { %5131 = vmatpush3.bf16.msra.mxu0 %v5551_v56  ;;  %4960 = vmatprep.mubr.msk.f32.mxu0 %vm5373_vm11, %v5371_v9 }
 0xc7e   :  { %5132 = vmatprep.subr.bf16.mxu0 %v5372_v53 }
 0xc7f   :  { %v1061_v60 = vpop.permute.xlu0 %1060 }
 0xc80   :  { %1063 = vst.msk [vmem:[#allocation3 + $0x10] sm:$0xff] %vm6948_vm12, %v1061_v60  ;;  %4906 = vmatmul.mubr.msk.f32.vlgmr.msra.gmra.mrb[16].mxu1 %vm6948_vm12, %v1061_v60 }
 0xc81   :  { %5113 = vmatpush3.bf16.msra.mxu1 %v5568_v63  ;;  %5134 = vmatpush3.bf16.msra.mxu0 %v5571_v1 }
 0xc82   :  { %5114 = vmatprep.subr.bf16.mxu1 %v5372_v53  ;;  %4927 = vmatprep.mubr.msk.f32.mxu1 %vm5373_vm11, %v5371_v9 }
 0xc83   :  { %5141 = vmatprep.subr.bf16.mxu0 %v5372_v53 }
 0xc85   :  { %5116 = vmatpush3.bf16.msra.mxu1 %v5584_v6 }
 0xc86   :  { %5123 = vmatprep.subr.bf16.mxu1 %v5372_v53 }
 0xd4f   :  { %v1456_v45 = vpop.f32.mrb[22].mxu0 }
 0xd50   :  { %v1460_v39 = vadd.f32 %v1456_v45, %v5644_v28  ;;  %v4940_v62 = vpop.f32.mrb[23].mxu0 }
 0xd52   :  { %5268 = vtanh.f32 %v1460_v39  ;;  %v4642_v7 = vmul.f32 -1.442695, %v1460_v39 }
 0xd53   :  { %v1139_v0 = vpop.f32.mrb[16].mxu1 }
 0xd54   :  { %v1143_v33 = vadd.f32 %v1139_v0, %v5640_v24  ;;  %v4907_v3 = vpop.f32.mrb[17].mxu1 }
 0xd56   :  { %5270 = vtanh.f32 %v1143_v33  ;;  %v4636_v28 = vmul.f32 -1.442695, %v1143_v33 }
 0xd57   :  { %5272 = vpow2.f32 %v4642_v7 }
 0xd58   :  { %5274 = vpow2.f32 %v4636_v28 }
 0xd5c   :  { %v5269_v49 = vpop.eup %5268 }
 0xd5d   :  { %1470 = vrot.lane.b32.xlu1 %v5269_v49, %s5375_s5 }
 0xd60   :  { %v5271_v5 = vpop.eup %5270 }
 0xd61   :  { %1153 = vrot.lane.b32.xlu0 %v5271_v5, %s5375_s5  ;;  %1163 = vperm.xlu1 %5201, %v5620_v12   ;;  %v5273_v16 = vpop.eup %5272 }
 0xd62   :  { %v1464_v19 = vadd.f32 1.0, %v5273_v16  ;;  %v5275_v23 = vpop.eup %5274 }
 0xd63   :  { %v1147_v24 = vadd.f32 1.0, %v5275_v23 }
 0xd64   :  { %5276 = vrcp.f32 %v1464_v19 }
 0xd65   :  { %5202 = vset.pattern.permute.xlu1 %v5379_v37  ;;  %5278 = vrcp.f32 %v1147_v24 }
 0xd6e   :  { %v5277_v29 = vpop.eup %5276 }
 0xd6f   :  { %v5279_v18 = vpop.eup %5278  ;;  %v1468_v40 = vmul.f32 %v5277_v29, %v5785_v32 }
 0xd70   :  { %v1151_v54 = vmul.f32 %v5279_v18, %v5790_v43 }
 0xdcf   :  { %v1471_v31 = vpop.permute.xlu1 %1470 }
 0xdd0   :  { %v1473_v48 = vmul.f32 %v5277_v29, %v1471_v31 }
 0xdd2   :  { %1475 = vrot.lane.b32.xlu0 %v1473_v48, %s5376_s26 }
 0xdd3   :  { %v1154_v35 = vpop.permute.xlu0 %1153 }
 0xdd4   :  { %v1156_v12 = vmul.f32 %v5279_v18, %v1154_v35 }
 0xdd6   :  { %1158 = vrot.lane.b32.xlu1 %v1156_v12, %s5376_s26 }
 0xde0   :  { %v1164_v37 = vpop.permute.xlu1 %1163 }
 0xe44   :  { %v1476_v44 = vpop.permute.xlu0 %1475 }
 0xe45   :  { %v1478_v10 = vadd.f32 %v1476_v44, %v1468_v40 }
 0xe47   :  { %v5825_v52 = vmul.f32 %v1478_v10, %v1164_v37 }
 0xe48   :  { %v1159_v55 = vpop.permute.xlu1 %1158 }
 0xe49   :  { %5280 = vtanh.f32 %v5825_v52  ;;  %v1161_v25 = vadd.f32 %v1159_v55, %v1151_v54 }
 0xe4b   :  { %v5829_v57 = vmul.f32 %v1164_v37, %v1161_v25 }
 0xe4d   :  { %5282 = vtanh.f32 %v5829_v57 }
 0xe53   :  { %v5281_v58 = vpop.eup %5280 }
 0xe54   :  { %1482 = vrot.lane.b32.xlu0 %v5281_v58, %s5375_s5 }
 0xe57   :  { %v5283_v59 = vpop.eup %5282 }
 0xe58   :  { %1169 = vrot.lane.b32.xlu1 %v5283_v59, %s5375_s5 }
 0xec6   :  { %v1483_v32 = vpop.permute.xlu0 %1482 }
 0xec7   :  { %v1485_v60 = vmul.f32 %v5277_v29, %v1483_v32 }
 0xec9   :  { %v1486_v45 = vmul.f32 %v1485_v60, %v1164_v37 }
 0xeca   :  { %v1170_v39 = vpop.permute.xlu1 %1169 }
 0xecb   :  { %v1172_v62 = vmul.f32 %v5279_v18, %v1170_v39  ;;  %1493 = vrot.lane.b32.xlu0 %v1486_v45, %s5376_s26 }
 0xecd   :  { %v1173_v43 = vmul.f32 %v1172_v62, %v1164_v37 }
 0xecf   :  { %1278 = vrot.lane.b32.xlu1 %v1173_v43, %s5376_s26 }
 0xf3d   :  { %v1494_v0 = vpop.permute.xlu0 %1493 }
 0xf3e   :  { %1496 = vst.msk [vmem:[#allocation4 + $0x18] sm:$0xff] %vm6948_vm12, %v1494_v0  ;;  %4961 = vmatmul.mubr.msk.f32.vlgmr.msra.gmra.mrb[24].mxu0 %vm6948_vm12, %v1494_v0 }
 0xf3f   :  { %5143 = vmatpush3.bf16.msra.mxu0 %v5551_v56  ;;  %4982 = vmatprep.mubr.msk.f32.mxu0 %vm5373_vm11, %v5371_v9 }
 0xf40   :  { %5144 = vmatprep.subr.bf16.mxu0 %v5372_v53 }
 0xf41   :  { %v1279_v33 = vpop.permute.xlu1 %1278 }
 0xf42   :  { %1281 = vst.msk [vmem:[#allocation3 + $0x18] sm:$0xff] %vm6948_vm12, %v1279_v33  ;;  %4928 = vmatmul.mubr.msk.f32.vlgmr.msra.gmra.mrb[18].mxu1 %vm6948_vm12, %v1279_v33 }
 0xf43   :  { %5125 = vmatpush3.bf16.msra.mxu1 %v5568_v63  ;;  %5146 = vmatpush3.bf16.msra.mxu0 %v5571_v1 }
 0xf44   :  { %5126 = vmatprep.subr.bf16.mxu1 %v5372_v53  ;;  %4949 = vmatprep.mubr.msk.f32.mxu1 %vm5373_vm11, %v5371_v9 }
 0xf45   :  { %5153 = vmatprep.subr.bf16.mxu0 %v5372_v53 }
 0xf47   :  { %5128 = vmatpush3.bf16.msra.mxu1 %v5584_v6 }
 0xf48   :  { %5135 = vmatprep.subr.bf16.mxu1 %v5372_v53 }
0x1011   :  { %v1666_v3 = vpop.f32.mrb[24].mxu0 }
0x1012   :  { %v1670_v49 = vadd.f32 %v1666_v3, %v5652_v38  ;;  %v4962_v5 = vpop.f32.mrb[25].mxu0 }
0x1014   :  { %5284 = vtanh.f32 %v1670_v49  ;;  %v4646_v24 = vmul.f32 -1.442695, %v1670_v49 }
0x1015   :  { %v1357_v7 = vpop.f32.mrb[18].mxu1 }
0x1016   :  { %v1361_v28 = vadd.f32 %v1357_v7, %v5650_v34  ;;  %v4929_v16 = vpop.f32.mrb[19].mxu1 }
0x1018   :  { %5286 = vtanh.f32 %v1361_v28  ;;  %v4640_v29 = vmul.f32 -1.442695, %v1361_v28 }
0x1019   :  { %5288 = vpow2.f32 %v4646_v24 }
0x101a   :  { %5290 = vpow2.f32 %v4640_v29 }
0x101e   :  { %v5285_v19 = vpop.eup %5284 }
0x101f   :  { %1680 = vrot.lane.b32.xlu0 %v5285_v19, %s5375_s5 }
0x1022   :  { %v5287_v23 = vpop.eup %5286 }
0x1023   :  { %1371 = vrot.lane.b32.xlu1 %v5287_v23, %s5375_s5  ;;  %v5289_v31 = vpop.eup %5288 }
0x1024   :  { %v1674_v48 = vadd.f32 1.0, %v5289_v31  ;;  %v5291_v38 = vpop.eup %5290 }
0x1025   :  { %v1365_v18 = vadd.f32 1.0, %v5291_v38 }
0x1026   :  { %5292 = vrcp.f32 %v1674_v48 }
0x1027   :  { %5294 = vrcp.f32 %v1365_v18 }
0x1030   :  { %v5293_v35 = vpop.eup %5292 }
0x1031   :  { %v5295_v37 = vpop.eup %5294  ;;  %v1678_v10 = vmul.f32 %v5293_v35, %v5825_v52 }
0x1032   :  { %v1369_v58 = vmul.f32 %v5295_v37, %v5829_v57 }
0x1091   :  { %v1681_v34 = vpop.permute.xlu0 %1680 }
0x1092   :  { %v1683_v12 = vmul.f32 %v5293_v35, %v1681_v34 }
0x1094   :  { %1685 = vrot.lane.b32.xlu0 %v1683_v12, %s5376_s26 }
0x1095   :  { %v1372_v40 = vpop.permute.xlu1 %1371 }
0x1096   :  { %v1374_v44 = vmul.f32 %v5295_v37, %v1372_v40 }
0x1098   :  { %1376 = vrot.lane.b32.xlu1 %v1374_v44, %s5376_s26 }
0x1106   :  { %v1686_v54 = vpop.permute.xlu0 %1685 }
0x1107   :  { %v1688_v55 = vadd.f32 %v1686_v54, %v1678_v10 }
0x1109   :  { %v5860_v25 = vmul.f32 %v1688_v55, %v5779_v26 }
0x110a   :  { %v1377_v59 = vpop.permute.xlu1 %1376 }
0x110b   :  { %5296 = vtanh.f32 %v5860_v25  ;;  %v1379_v32 = vadd.f32 %v1377_v59, %v1369_v58 }
0x110d   :  { %v5865_v60 = vmul.f32 %v1379_v32, %v5781_v20 }
0x110f   :  { %5298 = vtanh.f32 %v5865_v60 }
0x1115   :  { %v5297_v45 = vpop.eup %5296 }
0x1116   :  { %1692 = vrot.lane.b32.xlu0 %v5297_v45, %s5375_s5 }
0x1119   :  { %v5299_v52 = vpop.eup %5298 }
0x111a   :  { %1383 = vrot.lane.b32.xlu1 %v5299_v52, %s5375_s5 }
0x1188   :  { %v1693_v39 = vpop.permute.xlu0 %1692 }
0x1189   :  { %v1695_v62 = vmul.f32 %v5293_v35, %v1693_v39 }
0x118b   :  { %v1696_v43 = vmul.f32 %v1695_v62, %v5779_v26 }
0x118c   :  { %v1384_v57 = vpop.permute.xlu1 %1383 }
0x118d   :  { %v1386_v0 = vmul.f32 %v5295_v37, %v1384_v57  ;;  %1703 = vrot.lane.b32.xlu0 %v1696_v43, %s5376_s26 }
0x118f   :  { %v1387_v33 = vmul.f32 %v1386_v0, %v5781_v20 }
0x1191   :  { %1488 = vrot.lane.b32.xlu1 %v1387_v33, %s5376_s26 }
0x11ff   :  { %v1704_v3 = vpop.permute.xlu0 %1703 }
0x1200   :  { %1706 = vst.msk [vmem:[#allocation4 + $0x10] sm:$0xff] %vm6948_vm12, %v1704_v3  ;;  %4983 = vmatmul.mubr.msk.f32.vlgmr.msra.gmra.mrb[26].mxu0 %vm6948_vm12, %v1704_v3 }
0x1201   :  { %5155 = vmatpush3.bf16.msra.mxu0 %v5551_v56  ;;  %5004 = vmatprep.mubr.msk.f32.mxu0 %vm5373_vm11, %v5371_v9 }
0x1202   :  { %5156 = vmatprep.subr.bf16.mxu0 %v5372_v53 }
0x1203   :  { %v1489_v26 = vpop.permute.xlu1 %1488 }
0x1204   :  { %1491 = vst.msk [vmem:[#allocation3 + $0x20] sm:$0xff] %vm6948_vm12, %v1489_v26  ;;  %4950 = vmatmul.mubr.msk.f32.vlgmr.msra.gmra.mrb[20].mxu1 %vm6948_vm12, %v1489_v26 }
0x1205   :  { %5137 = vmatpush3.bf16.msra.mxu1 %v5568_v63  ;;  %5158 = vmatpush3.bf16.msra.mxu0 %v5571_v1 }
0x1206   :  { %5138 = vmatprep.subr.bf16.mxu1 %v5372_v53  ;;  %4971 = vmatprep.mubr.msk.f32.mxu1 %vm5373_vm11, %v5371_v9 }
0x1209   :  { %5140 = vmatpush3.bf16.msra.mxu1 %v5584_v6 }
0x120a   :  { %5147 = vmatprep.subr.bf16.mxu1 %v5372_v53 }
0x12d3   :  { %v1876_v56 = vpop.f32.mrb[26].mxu0 }
0x12d4   :  { %v1880_v20 = vadd.f32 %v1876_v56, %v5646_v30  ;;  %v4984_v49 = vpop.f32.mrb[27].mxu0 }
0x12d6   :  { %5300 = vtanh.f32 %v1880_v20  ;;  %v4650_v19 = vmul.f32 -1.442695, %v1880_v20 }
0x12d7   :  { %v1567_v5 = vpop.f32.mrb[20].mxu1 }
0x12d8   :  { %v1571_v7 = vadd.f32 %v1567_v5, %v5656_v42  ;;  %v4951_v28 = vpop.f32.mrb[21].mxu1 }
0x12da   :  { %5302 = vtanh.f32 %v1571_v7  ;;  %v4644_v23 = vmul.f32 -1.442695, %v1571_v7 }
0x12db   :  { %5304 = vpow2.f32 %v4650_v19 }
0x12dc   :  { %5306 = vpow2.f32 %v4644_v23 }
0x12e0   :  { %v5301_v1 = vpop.eup %5300 }
0x12e1   :  { %1890 = vrot.lane.b32.xlu0 %v5301_v1, %s5375_s5 }
0x12e4   :  { %v5303_v16 = vpop.eup %5302 }
0x12e5   :  { %1581 = vrot.lane.b32.xlu1 %v5303_v16, %s5375_s5  ;;  %v5305_v24 = vpop.eup %5304 }
0x12e6   :  { %v1884_v29 = vadd.f32 1.0, %v5305_v24  ;;  %v5307_v30 = vpop.eup %5306 }
0x12e7   :  { %v1575_v31 = vadd.f32 1.0, %v5307_v30 }
0x12e8   :  { %5308 = vrcp.f32 %v1884_v29 }
0x12e9   :  { %5310 = vrcp.f32 %v1575_v31 }
0x12f2   :  { %v5309_v48 = vpop.eup %5308 }
0x12f3   :  { %v5311_v18 = vpop.eup %5310  ;;  %v1888_v12 = vmul.f32 %v5309_v48, %v5860_v25 }
0x12f4   :  { %v1579_v10 = vmul.f32 %v5311_v18, %v5865_v60 }
0x1353   :  { %v1891_v42 = vpop.permute.xlu0 %1890 }
0x1354   :  { %v1893_v38 = vmul.f32 %v5309_v48, %v1891_v42 }
0x1356   :  { %1895 = vrot.lane.b32.xlu0 %v1893_v38, %s5376_s26 }
0x1357   :  { %v1582_v35 = vpop.permute.xlu1 %1581 }
0x1358   :  { %v1584_v34 = vmul.f32 %v5311_v18, %v1582_v35 }
0x135a   :  { %1586 = vrot.lane.b32.xlu1 %v1584_v34, %s5376_s26 }
0x13c8   :  { %v1896_v37 = vpop.permute.xlu0 %1895 }
0x13c9   :  { %v1898_v40 = vadd.f32 %v1896_v37, %v1888_v12 }
0x13cb   :  { %v1899_v44 = vmul.f32 %v1898_v40, %v5741_v21 }
0x13cc   :  { %v1587_v54 = vpop.permute.xlu1 %1586 }
0x13cd   :  { %5312 = vtanh.f32 %v1899_v44  ;;  %v1589_v55 = vadd.f32 %v1587_v54, %v1579_v10 }
0x13cf   :  { %v1590_v58 = vmul.f32 %v1589_v55, %v5735_v4 }
0x13d1   :  { %5314 = vtanh.f32 %v1590_v58 }
0x13d7   :  { %v5313_v59 = vpop.eup %5312 }
0x13d8   :  { %1902 = vrot.lane.b32.xlu0 %v5313_v59, %s5375_s5  ;;  %v2138_v59 = vld [vmem:[#allocation4 + $0x10] sm:$0xff] }
0x13db   :  { %v5315_v32 = vpop.eup %5314 }
0x13dc   :  { %1593 = vrot.lane.b32.xlu1 %v5315_v32, %s5375_s5  ;;  %v2139_v32 = vld [vmem:[#allocation4 + $0x18] sm:$0xff] }
0x144a   :  { %v1903_v45 = vpop.permute.xlu0 %1902 }
0x144b   :  { %v1905_v25 = vmul.f32 %v5309_v48, %v1903_v45  ;;  %v2140_v45 = vld [vmem:[#allocation4 + $0x20] sm:$0xff] }
0x144d   :  { %v1906_v52 = vmul.f32 %v1905_v25, %v5741_v21  ;;  %v2141_v25 = vld [vmem:[#allocation4 + $0x28] sm:$0xff] }
0x144e   :  { %v1594_v39 = vpop.permute.xlu1 %1593 }
0x144f   :  { %v1596_v62 = vmul.f32 %v5311_v18, %v1594_v39  ;;  %1913 = vrot.lane.b32.xlu0 %v1906_v52, %s5376_s26  ;;  %v2142_v52 = vld [vmem:[#allocation4 + $0x30] sm:$0xff]  ;;  %v2143_v39 = vld [vmem:[#allocation4 + $0x38] sm:$0xff] }
0x1451   :  { %v1597_v60 = vmul.f32 %v1596_v62, %v5735_v4  ;;  %v2128_v62 = vld [vmem:[#allocation3] sm:$0xff] }
0x1453   :  { %1698 = vrot.lane.b32.xlu1 %v1597_v60, %s5376_s26  ;;  %v2129_v60 = vld [vmem:[#allocation3 + $0x8] sm:$0xff] }
0x14c1   :  { %v1914_v43 = vpop.permute.xlu0 %1913 }
0x14c2   :  { %1916 = vst.msk [vmem:[#allocation4 + $0x8] sm:$0xff] %vm6948_vm12, %v1914_v43  ;;  %5005 = vmatmul.mubr.msk.f32.vlgmr.msra.gmra.mrb[28].mxu0 %vm6948_vm12, %v1914_v43  ;;  %v2130_v43 = vld [vmem:[#allocation3 + $0x10] sm:$0xff] }
0x14c5   :  { %v1699_v57 = vpop.permute.xlu1 %1698 }
0x14c6   :  { %1701 = vst.msk [vmem:[#allocation3 + $0x28] sm:$0xff] %vm6948_vm12, %v1699_v57  ;;  %4972 = vmatmul.mubr.msk.f32.vlgmr.msra.gmra.mrb[22].mxu1 %vm6948_vm12, %v1699_v57  ;;  %v2131_v57 = vld [vmem:[#allocation3 + $0x18] sm:$0xff] }
0x14c7   :  { %5149 = vmatpush3.bf16.msra.mxu1 %v5568_v63  ;;  %4993 = vmatprep.mubr.msk.f32.mxu1 %vm5373_vm11, %v5371_v9  ;;  %vm2657_vm11 = vcmask 1043459  }
0x14c8   :  { %5150 = vmatprep.subr.bf16.mxu1 %v5372_v53 }
0x14cb   :  { %5152 = vmatpush3.bf16.msra.mxu1 %v5584_v6 }
0x1595   :  { %v2086_v4 = vpop.f32.mrb[28].mxu0 }
0x1596   :  { %v2090_v21 = vadd.f32 %v2086_v4, %v5638_v22  ;;  %v5006_v0 = vpop.f32.mrb[29].mxu0  ;;  %v2132_v4 = vld [vmem:[#allocation3 + $0x20] sm:$0xff] }
0x1598   :  { %5316 = vtanh.f32 %v2090_v21  ;;  %v4654_v9 = vmul.f32 -1.442695, %v2090_v21  ;;  %v2133_v21 = vld [vmem:[#allocation3 + $0x28] sm:$0xff] }
0x1599   :  { %v1777_v33 = vpop.f32.mrb[22].mxu1 }
0x159a   :  { %v1781_v3 = vadd.f32 %v1777_v33, %v5660_v47  ;;  %v4973_v26 = vpop.f32.mrb[23].mxu1 }
0x159c   :  { %5318 = vtanh.f32 %v1781_v3  ;;  %v4648_v53 = vmul.f32 -1.442695, %v1781_v3 }
0x159d   :  { %5320 = vpow2.f32 %v4654_v9  ;;  %v5968_v9 = vld [vmem:[%s6946_s7 + $0x8] ss:$0 sm:$0xff] }
0x159e   :  { %5322 = vpow2.f32 %v4648_v53 }
0x15a2   :  { %v5317_v56 = vpop.eup %5316 }
0x15a3   :  { %2100 = vrot.lane.b32.xlu0 %v5317_v56, %s5375_s5  ;;  %v5958_v56 = vsub.s32 6, %v5625_v14 }
0x15a6   :  { %v5319_v63 = vpop.eup %5318 }
0x15a7   :  { %1791 = vrot.lane.b32.xlu1 %v5319_v63, %s5375_s5  ;;  %v5321_v6 = vpop.eup %5320  ;;  %v5963_v63 = vld [vmem:[%s6946_s7] sm:$0xff] }
0x15a8   :  { %v2094_v20 = vadd.f32 1.0, %v5321_v6  ;;  %v5323_v22 = vpop.eup %5322  ;;  %v2428_v6 = vrot.slane %v5963_v63, %v5958_v56 }
0x15a9   :  { %v1785_v49 = vadd.f32 1.0, %v5323_v22 }
0x15aa   :  { %5324 = vrcp.f32 %v2094_v20 }
0x15ab   :  { %5326 = vrcp.f32 %v1785_v49 }
0x15b4   :  { %v5325_v5 = vpop.eup %5324 }
0x15b5   :  { %v5327_v28 = vpop.eup %5326  ;;  %v2098_v19 = vmul.f32 %v5325_v5, %v1899_v44  ;;  %v2127_v44 = vld [vmem:[%s6945_s6] sm:$0xff] }
0x15b6   :  { %v1789_v30 = vmul.f32 %v5327_v28, %v1590_v58 }
0x1615   :  { %v2101_v47 = vpop.permute.xlu0 %2100 }
0x1616   :  { %v2103_v7 = vmul.f32 %v5325_v5, %v2101_v47 }
0x1618   :  { %2105 = vrot.lane.b32.xlu0 %v2103_v7, %s5376_s26 }
0x1619   :  { %v1792_v1 = vpop.permute.xlu1 %1791 }
0x161a   :  { %v1794_v16 = vmul.f32 %v5327_v28, %v1792_v1  ;;  %v5989_v1 = vsub.s32 2, %v5625_v14 }
0x161c   :  { %1796 = vrot.lane.b32.xlu1 %v1794_v16, %s5376_s26 }
0x168a   :  { %v2106_v23 = vpop.permute.xlu0 %2105 }
0x168b   :  { %v2108_v24 = vadd.f32 %v2106_v23, %v2098_v19 }
0x168d   :  { %v2109_v29 = vmul.f32 %v2108_v24, %v5688_v41 }
0x168e   :  { %v1797_v31 = vpop.permute.xlu1 %1796 }
0x168f   :  { %5328 = vtanh.f32 %v2109_v29  ;;  %v1799_v48 = vadd.f32 %v1797_v31, %v1789_v30  ;;  %v6000_v29 = vsub.s32 5, %v5625_v14  ;;  %v6003_v30 = vsub.s32 4, %v5625_v14 }
0x1691   :  { %v5922_v42 = vmul.f32 %v1799_v48, %v5710_v8 }
0x1693   :  { %5330 = vtanh.f32 %v5922_v42 }
0x1699   :  { %v5329_v38 = vpop.eup %5328 }
0x169a   :  { %2112 = vrot.lane.b32.xlu0 %v5329_v38, %s5375_s5  ;;  %v6010_v38 = vsub.s32 7, %v5625_v14 }
0x169d   :  { %v5331_v18 = vpop.eup %5330 }
0x169e   :  { %1803 = vrot.lane.b32.xlu1 %v5331_v18, %s5375_s5 }
0x170c   :  { %v2113_v35 = vpop.permute.xlu0 %2112 }
0x170d   :  { %v2115_v34 = vmul.f32 %v5325_v5, %v2113_v35 }
0x170f   :  { %v2116_v12 = vmul.f32 %v2115_v34, %v5688_v41  ;;  %v5340_v34 = vld [vmem:[%s6940_s1] sm:$0xff] }
0x1710   :  { %v1804_v37 = vpop.permute.xlu1 %1803  ;;  %vm2647_vm13 = vcmp.gt.f32.partialorder %v5340_v34, 0.0 }
0x1711   :  { %v1806_v40 = vmul.f32 %v5327_v28, %v1804_v37  ;;  %2123 = vrot.lane.b32.xlu0 %v2116_v12, %s5376_s26  ;;  %v5986_v28 = vsub.s32 3, %v5625_v14  ;;  %v6020_v12 = vsel %vm2647_vm13, 1, %v5370_v2 }
0x1713   :  { %v1807_v10 = vmul.f32 %v1806_v40, %v5710_v8  ;;  %v2137_v8 = vld [vmem:[#allocation4 + $0x8] sm:$0xff] }
0x1715   :  { %2145 = vrot.lane.b32.xlu0 %v2127_v44, %s5383_s29  ;;  %1908 = vrot.lane.b32.xlu1 %v1807_v10, %s5376_s26 }
0x1783   :  { %v2124_v54 = vpop.permute.xlu0 %2123 }
0x1784   :  { %2126 = vst.msk [vmem:[#allocation4] sm:$0xff] %vm6948_vm12, %v2124_v54 }
0x1787   :  { %v2146_v55 = vpop.permute.xlu0 %2145  ;;  %v1909_v58 = vpop.permute.xlu1 %1908 }
0x1788   :  { %1911 = vst.msk [vmem:[#allocation3 + $0x30] sm:$0xff] %vm6948_vm12, %v1909_v58  ;;  %4994 = vmatmul.mubr.msk.f32.vlgmr.msra.gmra.mrb[24].mxu1 %vm6948_vm12, %v1909_v58  ;;  %5007 = vmatprep.subr.msk.mxu1 %vm6948_vm12, %v2146_v55 }
0x1789   :  { %5008 = vmatpush3.xpose.msk.msra.mxu1 %vm6948_vm12, %v2146_v55 }
0x178a   :  { %5021 = vmatprep.subr.msk.mxu1 %vm6948_vm12, %v2127_v44 }
0x178b   :  { %v2136_v41 = vld [vmem:[#allocation4] sm:$0xff] }
0x178c   :  { %5009 = vmatprep.mubr.msk.f32.mxu1 %vm6948_vm12, %v2136_v41 }
0x178d   :  { %5010 = vmatmul.mubr.msk.f32.vlgmr.msra.gmra.mrb[26].mxu1 %vm6948_vm12, %v2137_v8 }
0x178e   :  { %5022 = vmatpush3.xpose.msk.msra.mxu1 %vm6948_vm12, %v2127_v44  ;;  %5012 = vmatprep.mubr.msk.f32.mxu1 %vm6948_vm12, %v2138_v59 }
0x178f   :  { %v2134_v0 = vld [vmem:[#allocation3 + $0x30] sm:$0xff] }
0x1791   :  { %5013 = vmatmul.mubr.msk.f32.gmra.mrb[28].mxu1 %vm6948_vm12, %v2139_v32 }
0x1792   :  { %5015 = vmatprep.mubr.msk.f32.mxu1 %vm6948_vm12, %v2140_v45 }
0x1795   :  { %5016 = vmatmul.mubr.msk.f32.gmra.mrb[30].mxu1 %vm6948_vm12, %v2141_v25 }
0x1796   :  { %5018 = vmatprep.mubr.msk.f32.mxu1 %vm6948_vm12, %v2142_v52 }
0x1799   :  { %5019 = vmatmul.mubr.msk.f32.gmra.mrb[32].mxu1 %vm6948_vm12, %v2143_v39 }
0x179a   :  { %5023 = vmatprep.mubr.msk.f32.mxu1 %vm6948_vm12, %v2128_v62 }
0x179d   :  { %5024 = vmatmul.mubr.msk.f32.vlgmr.msra.gmra.mrb[26].mxu1 %vm6948_vm12, %v2129_v60 }
0x179e   :  { %5026 = vmatprep.mubr.msk.f32.mxu1 %vm6948_vm12, %v2130_v43 }
0x17a1   :  { %5027 = vmatmul.mubr.msk.f32.gmra.mrb[28].mxu1 %vm6948_vm12, %v2131_v57 }
0x17a2   :  { %5029 = vmatprep.mubr.msk.f32.mxu1 %vm6948_vm12, %v2132_v4 }
0x17a5   :  { %5030 = vmatmul.mubr.msk.f32.gmra.mrb[30].mxu1 %vm6948_vm12, %v2133_v21 }
0x17a6   :  { %5032 = vmatprep.mubr.msk.f32.mxu1 %vm6948_vm12, %v2134_v0 }
0x185b   :  { %v1987_v33 = vpop.f32.mrb[24].mxu1 }
0x185c   :  { %v1991_v3 = vadd.f32 %v1987_v33, %v5664_v51  ;;  %v4995_v26 = vpop.f32.mrb[25].mxu1 }
0x185e   :  { %5332 = vtanh.f32 %v1991_v3  ;;  %v4652_v40 = vmul.f32 -1.442695, %v1991_v3 }
0x1860   :  { %5334 = vpow2.f32 %v4652_v40 }
0x1868   :  { %v5333_v37 = vpop.eup %5332 }
0x186a   :  { %v5335_v43 = vpop.eup %5334 }
0x1870   :  { %v5970_v53 = vpop.f32.mrb[26].mxu1 }
0x1871   :  { %v2370_v51 = vpop.f32.mrb[27].mxu1 }
0x1872   :  { %v2414_v20 = vadd.f32 %v5968_v9, %v2370_v51 }
0x1874   :  { %v5975_v22 = vadd.f32 %v2428_v6, %v2414_v20  ;;  %v5977_v49 = vpop.f32.mrb[28].mxu1 }
0x1875   :  { %v5979_v5 = vpop.f32.mrb[29].mxu1 }
0x1876   :  { %v2440_v47 = vrot.slane %v5975_v22, %v5628_v15  ;;  %v2433_v7 = vrot.slane %v5975_v22, %v5634_v17  ;;  %v2454_v23 = vrot.slane %v5975_v22, %v5986_v28  ;;  %v2447_v24 = vrot.slane %v5975_v22, %v5989_v1 }
0x1877   :  { %v2468_v31 = vrot.slane %v5975_v22, %v6000_v29  ;;  %v2461_v48 = vrot.slane %v5975_v22, %v6003_v30  ;;  %v2482_v18 = vrot.slane %v5975_v22, %v6010_v38  ;;  %v2475_v35 = vrot.slane %v5975_v22, %v5958_v56 }
0x1878   :  { %2442 = vbcast.lane.b32.xlu0 %v2440_v47, 256  ;;  %2435 = vbcast.lane.b32.xlu1 %v2433_v7, 256  ;;  %v5991_v16 = vpop.f32.mrb[30].mxu1 }
0x1879   :  { %v5993_v19 = vpop.f32.mrb[31].mxu1 }
0x187c   :  { %2456 = vbcast.lane.b32.xlu0 %v2454_v23, 256  ;;  %2449 = vbcast.lane.b32.xlu1 %v2447_v24, 256  ;;  %v1995_v23 = vadd.f32 1.0, %v5335_v43 }
0x187e   :  { %5336 = vrcp.f32 %v1995_v23 }
0x1880   :  { %2470 = vbcast.lane.b32.xlu0 %v2468_v31, 256  ;;  %2463 = vbcast.lane.b32.xlu1 %v2461_v48, 256 }
0x1884   :  { %2484 = vbcast.lane.b32.xlu0 %v2482_v18, 256  ;;  %2477 = vbcast.lane.b32.xlu1 %v2475_v35, 256 }
0x1888   :  { %2001 = vrot.lane.b32.xlu0 %v5333_v37, %s5375_s5  ;;  %2650 = vperm.xlu1 %5202, %v6020_v12  }
0x188c   :  { %5204 = vset.pattern.permute.xlu1 %v5382_v61 }
0x18ea   :  { %v2443_v44 = vpop.permute.xlu0 %2442  ;;  %v2436_v10 = vpop.permute.xlu1 %2435 }
0x18eb   :  { %v2487_v54 = vadd.f32 %v2443_v44, %v5963_v63  ;;  %v2486_v55 = vadd.f32 %v2436_v10, %v5963_v63 }
0x18ed   :  { %v2502_v58 = vsel %vm2494_vm14, %v2487_v54, -inf  ;;  %v2495_v41 = vsel %vm2494_vm14, %v2486_v55, -inf }
0x18ee   :  { %v2503_v8 = vrot.slane %v2502_v58, 4  ;;  %v2496_v59 = vrot.slane %v2495_v41, 4  ;;  %v2457_v32 = vpop.permute.xlu0 %2456  ;;  %v2450_v45 = vpop.permute.xlu1 %2449 }
0x18ef   :  { %v2489_v25 = vadd.f32 %v2457_v32, %v5963_v63  ;;  %v6031_v61 = vadd.f32 %v2450_v45, %v5963_v63 }
0x18f0   :  { %v2504_v52 = vmax.f32 %v2502_v58, %v2503_v8  ;;  %v2497_v39 = vmax.f32 %v2495_v41, %v2496_v59  ;;  %v6052_v59 = vadd.f32 %v5970_v53, %v5968_v9 }
0x18f1   :  { %v2516_v62 = vsel %vm2494_vm14, %v2489_v25, -inf  ;;  %v2509_v60 = vsel %vm2494_vm14, %v6031_v61, -inf }
0x18f2   :  { %v2505_v57 = vrot.slane %v2504_v52, 2  ;;  %v2498_v4 = vrot.slane %v2497_v39, 2  ;;  %v2517_v21 = vrot.slane %v2516_v62, 4  ;;  %v2510_v0 = vrot.slane %v2509_v60, 4  ;;  %v2471_v33 = vpop.permute.xlu0 %2470  ;;  %v2464_v3 = vpop.permute.xlu1 %2463 }
0x18f3   :  { %v6037_v26 = vadd.f32 %v2471_v33, %v5963_v63  ;;  %v6040_v6 = vadd.f32 %v2464_v3, %v5963_v63 }
0x18f4   :  { %v2506_v51 = vmax.f32 %v2504_v52, %v2505_v57  ;;  %v2499_v20 = vmax.f32 %v2497_v39, %v2498_v4  ;;  %v2518_v47 = vmax.f32 %v2516_v62, %v2517_v21  ;;  %v2511_v7 = vmax.f32 %v2509_v60, %v2510_v0 }
0x18f5   :  { %v2530_v24 = vsel %vm2494_vm14, %v6037_v26, -inf  ;;  %v2523_v31 = vsel %vm2494_vm14, %v6040_v6, -inf }
0x18f6   :  { %v2507_v48 = vrot.slane %v2506_v51, 1  ;;  %v2500_v18 = vrot.slane %v2499_v20, 1  ;;  %v2519_v35 = vrot.slane %v2518_v47, 2  ;;  %v2512_v34 = vrot.slane %v2511_v7, 2  ;;  %v2485_v44 = vpop.permute.xlu0 %2484  ;;  %v2478_v62 = vpop.permute.xlu1 %2477 }
0x18f7   :  { %v2531_v37 = vrot.slane %v2530_v24, 4  ;;  %v2524_v40 = vrot.slane %v2523_v31, 4  ;;  %v6057_v39 = vadd.f32 %v2485_v44, %v5963_v63 }
0x18f8   :  { %v6046_v10 = vmax.f32 %v2506_v51, %v2507_v48  ;;  %v6048_v58 = vmax.f32 %v2499_v20, %v2500_v18  ;;  %v2520_v41 = vmax.f32 %v2518_v47, %v2519_v35  ;;  %v2513_v8 = vmax.f32 %v2511_v7, %v2512_v34 }
0x18f9   :  { %v2532_v32 = vmax.f32 %v2530_v24, %v2531_v37  ;;  %v2525_v45 = vmax.f32 %v2523_v31, %v2524_v40  ;;  %v6068_v51 = vadd.f32 %v2478_v62, %v5963_v63  ;;  %v2544_v7 = vsel %vm2494_vm14, %v6057_v39, -inf }
0x18fa   :  { %vm2552_vm15 = vcmp.eq.f32.partialorder %v2487_v54, %v6046_v10  ;;  %vm2551_vm0 = vcmp.eq.f32.partialorder %v2486_v55, %v6048_v58  ;;  %v2521_v52 = vrot.slane %v2520_v41, 1  ;;  %v2514_v57 = vrot.slane %v2513_v8, 1 }
0x18fb   :  { %v2560_v60 = vsel %vm2552_vm15, %v5625_v14, 8  ;;  %v2559_v43 = vsel %vm2551_vm0, %v5625_v14, 8  ;;  %v2533_v4 = vrot.slane %v2532_v32, 2  ;;  %v2526_v54 = vrot.slane %v2525_v45, 2 }
0x18fc   :  { %v2577_v53 = vsel %vm2494_vm14, %v2560_v60, 2147483647  ;;  %v2567_v21 = vsel %vm2494_vm14, %v2559_v43, 2147483647  ;;  %v6063_v0 = vmax.f32 %v2520_v41, %v2521_v52  ;;  %v6065_v3 = vmax.f32 %v2513_v8, %v2514_v57 }
0x18fd   :  { %v2578_v33 = vrot.slane %v2577_v53, 4  ;;  %v2568_v55 = vrot.slane %v2567_v21, 4  ;;  %v2534_v20 = vmax.f32 %v2532_v32, %v2533_v4  ;;  %v2527_v47 = vmax.f32 %v2525_v45, %v2526_v54  ;;  %v6081_v32 = vpop.eup %5336 }
0x18fe   :  { %vm2554_vm1 = vcmp.eq.f32.partialorder %v2489_v25, %v6063_v0  ;;  %vm2553_vm4 = vcmp.eq.f32.partialorder %v6031_v61, %v6065_v3  ;;  %v2537_v8 = vsel %vm2494_vm14, %v6068_v51, -inf  ;;  %v2545_v61 = vrot.slane %v2544_v7, 4 }
0x18ff   :  { %vm2579_vm2 = vcmp.lt.s32.totalorder %v2577_v53, %v2578_v33  ;;  %vm2569_vm3 = vcmp.lt.s32.totalorder %v2567_v21, %v2568_v55  ;;  %v2562_v23 = vsel %vm2554_vm1, %v5625_v14, 8  ;;  %v2561_v18 = vsel %vm2553_vm4, %v5625_v14, 8 }
0x1900   :  { %v2580_v24 = vsel %vm2579_vm2, %v2577_v53, %v2578_v33  ;;  %v2570_v31 = vsel %vm2569_vm3, %v2567_v21, %v2568_v55  ;;  %v2597_v48 = vsel %vm2494_vm14, %v2562_v23, 2147483647  ;;  %v2587_v37 = vsel %vm2494_vm14, %v2561_v18, 2147483647 }
0x1901   :  { %v2581_v25 = vrot.slane %v2580_v24, 2  ;;  %v2571_v35 = vrot.slane %v2570_v31, 2  ;;  %v2598_v34 = vrot.slane %v2597_v48, 4  ;;  %v2588_v40 = vrot.slane %v2587_v37, 4 }
0x1902   :  { %v2535_v44 = vrot.slane %v2534_v20, 1  ;;  %v2528_v41 = vrot.slane %v2527_v47, 1  ;;  %v2538_v33 = vrot.slane %v2537_v8, 4  ;;  %vm2659_vm1 = vcmask 1044484  }
0x1903   :  { %vm2582_vm6 = vcmp.lt.s32.totalorder %v2580_v24, %v2581_v25  ;;  %vm2572_vm7 = vcmp.lt.s32.totalorder %v2570_v31, %v2571_v35  ;;  %vm2599_vm8 = vcmp.lt.s32.totalorder %v2597_v48, %v2598_v34  ;;  %vm2589_vm10 = vcmp.lt.s32.totalorder %v2587_v37, %v2588_v40 }
0x1904   :  { %v2583_v45 = vsel %vm2582_vm6, %v2580_v24, %v2581_v25  ;;  %v2573_v52 = vsel %vm2572_vm7, %v2570_v31, %v2571_v35  ;;  %v2600_v62 = vsel %vm2599_vm8, %v2597_v48, %v2598_v34  ;;  %v2590_v4 = vsel %vm2589_vm10, %v2587_v37, %v2588_v40  ;;  %v2002_v40 = vpop.permute.xlu0 %2001 }
0x1905   :  { %v2584_v60 = vrot.slane %v2583_v45, 1  ;;  %v2574_v43 = vrot.slane %v2573_v52, 1  ;;  %v2601_v57 = vrot.slane %v2600_v62, 2  ;;  %v2591_v53 = vrot.slane %v2590_v4, 2 }
0x1906   :  { %v6083_v21 = vmax.f32 %v2534_v20, %v2535_v44  ;;  %v2529_v54 = vmax.f32 %v2527_v47, %v2528_v41  ;;  %v2546_v55 = vmax.f32 %v2544_v7, %v2545_v61  ;;  %v2539_v35 = vmax.f32 %v2537_v8, %v2538_v33 }
0x1907   :  { %vm2585_vm13 = vcmp.lt.s32.totalorder %v2583_v45, %v2584_v60  ;;  %vm2575_vm15 = vcmp.lt.s32.totalorder %v2573_v52, %v2574_v43  ;;  %vm2602_vm0 = vcmp.lt.s32.totalorder %v2600_v62, %v2601_v57  ;;  %vm2592_vm2 = vcmp.lt.s32.totalorder %v2590_v4, %v2591_v53 }
0x1908   :  { %v2586_v23 = vsel %vm2585_vm13, %v2583_v45, %v2584_v60  ;;  %v2576_v24 = vsel %vm2575_vm15, %v2573_v52, %v2574_v43  ;;  %v2603_v31 = vsel %vm2602_vm0, %v2600_v62, %v2601_v57  ;;  %v2593_v25 = vsel %vm2592_vm2, %v2590_v4, %v2591_v53 }
0x1909   :  { %v2654_v48 = vsel %vm2653_vm5, %v2586_v23, %v2576_v24  ;;  %v2604_v18 = vrot.slane %v2603_v31, 1  ;;  %vm2556_vm3 = vcmp.eq.f32.partialorder %v6037_v26, %v6083_v21  ;;  %v2594_v20 = vrot.slane %v2593_v25, 1 }
0x190a   :  { %v2564_v47 = vsel %vm2556_vm3, %v5625_v14, 8  ;;  %vm2555_vm4 = vcmp.eq.f32.partialorder %v6040_v6, %v2529_v54  ;;  %v2547_v37 = vrot.slane %v2546_v55, 2  ;;  %v2676_v44 = vsel %vm2653_vm5, %v6046_v10, %v6048_v58 }
0x190b   :  { %vm2605_vm6 = vcmp.lt.s32.totalorder %v2603_v31, %v2604_v18  ;;  %v2617_v7 = vsel %vm2494_vm14, %v2564_v47, 2147483647  ;;  %v2563_v34 = vsel %vm2555_vm4, %v5625_v14, 8  ;;  %vm2595_vm7 = vcmp.lt.s32.totalorder %v2593_v25, %v2594_v20 }
0x190c   :  { %v2618_v41 = vrot.slane %v2617_v7, 4  ;;  %v2607_v26 = vsel %vm2494_vm14, %v2563_v34, 2147483647  ;;  %v2606_v61 = vsel %vm2605_vm6, %v2603_v31, %v2604_v18  ;;  %v2596_v45 = vsel %vm2595_vm7, %v2593_v25, %v2594_v20  ;;  %v2651_v18 = vpop.permute.xlu1 %2650 }
0x190d   :  { %v2608_v52 = vrot.slane %v2607_v26, 4  ;;  %v2548_v6 = vmax.f32 %v2546_v55, %v2547_v37  ;;  %v2677_v8 = vsel %vm2655_vm9, %v6065_v3, %v2676_v44  ;;  %v2540_v62 = vrot.slane %v2539_v35, 2 }
0x190e   :  { %vm2619_vm8 = vcmp.lt.s32.totalorder %v2617_v7, %v2618_v41  ;;  %v2004_v60 = vmul.f32 %v6081_v32, %v2002_v40  ;;  %v2656_v10 = vsel %vm2655_vm9, %v2596_v45, %v2654_v48  ;;  %v2678_v55 = vsel %vm2657_vm11, %v6063_v0, %v2677_v8 }
0x190f   :  { %v2620_v43 = vsel %vm2619_vm8, %v2617_v7, %v2618_v41  ;;  %vm2609_vm10 = vcmp.lt.s32.totalorder %v2607_v26, %v2608_v52  ;;  %v2549_v57 = vrot.slane %v2548_v6, 1  ;;  %v2541_v53 = vmax.f32 %v2539_v35, %v2540_v62 }
0x1910   :  { %v2621_v58 = vrot.slane %v2620_v43, 2  ;;  %v2610_v4 = vsel %vm2609_vm10, %v2607_v26, %v2608_v52  ;;  %2006 = vrot.lane.b32.xlu0 %v2004_v60, %s5376_s26  ;;  %v2658_v33 = vsel %vm2657_vm11, %v2606_v61, %v2656_v10  ;;  %vm2661_vm13 = vcmask 1045509  }
0x1911   :  { %v2611_v3 = vrot.slane %v2610_v4, 2  ;;  %v2550_v23 = vmax.f32 %v2548_v6, %v2549_v57  ;;  %v2679_v24 = vsel %vm2659_vm1, %v2529_v54, %v2678_v55  ;;  %vm2663_vm0 = vcmask 1046534  }
0x1912   :  { %vm2622_vm15 = vcmp.lt.s32.totalorder %v2620_v43, %v2621_v58  ;;  %v2542_v31 = vrot.slane %v2541_v53, 1  ;;  %vm2665_vm4 = vcmask 1047559   ;;  %v2680_v34 = vsel %vm2661_vm13, %v6083_v21, %v2679_v24 }
0x1913   :  { %v2623_v48 = vsel %vm2622_vm15, %v2620_v43, %v2621_v58  ;;  %vm2612_vm2 = vcmp.lt.s32.totalorder %v2610_v4, %v2611_v3  ;;  %vm2558_vm3 = vcmp.eq.f32.partialorder %v6057_v39, %v2550_v23  ;;  %vm2652_vm6 = vcmp.eq.s32.totalorder %v2651_v18, 1 }
0x1914   :  { %v2624_v25 = vrot.slane %v2623_v48, 1  ;;  %v2613_v20 = vsel %vm2612_vm2, %v2610_v4, %v2611_v3  ;;  %v2566_v47 = vsel %vm2558_vm3, %v5625_v14, 8  ;;  %v2543_v35 = vmax.f32 %v2541_v53, %v2542_v31 }
0x1915   :  { %v2614_v0 = vrot.slane %v2613_v20, 1  ;;  %v2637_v7 = vsel %vm2494_vm14, %v2566_v47, 2147483647  ;;  %v1999_v47 = vmul.f32 %v6081_v32, %v5922_v42 }
0x1916   :  { %vm2625_vm7 = vcmp.lt.s32.totalorder %v2623_v48, %v2624_v25  ;;  %v2638_v54 = vrot.slane %v2637_v7, 4  ;;  %vm2557_vm8 = vcmp.eq.f32.partialorder %v6068_v51, %v2543_v35  ;;  %v2681_v37 = vsel %vm2663_vm0, %v2543_v35, %v2680_v34 }
0x1917   :  { %vm2615_vm10 = vcmp.lt.s32.totalorder %v2613_v20, %v2614_v0  ;;  %v2565_v39 = vsel %vm2557_vm8, %v5625_v14, 8  ;;  %v2682_v40 = vsel %vm2665_vm4, %v2550_v23, %v2681_v37  ;;  %v2626_v44 = vsel %vm2625_vm7, %v2623_v48, %v2624_v25 }
0x1918   :  { %vm2639_vm15 = vcmp.lt.s32.totalorder %v2637_v7, %v2638_v54  ;;  %v2627_v41 = vsel %vm2494_vm14, %v2565_v39, 2147483647  ;;  %v2684_v26 = vadd.f32 %v2682_v40, %v6052_v59  ;;  %v2616_v61 = vsel %vm2615_vm10, %v2613_v20, %v2614_v0 }
0x1919   :  { %v2640_v21 = vsel %vm2639_vm15, %v2637_v7, %v2638_v54  ;;  %v2628_v45 = vrot.slane %v2627_v41, 4  ;;  %v2660_v52 = vsel %vm2659_vm1, %v2616_v61, %v2658_v33 }
0x191a   :  { %v2641_v6 = vrot.slane %v2640_v21, 2  ;;  %v6119_v51 = vsel %vm2652_vm6, %v2684_v26, %v5975_v22  ;;  %v2662_v8 = vsel %vm2661_vm13, %v2626_v44, %v2660_v52 }
0x191b   :  { %vm2629_vm2 = vcmp.lt.s32.totalorder %v2627_v41, %v2628_v45  ;;  %v2696_v62 = vrot.slane %v6119_v51, %v5628_v15  ;;  %v2689_v60 = vrot.slane %v6119_v51, %v5634_v17  ;;  %v2710_v22 = vrot.slane %v6119_v51, %v5986_v28 }
0x191c   :  { %vm2642_vm3 = vcmp.lt.s32.totalorder %v2640_v21, %v2641_v6  ;;  %v2630_v59 = vsel %vm2629_vm2, %v2627_v41, %v2628_v45  ;;  %v2703_v10 = vrot.slane %v6119_v51, %v5989_v1  ;;  %v2731_v33 = vrot.slane %v6119_v51, %v5958_v56 }
0x191d   :  { %v2631_v43 = vrot.slane %v2630_v59, 2  ;;  %2698 = vbcast.lane.b32.xlu0 %v2696_v62, 256  ;;  %2691 = vbcast.lane.b32.xlu1 %v2689_v60, 256  ;;  %v2643_v57 = vsel %vm2642_vm3, %v2640_v21, %v2641_v6  ;;  %v2717_v55 = vrot.slane %v6119_v51, %v6003_v30  ;;  %v2724_v48 = vrot.slane %v6119_v51, %v6000_v29 }
0x191e   :  { %v2644_v58 = vrot.slane %v2643_v57, 1  ;;  %v2738_v20 = vrot.slane %v6119_v51, %v6010_v38 }
0x191f   :  { %vm2632_vm7 = vcmp.lt.s32.totalorder %v2630_v59, %v2631_v43 }
0x1920   :  { %v2633_v4 = vsel %vm2632_vm7, %v2630_v59, %v2631_v43  ;;  %vm2645_vm8 = vcmp.lt.s32.totalorder %v2643_v57, %v2644_v58 }
0x1921   :  { %2712 = vbcast.lane.b32.xlu0 %v2710_v22, 256  ;;  %2705 = vbcast.lane.b32.xlu1 %v2703_v10, 256  ;;  %v2634_v53 = vrot.slane %v2633_v4, 1  ;;  %v2646_v3 = vsel %vm2645_vm8, %v2643_v57, %v2644_v58 }
0x1923   :  { %vm2635_vm10 = vcmp.lt.s32.totalorder %v2633_v4, %v2634_v53 }
0x1924   :  { %v2636_v23 = vsel %vm2635_vm10, %v2633_v4, %v2634_v53 }
0x1925   :  { %2733 = vbcast.lane.b32.xlu0 %v2731_v33, 256  ;;  %2719 = vbcast.lane.b32.xlu1 %v2717_v55, 256  ;;  %v2664_v24 = vsel %vm2663_vm0, %v2636_v23, %v2662_v8 }
0x1926   :  { %v2666_v31 = vsel %vm2665_vm4, %v2646_v3, %v2664_v24 }
0x1927   :  { %v6139_v25 = vsel %vm2652_vm6, %v2666_v31, 0 }
0x1929   :  { %2726 = vbcast.lane.b32.xlu1 %v2724_v48, 256  ;;  %2903 = vperm.xlu0 %5203, %v6020_v12  }
0x192d   :  { %2740 = vbcast.lane.b32.xlu1 %v2738_v20, 256  ;;  %5206 = vset.pattern.permute.xlu0 %v5378_v27 }
0x1982   :  { %v2007_v35 = vpop.permute.xlu0 %2006 }
0x1983   :  { %v2009_v0 = vadd.f32 %v2007_v35, %v1999_v47 }
0x1985   :  { %v2010_v7 = vmul.f32 %v2009_v0, %v5668_v11 }
0x1987   :  { %5338 = vtanh.f32 %v2010_v7 }
0x198f   :  { %v2699_v18 = vpop.permute.xlu0 %2698  ;;  %v2692_v34 = vpop.permute.xlu1 %2691 }
0x1990   :  { %v2743_v54 = vadd.f32 %v2699_v18, %v5963_v63  ;;  %v2742_v37 = vadd.f32 %v2692_v34, %v5963_v63 }
0x1991   :  { %v5339_v39 = vpop.eup %5338 }
0x1992   :  { %v2757_v40 = vsel %vm2494_vm14, %v2743_v54, -inf  ;;  %2013 = vrot.lane.b32.xlu1 %v5339_v39, %s5375_s5  ;;  %v2750_v27 = vsel %vm2494_vm14, %v2742_v37, -inf  ;;  %s5346_s5 = scalar_lea.vmem %s4593_s25, 128 }
0x1993   :  { %v2758_v44 = vrot.slane %v2757_v40, 4  ;;  %v2751_v42 = vrot.slane %v2750_v27, 4  ;;  %v2713_v41 = vpop.permute.xlu0 %2712  ;;  %v2706_v26 = vpop.permute.xlu1 %2705  ;;  %p5347_p0 = scmp.ne.s32.totalorder %s4593_s25, %s5346_s5  ;;  %p5352_p2 = scmp.lt.s32.totalorder %s5346_s5, %s5346_s5 }
0x1994   :  { %v2745_v61 = vadd.f32 %v2713_v41, %v5963_v63  ;;  %v2744_v21 = vadd.f32 %v2706_v26, %v5963_v63 }
0x1995   :  { %v2759_v45 = vmax.f32 %v2757_v40, %v2758_v44  ;;  %v2752_v52 = vmax.f32 %v2750_v27, %v2751_v42  ;;  %p5353_p3 = por %p5352_p2, %p5351_p1 }
0x1996   :  { %v2771_v6 = vsel %vm2494_vm14, %v2745_v61, -inf  ;;  %v2764_v8 = vsel %vm2494_vm14, %v2744_v21, -inf }
0x1997   :  { %v2760_v62 = vrot.slane %v2759_v45, 2  ;;  %v2753_v60 = vrot.slane %v2752_v52, 2  ;;  %v2772_v59 = vrot.slane %v2771_v6, 4  ;;  %v2765_v43 = vrot.slane %v2764_v8, 4  ;;  %v2734_v57 = vpop.permute.xlu0 %2733  ;;  %v2720_v22 = vpop.permute.xlu1 %2719  ;;  %p5354_p4 = pnand %p5353_p3, %p5347_p0 }
0x1998   :  { %v6158_v10 = vadd.f32 %v2734_v57, %v5963_v63  ;;  %v6161_v58 = vadd.f32 %v2720_v22, %v5963_v63 }
0x1999   :  { %v2761_v4 = vmax.f32 %v2759_v45, %v2760_v62  ;;  %v2754_v53 = vmax.f32 %v2752_v52, %v2753_v60  ;;  %v2773_v33 = vmax.f32 %v2771_v6, %v2772_v59  ;;  %v2766_v55 = vmax.f32 %v2764_v8, %v2765_v43 }
0x199a   :  { %v2792_v3 = vsel %vm2494_vm14, %v6158_v10, -inf  ;;  %v2778_v23 = vsel %vm2494_vm14, %v6161_v58, -inf }
0x199b   :  { %v2762_v24 = vrot.slane %v2761_v4, 1  ;;  %v2755_v31 = vrot.slane %v2754_v53, 1  ;;  %v2774_v48 = vrot.slane %v2773_v33, 2  ;;  %v2767_v20 = vrot.slane %v2766_v55, 2  ;;  %v2727_v0 = vpop.permute.xlu1 %2726 }
0x199c   :  { %v2793_v47 = vrot.slane %v2792_v3, 4  ;;  %v2779_v35 = vrot.slane %v2778_v23, 4  ;;  %v6174_v42 = vadd.f32 %v2727_v0, %v5963_v63 }
0x199d   :  { %v6167_v7 = vmax.f32 %v2761_v4, %v2762_v24  ;;  %v6169_v18 = vmax.f32 %v2754_v53, %v2755_v31  ;;  %v2775_v34 = vmax.f32 %v2773_v33, %v2774_v48  ;;  %v2768_v39 = vmax.f32 %v2766_v55, %v2767_v20 }
0x199e   :  { %v2794_v40 = vmax.f32 %v2792_v3, %v2793_v47  ;;  %v2780_v27 = vmax.f32 %v2778_v23, %v2779_v35  ;;  %v2785_v22 = vsel %vm2494_vm14, %v6174_v42, -inf }
0x199f   :  { %vm2807_vm6 = vcmp.eq.f32.partialorder %v2743_v54, %v6167_v7  ;;  %vm2806_vm15 = vcmp.eq.f32.partialorder %v2742_v37, %v6169_v18  ;;  %v2776_v44 = vrot.slane %v2775_v34, 1  ;;  %v2769_v45 = vrot.slane %v2768_v39, 1  ;;  %v2741_v0 = vpop.permute.xlu1 %2740 }
0x19a0   :  { %v2815_v41 = vsel %vm2807_vm6, %v5625_v14, 8  ;;  %v2814_v26 = vsel %vm2806_vm15, %v5625_v14, 8  ;;  %v2795_v52 = vrot.slane %v2794_v40, 2  ;;  %v2781_v60 = vrot.slane %v2780_v27, 2 }
0x19a1   :  { %v2832_v6 = vsel %vm2494_vm14, %v2815_v41, 2147483647  ;;  %v2822_v8 = vsel %vm2494_vm14, %v2814_v26, 2147483647  ;;  %v6180_v62 = vmax.f32 %v2775_v34, %v2776_v44  ;;  %v6182_v37 = vmax.f32 %v2768_v39, %v2769_v45 }
0x19a2   :  { %v2833_v54 = vrot.slane %v2832_v6, 4  ;;  %v2823_v59 = vrot.slane %v2822_v8, 4  ;;  %v2796_v43 = vmax.f32 %v2794_v40, %v2795_v52  ;;  %v2782_v57 = vmax.f32 %v2780_v27, %v2781_v60 }
0x19a3   :  { %vm2809_vm2 = vcmp.eq.f32.partialorder %v2745_v61, %v6180_v62  ;;  %vm2808_vm8 = vcmp.eq.f32.partialorder %v2744_v21, %v6182_v37  ;;  %v2786_v35 = vrot.slane %v2785_v22, 4 }
0x19a4   :  { %vm2834_vm3 = vcmp.lt.s32.totalorder %v2832_v6, %v2833_v54  ;;  %vm2824_vm7 = vcmp.lt.s32.totalorder %v2822_v8, %v2823_v59  ;;  %v2817_v4 = vsel %vm2809_vm2, %v5625_v14, 8  ;;  %v2816_v3 = vsel %vm2808_vm8, %v5625_v14, 8 }
0x19a5   :  { %v2835_v53 = vsel %vm2834_vm3, %v2832_v6, %v2833_v54  ;;  %v2825_v33 = vsel %vm2824_vm7, %v2822_v8, %v2823_v59  ;;  %v2852_v55 = vsel %vm2494_vm14, %v2817_v4, 2147483647  ;;  %v2842_v31 = vsel %vm2494_vm14, %v2816_v3, 2147483647 }
0x19a6   :  { %v2836_v23 = vrot.slane %v2835_v53, 2  ;;  %v2826_v24 = vrot.slane %v2825_v33, 2  ;;  %v2853_v61 = vrot.slane %v2852_v55, 4  ;;  %v2843_v48 = vrot.slane %v2842_v31, 4 }
0x19a7   :  { %v2797_v20 = vrot.slane %v2796_v43, 1  ;;  %v2783_v47 = vrot.slane %v2782_v57, 1  ;;  %v6195_v6 = vadd.f32 %v2741_v0, %v5963_v63  ;;  %v2787_v8 = vmax.f32 %v2785_v22, %v2786_v35 }
0x19a8   :  { %vm2837_vm10 = vcmp.lt.s32.totalorder %v2835_v53, %v2836_v23  ;;  %vm2827_vm6 = vcmp.lt.s32.totalorder %v2825_v33, %v2826_v24  ;;  %vm2854_vm15 = vcmp.lt.s32.totalorder %v2852_v55, %v2853_v61  ;;  %vm2844_vm2 = vcmp.lt.s32.totalorder %v2842_v31, %v2843_v48 }
0x19a9   :  { %v2838_v21 = vsel %vm2837_vm10, %v2835_v53, %v2836_v23  ;;  %v2828_v34 = vsel %vm2827_vm6, %v2825_v33, %v2826_v24  ;;  %v2855_v39 = vsel %vm2854_vm15, %v2852_v55, %v2853_v61  ;;  %v2845_v41 = vsel %vm2844_vm2, %v2842_v31, %v2843_v48 }
0x19aa   :  { %v2839_v40 = vrot.slane %v2838_v21, 1  ;;  %v2829_v27 = vrot.slane %v2828_v34, 1  ;;  %v2856_v44 = vrot.slane %v2855_v39, 2  ;;  %v2846_v26 = vrot.slane %v2845_v41, 2 }
0x19ab   :  { %v6192_v45 = vmax.f32 %v2796_v43, %v2797_v20  ;;  %v2784_v52 = vmax.f32 %v2782_v57, %v2783_v47  ;;  %v2799_v55 = vsel %vm2494_vm14, %v6195_v6, -inf  ;;  %v2788_v23 = vrot.slane %v2787_v8, 2 }
0x19ac   :  { %vm2840_vm3 = vcmp.lt.s32.totalorder %v2838_v21, %v2839_v40  ;;  %vm2830_vm7 = vcmp.lt.s32.totalorder %v2828_v34, %v2829_v27  ;;  %vm2857_vm8 = vcmp.lt.s32.totalorder %v2855_v39, %v2856_v44  ;;  %vm2847_vm10 = vcmp.lt.s32.totalorder %v2845_v41, %v2846_v26 }
0x19ad   :  { %v2841_v60 = vsel %vm2840_vm3, %v2838_v21, %v2839_v40  ;;  %v2831_v54 = vsel %vm2830_vm7, %v2828_v34, %v2829_v27  ;;  %v2858_v59 = vsel %vm2857_vm8, %v2855_v39, %v2856_v44  ;;  %v2848_v33 = vsel %vm2847_vm10, %v2845_v41, %v2846_v26 }
0x19ae   :  { %v2906_v4 = vsel %vm2653_vm5, %v2841_v60, %v2831_v54  ;;  %v2859_v53 = vrot.slane %v2858_v59, 1  ;;  %vm2812_vm6 = vcmp.eq.f32.partialorder %v6158_v10, %v6192_v45  ;;  %v2849_v43 = vrot.slane %v2848_v33, 1 }
0x19af   :  { %v2820_v57 = vsel %vm2812_vm6, %v5625_v14, 8  ;;  %vm2810_vm15 = vcmp.eq.f32.partialorder %v6161_v58, %v2784_v52  ;;  %v2789_v20 = vmax.f32 %v2787_v8, %v2788_v23  ;;  %v2800_v47 = vrot.slane %v2799_v55, 4 }
0x19b0   :  { %vm2860_vm2 = vcmp.lt.s32.totalorder %v2858_v59, %v2859_v53  ;;  %v2882_v22 = vsel %vm2494_vm14, %v2820_v57, 2147483647  ;;  %v2818_v3 = vsel %vm2810_vm15, %v5625_v14, 8  ;;  %vm2850_vm3 = vcmp.lt.s32.totalorder %v2848_v33, %v2849_v43  ;;  %v2904_v57 = vpop.permute.xlu0 %2903 }
0x19b1   :  { %v2861_v24 = vsel %vm2860_vm2, %v2858_v59, %v2859_v53  ;;  %v2883_v61 = vrot.slane %v2882_v22, 4  ;;  %v2862_v31 = vsel %vm2494_vm14, %v2818_v3, 2147483647  ;;  %v2851_v10 = vsel %vm2850_vm3, %v2848_v33, %v2849_v43 }
0x19b2   :  { %v2863_v48 = vrot.slane %v2862_v31, 4  ;;  %v2922_v58 = vsel %vm2653_vm5, %v6167_v7, %v6169_v18  ;;  %v2907_v35 = vsel %vm2655_vm9, %v2851_v10, %v2906_v4  ;;  %v2790_v21 = vrot.slane %v2789_v20, 1 }
0x19b3   :  { %vm2884_vm7 = vcmp.lt.s32.totalorder %v2882_v22, %v2883_v61  ;;  %v2801_v34 = vmax.f32 %v2799_v55, %v2800_v47  ;;  %v2923_v39 = vsel %vm2655_vm9, %v6182_v37, %v2922_v58  ;;  %v2908_v27 = vsel %vm2657_vm11, %v2861_v24, %v2907_v35 }
0x19b4   :  { %v2885_v0 = vsel %vm2884_vm7, %v2882_v22, %v2883_v61  ;;  %vm2864_vm8 = vcmp.lt.s32.totalorder %v2862_v31, %v2863_v48  ;;  %v2791_v26 = vmax.f32 %v2789_v20, %v2790_v21  ;;  %v2924_v7 = vsel %vm2657_vm11, %v6180_v62, %v2923_v39 }
0x19b5   :  { %v2865_v40 = vsel %vm2864_vm8, %v2862_v31, %v2863_v48  ;;  %v2886_v44 = vrot.slane %v2885_v0, 2  ;;  %v2802_v8 = vrot.slane %v2801_v34, 2  ;;  %v2925_v37 = vsel %vm2659_vm1, %v2784_v52, %v2924_v7 }
0x19b6   :  { %v2866_v41 = vrot.slane %v2865_v40, 2  ;;  %vm2811_vm6 = vcmp.eq.f32.partialorder %v6174_v42, %v2791_v26  ;;  %v2926_v33 = vsel %vm2661_vm13, %v2791_v26, %v2925_v37  ;;  %v2416_v22 = vadd.f32 %v5968_v9, %v5979_v5 }
0x19b7   :  { %v2819_v60 = vsel %vm2811_vm6, %v5625_v14, 8  ;;  %v2803_v54 = vmax.f32 %v2801_v34, %v2802_v8  ;;  %vm2887_vm15 = vcmp.lt.s32.totalorder %v2885_v0, %v2886_v44  ;;  %v2927_v52 = vsel %vm2663_vm0, %v6192_v45, %v2926_v33 }
0x19b8   :  { %vm2867_vm10 = vcmp.lt.s32.totalorder %v2865_v40, %v2866_v41  ;;  %v2872_v4 = vsel %vm2494_vm14, %v2819_v60, 2147483647  ;;  %v2888_v42 = vsel %vm2887_vm15, %v2885_v0, %v2886_v44  ;;  %vm2905_vm8 = vcmp.eq.s32.totalorder %v2904_v57, 1 }
0x19b9   :  { %v2868_v18 = vsel %vm2867_vm10, %v2865_v40, %v2866_v41  ;;  %v2873_v53 = vrot.slane %v2872_v4, 4  ;;  %v2804_v43 = vrot.slane %v2803_v54, 1  ;;  %v2889_v10 = vrot.slane %v2888_v42, 1 }
0x19ba   :  { %v2869_v59 = vrot.slane %v2868_v18, 1 }
0x19bb   :  { %vm2874_vm3 = vcmp.lt.s32.totalorder %v2872_v4, %v2873_v53  ;;  %v2805_v55 = vmax.f32 %v2803_v54, %v2804_v43  ;;  %vm2890_vm15 = vcmp.lt.s32.totalorder %v2888_v42, %v2889_v10 }
0x19bc   :  { %vm2870_vm2 = vcmp.lt.s32.totalorder %v2868_v18, %v2869_v59  ;;  %v2875_v3 = vsel %vm2874_vm3, %v2872_v4, %v2873_v53  ;;  %v2891_v34 = vsel %vm2890_vm15, %v2888_v42, %v2889_v10 }
0x19bd   :  { %v2871_v62 = vsel %vm2870_vm2, %v2868_v18, %v2869_v59  ;;  %v2876_v24 = vrot.slane %v2875_v3, 2  ;;  %vm2813_vm7 = vcmp.eq.f32.partialorder %v6195_v6, %v2805_v55  ;;  %v2928_v61 = vsel %vm2665_vm4, %v2805_v55, %v2927_v52 }
0x19be   :  { %v2909_v23 = vsel %vm2659_vm1, %v2871_v62, %v2908_v27  ;;  %v2821_v31 = vsel %vm2813_vm7, %v5625_v14, 8  ;;  %v2930_v48 = vadd.f32 %v2928_v61, %v2416_v22 }
0x19bf   :  { %vm2877_vm10 = vcmp.lt.s32.totalorder %v2875_v3, %v2876_v24  ;;  %v2892_v20 = vsel %vm2494_vm14, %v2821_v31, 2147483647 }
0x19c0   :  { %v2878_v9 = vsel %vm2877_vm10, %v2875_v3, %v2876_v24  ;;  %v2893_v5 = vrot.slane %v2892_v20, 4  ;;  %v6232_v47 = vsel %vm2905_vm8, %v2930_v48, %v6119_v51 }
0x19c1   :  { %v2879_v45 = vrot.slane %v2878_v9, 1  ;;  %v2942_v6 = vrot.slane %v6232_v47, %v5628_v15  ;;  %v2935_v58 = vrot.slane %v6232_v47, %v5634_v17  ;;  %v2956_v51 = vrot.slane %v6232_v47, %v5986_v28 }
0x19c2   :  { %vm2894_vm6 = vcmp.lt.s32.totalorder %v2892_v20, %v2893_v5  ;;  %v2949_v40 = vrot.slane %v6232_v47, %v5989_v1  ;;  %v2970_v26 = vrot.slane %v6232_v47, %v6000_v29  ;;  %v2963_v8 = vrot.slane %v6232_v47, %v6003_v30 }
0x19c3   :  { %v2895_v35 = vsel %vm2894_vm6, %v2892_v20, %v2893_v5  ;;  %vm2880_vm2 = vcmp.lt.s32.totalorder %v2878_v9, %v2879_v45  ;;  %2944 = vbcast.lane.b32.xlu0 %v2942_v6, 256  ;;  %2937 = vbcast.lane.b32.xlu1 %v2935_v58, 256  ;;  %v2984_v54 = vrot.slane %v6232_v47, %v6010_v38 }
0x19c4   :  { %v2896_v0 = vrot.slane %v2895_v35, 2  ;;  %v2881_v21 = vsel %vm2880_vm2, %v2878_v9, %v2879_v45  ;;  %v2977_v59 = vrot.slane %v6232_v47, %v5958_v56 }
0x19c5   :  { %v2910_v39 = vsel %vm2661_vm13, %v2881_v21, %v2909_v23 }
0x19c6   :  { %vm2897_vm3 = vcmp.lt.s32.totalorder %v2895_v35, %v2896_v0  ;;  %v2911_v27 = vsel %vm2663_vm0, %v2891_v34, %v2910_v39 }
0x19c7   :  { %v2898_v44 = vsel %vm2897_vm3, %v2895_v35, %v2896_v0  ;;  %2958 = vbcast.lane.b32.xlu0 %v2956_v51, 256  ;;  %2951 = vbcast.lane.b32.xlu1 %v2949_v40, 256 }
0x19c8   :  { %v2899_v41 = vrot.slane %v2898_v44, 1 }
0x19ca   :  { %vm2900_vm7 = vcmp.lt.s32.totalorder %v2898_v44, %v2899_v41 }
0x19cb   :  { %v2901_v7 = vsel %vm2900_vm7, %v2898_v44, %v2899_v41  ;;  %2972 = vbcast.lane.b32.xlu0 %v2970_v26, 256  ;;  %2965 = vbcast.lane.b32.xlu1 %v2963_v8, 256 }
0x19cc   :  { %v2912_v18 = vsel %vm2665_vm4, %v2901_v7, %v2911_v27 }
0x19cd   :  { %v6250_v60 = vsel %vm2905_vm8, %v2912_v18, 0 }
0x19cf   :  { %2986 = vbcast.lane.b32.xlu0 %v2984_v54, 256  ;;  %2979 = vbcast.lane.b32.xlu1 %v2977_v59, 256 }
0x19d3   :  { %3149 = vperm.xlu1 %5204, %v6020_v12  }
0x19d7   :  { %5205 = vset.pattern.permute.xlu1 %v5381_v46 }
0x1a04   :  { %v2014_v37 = vpop.permute.xlu1 %2013 }
0x1a05   :  { %v2016_v4 = vmul.f32 %v6081_v32, %v2014_v37 }
0x1a07   :  { %v2017_v53 = vmul.f32 %v2016_v4, %v5668_v11 }
0x1a09   :  { %2118 = vrot.lane.b32.xlu0 %v2017_v53, %s5376_s26 }
0x1a35   :  { %v2945_v33 = vpop.permute.xlu0 %2944  ;;  %v2938_v43 = vpop.permute.xlu1 %2937 }
0x1a36   :  { %v2989_v57 = vadd.f32 %v2945_v33, %v5963_v63  ;;  %v2988_v42 = vadd.f32 %v2938_v43, %v5963_v63  ;;  %v6288_v33 = vld [vmem:[%s6946_s7] sm:$0xff] }
0x1a38   :  { %v3003_v55 = vsel %vm2494_vm14, %v2989_v57, -inf  ;;  %v2996_v62 = vsel %vm2494_vm14, %v2988_v42, -inf }
0x1a39   :  { %v3004_v22 = vrot.slane %v3003_v55, 4  ;;  %v2997_v3 = vrot.slane %v2996_v62, 4  ;;  %v2959_v46 = vpop.permute.xlu0 %2958  ;;  %v2952_v23 = vpop.permute.xlu1 %2951 }
0x1a3a   :  { %v2991_v32 = vadd.f32 %v2959_v46, %v5963_v63  ;;  %v2990_v11 = vadd.f32 %v2952_v23, %v5963_v63 }
0x1a3b   :  { %v3005_v52 = vmax.f32 %v3003_v55, %v3004_v22  ;;  %v2998_v24 = vmax.f32 %v2996_v62, %v2997_v3 }
0x1a3c   :  { %v3017_v61 = vsel %vm2494_vm14, %v2991_v32, -inf  ;;  %v3010_v31 = vsel %vm2494_vm14, %v2990_v11, -inf }
0x1a3d   :  { %v3006_v10 = vrot.slane %v3005_v52, 2  ;;  %v2999_v48 = vrot.slane %v2998_v24, 2  ;;  %v3018_v20 = vrot.slane %v3017_v61, 4  ;;  %v3011_v9 = vrot.slane %v3010_v31, 4  ;;  %v2973_v5 = vpop.permute.xlu0 %2972  ;;  %v2966_v45 = vpop.permute.xlu1 %2965 }
0x1a3e   :  { %v6270_v6 = vadd.f32 %v2973_v5, %v5963_v63  ;;  %v6273_v58 = vadd.f32 %v2966_v45, %v5963_v63 }
0x1a3f   :  { %v3007_v35 = vmax.f32 %v3005_v52, %v3006_v10  ;;  %v3000_v0 = vmax.f32 %v2998_v24, %v2999_v48  ;;  %v3019_v21 = vmax.f32 %v3017_v61, %v3018_v20  ;;  %v3012_v34 = vmax.f32 %v3010_v31, %v3011_v9 }
0x1a40   :  { %v3031_v39 = vsel %vm2494_vm14, %v6270_v6, -inf  ;;  %v3024_v51 = vsel %vm2494_vm14, %v6273_v58, -inf }
0x1a41   :  { %v3008_v40 = vrot.slane %v3007_v35, 1  ;;  %v3001_v27 = vrot.slane %v3000_v0, 1  ;;  %v3020_v44 = vrot.slane %v3019_v21, 2  ;;  %v3013_v41 = vrot.slane %v3012_v34, 2  ;;  %v2987_v7 = vpop.permute.xlu0 %2986  ;;  %v2980_v55 = vpop.permute.xlu1 %2979 }
0x1a42   :  { %v3032_v26 = vrot.slane %v3031_v39, 4  ;;  %v3025_v8 = vrot.slane %v3024_v51, 4  ;;  %v6291_v43 = vadd.f32 %v6288_v33, %v2987_v7  ;;  %v6302_v10 = vadd.f32 %v6288_v33, %v2980_v55 }
0x1a43   :  { %v6279_v18 = vmax.f32 %v3007_v35, %v3008_v40  ;;  %v6281_v63 = vmax.f32 %v3000_v0, %v3001_v27  ;;  %v3021_v54 = vmax.f32 %v3019_v21, %v3020_v44  ;;  %v3014_v59 = vmax.f32 %v3012_v34, %v3013_v41 }
0x1a44   :  { %v3033_v37 = vmax.f32 %v3031_v39, %v3032_v26  ;;  %v3026_v4 = vmax.f32 %v3024_v51, %v3025_v8  ;;  %v3045_v9 = vsel %vm2494_vm14, %v6291_v43, -inf  ;;  %v3038_v41 = vsel %vm2494_vm14, %v6302_v10, -inf }
0x1a45   :  { %vm3053_vm8 = vcmp.eq.f32.partialorder %v2989_v57, %v6279_v18  ;;  %vm3052_vm10 = vcmp.eq.f32.partialorder %v2988_v42, %v6281_v63  ;;  %v3022_v53 = vrot.slane %v3021_v54, 1  ;;  %v3015_v3 = vrot.slane %v3014_v59, 1 }
0x1a46   :  { %v3061_v62 = vsel %vm3053_vm8, %v5625_v14, 8  ;;  %v3060_v22 = vsel %vm3052_vm10, %v5625_v14, 8  ;;  %v3034_v46 = vrot.slane %v3033_v37, 2  ;;  %v3027_v52 = vrot.slane %v3026_v4, 2 }
0x1a47   :  { %v3078_v57 = vsel %vm2494_vm14, %v3061_v62, 2147483647  ;;  %v3068_v42 = vsel %vm2494_vm14, %v3060_v22, 2147483647  ;;  %v6297_v23 = vmax.f32 %v3021_v54, %v3022_v53  ;;  %v6299_v31 = vmax.f32 %v3014_v59, %v3015_v3 }
0x1a48   :  { %v3079_v24 = vrot.slane %v3078_v57, 4  ;;  %v3069_v61 = vrot.slane %v3068_v42, 4  ;;  %v3035_v48 = vmax.f32 %v3033_v37, %v3034_v46  ;;  %v3028_v20 = vmax.f32 %v3026_v4, %v3027_v52 }
0x1a49   :  { %vm3055_vm6 = vcmp.eq.f32.partialorder %v2991_v32, %v6297_v23  ;;  %vm3054_vm3 = vcmp.eq.f32.partialorder %v2990_v11, %v6299_v31  ;;  %v3046_v11 = vrot.slane %v3045_v9, 4  ;;  %v3039_v22 = vrot.slane %v3038_v41, 4 }
0x1a4a   :  { %vm3080_vm15 = vcmp.lt.s32.totalorder %v3078_v57, %v3079_v24  ;;  %vm3070_vm2 = vcmp.lt.s32.totalorder %v3068_v42, %v3069_v61  ;;  %v3063_v5 = vsel %vm3055_vm6, %v5625_v14, 8  ;;  %v3062_v21 = vsel %vm3054_vm3, %v5625_v14, 8 }
0x1a4b   :  { %v3081_v45 = vsel %vm3080_vm15, %v3078_v57, %v3079_v24  ;;  %v3071_v35 = vsel %vm3070_vm2, %v3068_v42, %v3069_v61  ;;  %v3098_v0 = vsel %vm2494_vm14, %v3063_v5, 2147483647  ;;  %v3088_v51 = vsel %vm2494_vm14, %v3062_v21, 2147483647 }
0x1a4c   :  { %v3082_v34 = vrot.slane %v3081_v45, 2  ;;  %v3072_v39 = vrot.slane %v3071_v35, 2  ;;  %v3099_v32 = vrot.slane %v3098_v0, 4  ;;  %v3089_v40 = vrot.slane %v3088_v51, 4 }
0x1a4d   :  { %v3036_v27 = vrot.slane %v3035_v48, 1  ;;  %v3029_v44 = vrot.slane %v3028_v20, 1  ;;  %v3047_v3 = vmax.f32 %v3045_v9, %v3046_v11 }
0x1a4e   :  { %vm3083_vm7 = vcmp.lt.s32.totalorder %v3081_v45, %v3082_v34  ;;  %vm3073_vm8 = vcmp.lt.s32.totalorder %v3071_v35, %v3072_v39  ;;  %vm3100_vm10 = vcmp.lt.s32.totalorder %v3098_v0, %v3099_v32  ;;  %vm3090_vm6 = vcmp.lt.s32.totalorder %v3088_v51, %v3089_v40 }
0x1a4f   :  { %v3084_v26 = vsel %vm3083_vm7, %v3081_v45, %v3082_v34  ;;  %v3074_v8 = vsel %vm3073_vm8, %v3071_v35, %v3072_v39  ;;  %v3101_v7 = vsel %vm3100_vm10, %v3098_v0, %v3099_v32  ;;  %v3091_v4 = vsel %vm3090_vm6, %v3088_v51, %v3089_v40 }
0x1a50   :  { %v3085_v54 = vrot.slane %v3084_v26, 1  ;;  %v3075_v59 = vrot.slane %v3074_v8, 1  ;;  %v3102_v37 = vrot.slane %v3101_v7, 2  ;;  %v3092_v53 = vrot.slane %v3091_v4, 2 }
0x1a51   :  { %v3037_v55 = vmax.f32 %v3035_v48, %v3036_v27  ;;  %v3030_v62 = vmax.f32 %v3028_v20, %v3029_v44  ;;  %v3040_v48 = vmax.f32 %v3038_v41, %v3039_v22  ;;  %v3048_v35 = vrot.slane %v3047_v3, 2 }
0x1a52   :  { %vm3086_vm15 = vcmp.lt.s32.totalorder %v3084_v26, %v3085_v54  ;;  %vm3076_vm2 = vcmp.lt.s32.totalorder %v3074_v8, %v3075_v59  ;;  %vm3103_vm3 = vcmp.lt.s32.totalorder %v3101_v7, %v3102_v37  ;;  %vm3093_vm12 = vcmp.lt.s32.totalorder %v3091_v4, %v3092_v53 }
0x1a53   :  { %v3087_v46 = vsel %vm3086_vm15, %v3084_v26, %v3085_v54  ;;  %v3077_v57 = vsel %vm3076_vm2, %v3074_v8, %v3075_v59  ;;  %v3104_v42 = vsel %vm3103_vm3, %v3101_v7, %v3102_v37  ;;  %v3094_v61 = vsel %vm3093_vm12, %v3091_v4, %v3092_v53  ;;  %v6334_v4 = vld [vmem:[%s6946_s7 + $0x8] ss:$0 sm:$0xff] }
0x1a54   :  { %v3152_v52 = vsel %vm2653_vm5, %v3087_v46, %v3077_v57  ;;  %v3105_v24 = vrot.slane %v3104_v42, 1  ;;  %vm3057_vm7 = vcmp.eq.f32.partialorder %v6270_v6, %v3037_v55  ;;  %v3095_v5 = vrot.slane %v3094_v61, 1 }
0x1a55   :  { %v3065_v45 = vsel %vm3057_vm7, %v5625_v14, 8  ;;  %vm3056_vm8 = vcmp.eq.f32.partialorder %v6273_v58, %v3030_v62  ;;  %v3168_v6 = vsel %vm2653_vm5, %v6279_v18, %v6281_v63  ;;  %v3049_v51 = vmax.f32 %v3047_v3, %v3048_v35 }
0x1a56   :  { %vm3106_vm10 = vcmp.lt.s32.totalorder %v3104_v42, %v3105_v24  ;;  %v3118_v20 = vsel %vm2494_vm14, %v3065_v45, 2147483647  ;;  %v3064_v9 = vsel %vm3056_vm8, %v5625_v14, 8  ;;  %vm3096_vm6 = vcmp.lt.s32.totalorder %v3094_v61, %v3095_v5 }
0x1a57   :  { %v3107_v0 = vsel %vm3106_vm10, %v3104_v42, %v3105_v24  ;;  %v3119_v21 = vrot.slane %v3118_v20, 4  ;;  %v3108_v34 = vsel %vm2494_vm14, %v3064_v9, 2147483647  ;;  %v3097_v39 = vsel %vm3096_vm6, %v3094_v61, %v3095_v5 }
0x1a58   :  { %v3109_v32 = vrot.slane %v3108_v34, 4  ;;  %v3153_v58 = vsel %vm2655_vm9, %v3097_v39, %v3152_v52  ;;  %v3169_v40 = vsel %vm2655_vm9, %v6299_v31, %v3168_v6  ;;  %v3041_v27 = vrot.slane %v3040_v48, 2  ;;  %v3150_v31 = vpop.permute.xlu1 %3149 }
0x1a59   :  { %vm3120_vm12 = vcmp.lt.s32.totalorder %v3118_v20, %v3119_v21  ;;  %v3050_v41 = vrot.slane %v3049_v51, 1  ;;  %v3154_v11 = vsel %vm2657_vm11, %v3107_v0, %v3153_v58  ;;  %v3170_v18 = vsel %vm2657_vm11, %v6297_v23, %v3169_v40 }
0x1a5a   :  { %v3121_v44 = vsel %vm3120_vm12, %v3118_v20, %v3119_v21  ;;  %vm3110_vm15 = vcmp.lt.s32.totalorder %v3108_v34, %v3109_v32  ;;  %v3042_v7 = vmax.f32 %v3040_v48, %v3041_v27  ;;  %v3171_v59 = vsel %vm2659_vm1, %v3030_v62, %v3170_v18 }
0x1a5b   :  { %v3122_v26 = vrot.slane %v3121_v44, 2  ;;  %v3111_v8 = vsel %vm3110_vm15, %v3108_v34, %v3109_v32  ;;  %v3051_v54 = vmax.f32 %v3049_v51, %v3050_v41  ;;  %v2417_v53 = vadd.f32 %v6334_v4, %v5977_v49 }
0x1a5c   :  { %v3112_v63 = vrot.slane %v3111_v8, 2  ;;  %v3043_v37 = vrot.slane %v3042_v7, 1  ;;  %v3172_v52 = vsel %vm2661_vm13, %v3037_v55, %v3171_v59  ;;  %vm3151_vm8 = vcmp.eq.s32.totalorder %v3150_v31, 1 }
0x1a5d   :  { %vm3123_vm2 = vcmp.lt.s32.totalorder %v3121_v44, %v3122_v26  ;;  %vm3059_vm7 = vcmp.eq.f32.partialorder %v6291_v43, %v3051_v54 }
0x1a5e   :  { %v3124_v22 = vsel %vm3123_vm2, %v3121_v44, %v3122_v26  ;;  %vm3113_vm3 = vcmp.lt.s32.totalorder %v3111_v8, %v3112_v63  ;;  %v3067_v46 = vsel %vm3059_vm7, %v5625_v14, 8  ;;  %v3044_v57 = vmax.f32 %v3042_v7, %v3043_v37 }
0x1a5f   :  { %v3125_v23 = vrot.slane %v3124_v22, 1  ;;  %v3114_v3 = vsel %vm3113_vm3, %v3111_v8, %v3112_v63  ;;  %v3138_v42 = vsel %vm2494_vm14, %v3067_v46, 2147483647 }
0x1a60   :  { %v3115_v62 = vrot.slane %v3114_v3, 1  ;;  %v3139_v24 = vrot.slane %v3138_v42, 4  ;;  %vm3058_vm6 = vcmp.eq.f32.partialorder %v6302_v10, %v3044_v57  ;;  %v3173_v49 = vsel %vm2663_vm0, %v3044_v57, %v3172_v52 }
0x1a61   :  { %vm3126_vm10 = vcmp.lt.s32.totalorder %v3124_v22, %v3125_v23  ;;  %v3066_v43 = vsel %vm3058_vm6, %v5625_v14, 8  ;;  %v3174_v5 = vsel %vm2665_vm4, %v3051_v54, %v3173_v49 }
0x1a62   :  { %vm3116_vm12 = vcmp.lt.s32.totalorder %v3114_v3, %v3115_v62  ;;  %v3127_v61 = vsel %vm3126_vm10, %v3124_v22, %v3125_v23  ;;  %vm3140_vm15 = vcmp.lt.s32.totalorder %v3138_v42, %v3139_v24  ;;  %v3128_v48 = vsel %vm2494_vm14, %v3066_v43, 2147483647 }
0x1a63   :  { %v3117_v45 = vsel %vm3116_vm12, %v3114_v3, %v3115_v62  ;;  %v3176_v20 = vadd.f32 %v3174_v5, %v2417_v53  ;;  %v3141_v9 = vsel %vm3140_vm15, %v3138_v42, %v3139_v24  ;;  %v3129_v55 = vrot.slane %v3128_v48, 4 }
0x1a64   :  { %v3155_v35 = vsel %vm2659_vm1, %v3117_v45, %v3154_v11  ;;  %v3142_v0 = vrot.slane %v3141_v9, 2  ;;  %vm6949_vm12 = vcmask 261120  }
0x1a65   :  { %v3156_v10 = vsel %vm2661_vm13, %v3127_v61, %v3155_v35  ;;  %v6351_v21 = vsel %vm3151_vm8, %v3176_v20, %v6232_v47  ;;  %vm3130_vm2 = vcmp.lt.s32.totalorder %v3128_v48, %v3129_v55  ;;  %vm6950_vm15 = vmmov %vm6949_vm12 }
0x1a66   :  { %v3188_v34 = vrot.slane %v6351_v21, %v5628_v15  ;;  %v3181_v6 = vrot.slane %v6351_v21, %v5634_v17  ;;  %vm3143_vm3 = vcmp.lt.s32.totalorder %v3141_v9, %v3142_v0  ;;  %v3131_v39 = vsel %vm3130_vm2, %v3128_v48, %v3129_v55 }
0x1a67   :  { %v3132_v32 = vrot.slane %v3131_v39, 2  ;;  %v3144_v51 = vsel %vm3143_vm3, %v3141_v9, %v3142_v0  ;;  %v3202_v40 = vrot.slane %v6351_v21, %v5986_v28  ;;  %v3195_v47 = vrot.slane %v6351_v21, %v5989_v1 }
0x1a68   :  { %3190 = vbcast.lane.b32.xlu0 %v3188_v34, 256  ;;  %3183 = vbcast.lane.b32.xlu1 %v3181_v6, 256  ;;  %v3145_v58 = vrot.slane %v3144_v51, 1  ;;  %v3216_v11 = vrot.slane %v6351_v21, %v6000_v29  ;;  %v3209_v26 = vrot.slane %v6351_v21, %v6003_v30  ;;  %v3230_v54 = vrot.slane %v6351_v21, %v6010_v38 }
0x1a69   :  { %vm3133_vm7 = vcmp.lt.s32.totalorder %v3131_v39, %v3132_v32  ;;  %v3223_v59 = vrot.slane %v6351_v21, %v5958_v56 }
0x1a6a   :  { %v3134_v27 = vsel %vm3133_vm7, %v3131_v39, %v3132_v32  ;;  %vm3146_vm10 = vcmp.lt.s32.totalorder %v3144_v51, %v3145_v58 }
0x1a6b   :  { %v3135_v44 = vrot.slane %v3134_v27, 1  ;;  %v3147_v41 = vsel %vm3146_vm10, %v3144_v51, %v3145_v58 }
0x1a6c   :  { %3204 = vbcast.lane.b32.xlu0 %v3202_v40, 256  ;;  %3197 = vbcast.lane.b32.xlu1 %v3195_v47, 256 }
0x1a6d   :  { %vm3136_vm6 = vcmp.lt.s32.totalorder %v3134_v27, %v3135_v44 }
0x1a6e   :  { %v3137_v8 = vsel %vm3136_vm6, %v3134_v27, %v3135_v44 }
0x1a6f   :  { %v3157_v7 = vsel %vm2663_vm0, %v3137_v8, %v3156_v10 }
0x1a70   :  { %3218 = vbcast.lane.b32.xlu0 %v3216_v11, 256  ;;  %3211 = vbcast.lane.b32.xlu1 %v3209_v26, 256  ;;  %v3158_v18 = vsel %vm2665_vm4, %v3147_v41, %v3157_v7 }
0x1a71   :  { %v6368_v63 = vsel %vm3151_vm8, %v3158_v18, 0 }
0x1a74   :  { %3232 = vbcast.lane.b32.xlu0 %v3230_v54, 256  ;;  %3225 = vbcast.lane.b32.xlu1 %v3223_v59, 256 }
0x1a78   :  { %3395 = vperm.xlu1 %5205, %v6020_v12  }
0x1a7b   :  { %v2119_v37 = vpop.permute.xlu0 %2118 }
0x1a7c   :  { %2121 = vst.msk [vmem:[#allocation3 + $0x38] sm:$0xff] %vm6949_vm12, %v2119_v37  ;;  %5209 = vset.pattern.permute.xlu1 %v5374_v13 }
0x1a83   :  { %v2135_v53 = vld [vmem:[#allocation3 + $0x38] sm:$0xff] }
0x1a84   :  { %5033 = vmatmul.mubr.msk.f32.gmra.mrb[32].mxu1 %vm6950_vm15, %v2135_v53 }
0x1ada   :  { %v3191_v31 = vpop.permute.xlu0 %3190  ;;  %v3184_v22 = vpop.permute.xlu1 %3183 }
0x1adb   :  { %v3235_v23 = vadd.f32 %v6288_v33, %v3191_v31  ;;  %v3234_v3 = vadd.f32 %v6288_v33, %v3184_v22 }
0x1add   :  { %v3249_v46 = vsel %vm2494_vm14, %v3235_v23, -inf  ;;  %v3242_v57 = vsel %vm2494_vm14, %v3234_v3, -inf }
0x1ade   :  { %v3250_v62 = vrot.slane %v3249_v46, 4  ;;  %v3243_v42 = vrot.slane %v3242_v57, 4  ;;  %v3205_v52 = vpop.permute.xlu0 %3204  ;;  %v3198_v24 = vpop.permute.xlu1 %3197 }
0x1adf   :  { %v3237_v49 = vadd.f32 %v6288_v33, %v3205_v52  ;;  %v3236_v43 = vadd.f32 %v6288_v33, %v3198_v24 }
0x1ae0   :  { %v3251_v61 = vmax.f32 %v3249_v46, %v3250_v62  ;;  %v3244_v5 = vmax.f32 %v3242_v57, %v3243_v42 }
0x1ae1   :  { %v3263_v45 = vsel %vm2494_vm14, %v3237_v49, -inf  ;;  %v3256_v48 = vsel %vm2494_vm14, %v3236_v43, -inf }
0x1ae2   :  { %v3252_v20 = vrot.slane %v3251_v61, 2  ;;  %v3245_v9 = vrot.slane %v3244_v5, 2  ;;  %v3264_v55 = vrot.slane %v3263_v45, 4  ;;  %v3257_v35 = vrot.slane %v3256_v48, 4  ;;  %v3219_v0 = vpop.permute.xlu0 %3218  ;;  %v3212_v10 = vpop.permute.xlu1 %3211 }
0x1ae3   :  { %v6387_v34 = vadd.f32 %v6288_v33, %v3219_v0  ;;  %v6390_v6 = vadd.f32 %v6288_v33, %v3212_v10 }
0x1ae4   :  { %v3253_v39 = vmax.f32 %v3251_v61, %v3252_v20  ;;  %v3246_v32 = vmax.f32 %v3244_v5, %v3245_v9  ;;  %v3265_v51 = vmax.f32 %v3263_v45, %v3264_v55  ;;  %v3258_v58 = vmax.f32 %v3256_v48, %v3257_v35 }
0x1ae5   :  { %v3277_v40 = vsel %vm2494_vm14, %v6387_v34, -inf  ;;  %v3270_v47 = vsel %vm2494_vm14, %v6390_v6, -inf }
0x1ae6   :  { %v3254_v27 = vrot.slane %v3253_v39, 1  ;;  %v3247_v44 = vrot.slane %v3246_v32, 1  ;;  %v3266_v41 = vrot.slane %v3265_v51, 2  ;;  %v3259_v11 = vrot.slane %v3258_v58, 2  ;;  %v3233_v7 = vpop.permute.xlu0 %3232  ;;  %v3226_v57 = vpop.permute.xlu1 %3225 }
0x1ae7   :  { %v3278_v26 = vrot.slane %v3277_v40, 4  ;;  %v3271_v8 = vrot.slane %v3270_v47, 4  ;;  %v6403_v46 = vadd.f32 %v6288_v33, %v3233_v7  ;;  %v6414_v9 = vadd.f32 %v6288_v33, %v3226_v57 }
0x1ae8   :  { %v6396_v18 = vmax.f32 %v3253_v39, %v3254_v27  ;;  %v6398_v54 = vmax.f32 %v3246_v32, %v3247_v44  ;;  %v3267_v59 = vmax.f32 %v3265_v51, %v3266_v41  ;;  %v3260_v37 = vmax.f32 %v3258_v58, %v3259_v11 }
0x1ae9   :  { %v3279_v53 = vmax.f32 %v3277_v40, %v3278_v26  ;;  %v3272_v31 = vmax.f32 %v3270_v47, %v3271_v8  ;;  %v3291_v0 = vsel %vm2494_vm14, %v6403_v46, -inf  ;;  %v3284_v26 = vsel %vm2494_vm14, %v6414_v9, -inf }
0x1aea   :  { %vm3299_vm8 = vcmp.eq.f32.partialorder %v3235_v23, %v6396_v18  ;;  %vm3298_vm2 = vcmp.eq.f32.partialorder %v3234_v3, %v6398_v54  ;;  %v3268_v22 = vrot.slane %v3267_v59, 1  ;;  %v3261_v52 = vrot.slane %v3260_v37, 1 }
0x1aeb   :  { %v3307_v62 = vsel %vm3299_vm8, %v5625_v14, 8  ;;  %v3306_v42 = vsel %vm3298_vm2, %v5625_v14, 8  ;;  %v3280_v24 = vrot.slane %v3279_v53, 2  ;;  %v3273_v23 = vrot.slane %v3272_v31, 2 }
0x1aec   :  { %v3324_v61 = vsel %vm2494_vm14, %v3307_v62, 2147483647  ;;  %v3314_v5 = vsel %vm2494_vm14, %v3306_v42, 2147483647  ;;  %v6409_v45 = vmax.f32 %v3267_v59, %v3268_v22  ;;  %v6411_v20 = vmax.f32 %v3260_v37, %v3261_v52 }
0x1aed   :  { %v3325_v48 = vrot.slane %v3324_v61, 4  ;;  %v3315_v3 = vrot.slane %v3314_v5, 4  ;;  %v3281_v55 = vmax.f32 %v3279_v53, %v3280_v24  ;;  %v3274_v35 = vmax.f32 %v3272_v31, %v3273_v23 }
0x1aee   :  { %vm3301_vm3 = vcmp.eq.f32.partialorder %v3237_v49, %v6409_v45  ;;  %vm3300_vm6 = vcmp.eq.f32.partialorder %v3236_v43, %v6411_v20  ;;  %v3292_v43 = vrot.slane %v3291_v0, 4  ;;  %v3285_v52 = vrot.slane %v3284_v26, 4 }
0x1aef   :  { %vm3326_vm7 = vcmp.lt.s32.totalorder %v3324_v61, %v3325_v48  ;;  %vm3316_vm10 = vcmp.lt.s32.totalorder %v3314_v5, %v3315_v3  ;;  %v3309_v10 = vsel %vm3301_vm3, %v5625_v14, 8  ;;  %v3308_v58 = vsel %vm3300_vm6, %v5625_v14, 8 }
0x1af0   :  { %v3327_v39 = vsel %vm3326_vm7, %v3324_v61, %v3325_v48  ;;  %v3317_v32 = vsel %vm3316_vm10, %v3314_v5, %v3315_v3  ;;  %v3344_v51 = vsel %vm2494_vm14, %v3309_v10, 2147483647  ;;  %v3334_v27 = vsel %vm2494_vm14, %v3308_v58, 2147483647 }
0x1af1   :  { %v3328_v40 = vrot.slane %v3327_v39, 2  ;;  %v3318_v47 = vrot.slane %v3317_v32, 2  ;;  %v3345_v49 = vrot.slane %v3344_v51, 4  ;;  %v3335_v44 = vrot.slane %v3334_v27, 4 }
0x1af2   :  { %v3282_v41 = vrot.slane %v3281_v55, 1  ;;  %v3275_v11 = vrot.slane %v3274_v35, 1  ;;  %v3293_v24 = vmax.f32 %v3291_v0, %v3292_v43 }
0x1af3   :  { %vm3329_vm12 = vcmp.lt.s32.totalorder %v3327_v39, %v3328_v40  ;;  %vm3319_vm15 = vcmp.lt.s32.totalorder %v3317_v32, %v3318_v47  ;;  %vm3346_vm8 = vcmp.lt.s32.totalorder %v3344_v51, %v3345_v49  ;;  %vm3336_vm2 = vcmp.lt.s32.totalorder %v3334_v27, %v3335_v44 }
0x1af4   :  { %v3330_v8 = vsel %vm3329_vm12, %v3327_v39, %v3328_v40  ;;  %v3320_v7 = vsel %vm3319_vm15, %v3317_v32, %v3318_v47  ;;  %v3347_v59 = vsel %vm3346_vm8, %v3344_v51, %v3345_v49  ;;  %v3337_v22 = vsel %vm3336_vm2, %v3334_v27, %v3335_v44 }
0x1af5   :  { %v3331_v37 = vrot.slane %v3330_v8, 1  ;;  %v3321_v53 = vrot.slane %v3320_v7, 1  ;;  %v3348_v31 = vrot.slane %v3347_v59, 2  ;;  %v3338_v57 = vrot.slane %v3337_v22, 2 }
0x1af6   :  { %v3283_v62 = vmax.f32 %v3281_v55, %v3282_v41  ;;  %v3276_v42 = vmax.f32 %v3274_v35, %v3275_v11  ;;  %v3286_v55 = vmax.f32 %v3284_v26, %v3285_v52  ;;  %v3294_v51 = vrot.slane %v3293_v24, 2 }
0x1af7   :  { %vm3332_vm3 = vcmp.lt.s32.totalorder %v3330_v8, %v3331_v37  ;;  %vm3322_vm7 = vcmp.lt.s32.totalorder %v3320_v7, %v3321_v53  ;;  %vm3349_vm10 = vcmp.lt.s32.totalorder %v3347_v59, %v3348_v31  ;;  %vm3339_vm6 = vcmp.lt.s32.totalorder %v3337_v22, %v3338_v57 }
0x1af8   :  { %v3333_v61 = vsel %vm3332_vm3, %v3330_v8, %v3331_v37  ;;  %v3323_v5 = vsel %vm3322_vm7, %v3320_v7, %v3321_v53  ;;  %v3350_v23 = vsel %vm3349_vm10, %v3347_v59, %v3348_v31  ;;  %v3340_v10 = vsel %vm3339_vm6, %v3337_v22, %v3338_v57 }
0x1af9   :  { %v3398_v48 = vsel %vm2653_vm5, %v3333_v61, %v3323_v5  ;;  %v3351_v3 = vrot.slane %v3350_v23, 1  ;;  %vm3303_vm12 = vcmp.eq.f32.partialorder %v6387_v34, %v3283_v62  ;;  %v3341_v39 = vrot.slane %v3340_v10, 1 }
0x1afa   :  { %v3311_v32 = vsel %vm3303_vm12, %v5625_v14, 8  ;;  %vm3302_vm15 = vcmp.eq.f32.partialorder %v6390_v6, %v3276_v42  ;;  %v3414_v34 = vsel %vm2653_vm5, %v6396_v18, %v6398_v54  ;;  %v3295_v44 = vmax.f32 %v3293_v24, %v3294_v51 }
0x1afb   :  { %vm3352_vm8 = vcmp.lt.s32.totalorder %v3350_v23, %v3351_v3  ;;  %v3364_v35 = vsel %vm2494_vm14, %v3311_v32, 2147483647  ;;  %v3310_v0 = vsel %vm3302_vm15, %v5625_v14, 8  ;;  %vm3342_vm2 = vcmp.lt.s32.totalorder %v3340_v10, %v3341_v39 }
0x1afc   :  { %v3353_v58 = vsel %vm3352_vm8, %v3350_v23, %v3351_v3  ;;  %v3365_v40 = vrot.slane %v3364_v35, 4  ;;  %v3354_v47 = vsel %vm2494_vm14, %v3310_v0, 2147483647  ;;  %v3343_v49 = vsel %vm3342_vm2, %v3340_v10, %v3341_v39 }
0x1afd   :  { %v3355_v27 = vrot.slane %v3354_v47, 4  ;;  %v3399_v6 = vsel %vm2655_vm9, %v3343_v49, %v3398_v48  ;;  %v3415_v41 = vsel %vm2655_vm9, %v6411_v20, %v3414_v34  ;;  %v3287_v11 = vrot.slane %v3286_v55, 2  ;;  %v3396_v20 = vpop.permute.xlu1 %3395 }
0x1afe   :  { %vm3366_vm3 = vcmp.lt.s32.totalorder %v3364_v35, %v3365_v40  ;;  %v3296_v43 = vrot.slane %v3295_v44, 1  ;;  %v3400_v8 = vsel %vm2657_vm11, %v3353_v58, %v3399_v6  ;;  %v3416_v18 = vsel %vm2657_vm11, %v6409_v45, %v3415_v41 }
0x1aff   :  { %v3367_v26 = vsel %vm3366_vm3, %v3364_v35, %v3365_v40  ;;  %vm3356_vm7 = vcmp.lt.s32.totalorder %v3354_v47, %v3355_v27  ;;  %v3288_v37 = vmax.f32 %v3286_v55, %v3287_v11  ;;  %v3417_v31 = vsel %vm2659_vm1, %v3276_v42, %v3416_v18 }
0x1b00   :  { %v3368_v7 = vrot.slane %v3367_v26, 2  ;;  %v3357_v59 = vsel %vm3356_vm7, %v3354_v47, %v3355_v27  ;;  %v3297_v53 = vmax.f32 %v3295_v44, %v3296_v43  ;;  %v2418_v57 = vadd.f32 %v6334_v4, %v5993_v19 }
0x1b01   :  { %v3358_v54 = vrot.slane %v3357_v59, 2  ;;  %v3289_v22 = vrot.slane %v3288_v37, 1  ;;  %v3418_v3 = vsel %vm2661_vm13, %v3283_v62, %v3417_v31  ;;  %vm3397_vm15 = vcmp.eq.s32.totalorder %v3396_v20, 1 }
0x1b02   :  { %vm3369_vm10 = vcmp.lt.s32.totalorder %v3367_v26, %v3368_v7  ;;  %vm3305_vm12 = vcmp.eq.f32.partialorder %v6403_v46, %v3297_v53 }
0x1b03   :  { %v3370_v52 = vsel %vm3369_vm10, %v3367_v26, %v3368_v7  ;;  %vm3359_vm6 = vcmp.lt.s32.totalorder %v3357_v59, %v3358_v54  ;;  %v3313_v5 = vsel %vm3305_vm12, %v5625_v14, 8  ;;  %v3290_v23 = vmax.f32 %v3288_v37, %v3289_v22 }
0x1b04   :  { %v3371_v24 = vrot.slane %v3370_v52, 1  ;;  %v3360_v61 = vsel %vm3359_vm6, %v3357_v59, %v3358_v54  ;;  %v3384_v48 = vsel %vm2494_vm14, %v3313_v5, 2147483647 }
0x1b05   :  { %v3361_v45 = vrot.slane %v3360_v61, 1  ;;  %v3385_v42 = vrot.slane %v3384_v48, 4  ;;  %vm3304_vm2 = vcmp.eq.f32.partialorder %v6414_v9, %v3290_v23  ;;  %v3419_v19 = vsel %vm2663_vm0, %v3290_v23, %v3418_v3 }
0x1b06   :  { %vm3372_vm8 = vcmp.lt.s32.totalorder %v3370_v52, %v3371_v24  ;;  %v3312_v46 = vsel %vm3304_vm2, %v5625_v14, 8  ;;  %v3420_v39 = vsel %vm2665_vm4, %v3297_v53, %v3419_v19 }
0x1b07   :  { %vm3362_vm3 = vcmp.lt.s32.totalorder %v3360_v61, %v3361_v45  ;;  %v3373_v10 = vsel %vm3372_vm8, %v3370_v52, %v3371_v24  ;;  %vm3386_vm7 = vcmp.lt.s32.totalorder %v3384_v48, %v3385_v42  ;;  %v3374_v55 = vsel %vm2494_vm14, %v3312_v46, 2147483647 }
0x1b08   :  { %v3363_v32 = vsel %vm3362_vm3, %v3360_v61, %v3361_v45  ;;  %v3422_v35 = vadd.f32 %v3420_v39, %v2418_v57  ;;  %v3387_v0 = vsel %vm3386_vm7, %v3384_v48, %v3385_v42  ;;  %v3375_v62 = vrot.slane %v3374_v55, 4 }
0x1b09   :  { %v3401_v51 = vsel %vm2659_vm1, %v3363_v32, %v3400_v8  ;;  %v3388_v58 = vrot.slane %v3387_v0, 2 }
0x1b0a   :  { %v3402_v9 = vsel %vm2661_vm13, %v3373_v10, %v3401_v51  ;;  %v6458_v40 = vsel %vm3397_vm15, %v3422_v35, %v6351_v21  ;;  %vm3376_vm10 = vcmp.lt.s32.totalorder %v3374_v55, %v3375_v62 }
0x1b0b   :  { %v3434_v47 = vrot.slane %v6458_v40, %v5628_v15  ;;  %v3427_v34 = vrot.slane %v6458_v40, %v5634_v17  ;;  %vm3389_vm6 = vcmp.lt.s32.totalorder %v3387_v0, %v3388_v58  ;;  %v3377_v49 = vsel %vm3376_vm10, %v3374_v55, %v3375_v62 }
0x1b0c   :  { %v3378_v27 = vrot.slane %v3377_v49, 2  ;;  %v3390_v44 = vsel %vm3389_vm6, %v3387_v0, %v3388_v58  ;;  %v3448_v41 = vrot.slane %v6458_v40, %v5986_v28  ;;  %v3441_v21 = vrot.slane %v6458_v40, %v5989_v1 }
0x1b0d   :  { %3436 = vbcast.lane.b32.xlu1 %v3434_v47, 256  ;;  %3429 = vbcast.lane.b32.xlu0 %v3427_v34, 256  ;;  %v3391_v6 = vrot.slane %v3390_v44, 1  ;;  %v3462_v8 = vrot.slane %v6458_v40, %v6000_v29  ;;  %v3455_v7 = vrot.slane %v6458_v40, %v6003_v30  ;;  %v3476_v53 = vrot.slane %v6458_v40, %v6010_v38 }
0x1b0e   :  { %vm3379_vm12 = vcmp.lt.s32.totalorder %v3377_v49, %v3378_v27  ;;  %v3469_v31 = vrot.slane %v6458_v40, %v5958_v56 }
0x1b0f   :  { %v3380_v11 = vsel %vm3379_vm12, %v3377_v49, %v3378_v27  ;;  %vm3392_vm8 = vcmp.lt.s32.totalorder %v3390_v44, %v3391_v6 }
0x1b10   :  { %v3381_v26 = vrot.slane %v3380_v11, 1  ;;  %v3393_v43 = vsel %vm3392_vm8, %v3390_v44, %v3391_v6 }
0x1b11   :  { %3450 = vbcast.lane.b32.xlu1 %v3448_v41, 256  ;;  %3443 = vbcast.lane.b32.xlu0 %v3441_v21, 256 }
0x1b12   :  { %vm3382_vm2 = vcmp.lt.s32.totalorder %v3380_v11, %v3381_v26 }
0x1b13   :  { %v3383_v59 = vsel %vm3382_vm2, %v3380_v11, %v3381_v26 }
0x1b14   :  { %v3403_v37 = vsel %vm2663_vm0, %v3383_v59, %v3402_v9 }
0x1b15   :  { %3464 = vbcast.lane.b32.xlu1 %v3462_v8, 256  ;;  %3457 = vbcast.lane.b32.xlu0 %v3455_v7, 256  ;;  %v3404_v18 = vsel %vm2665_vm4, %v3393_v43, %v3403_v37 }
0x1b16   :  { %v6475_v54 = vsel %vm3397_vm15, %v3404_v18, 0 }
0x1b19   :  { %3478 = vbcast.lane.b32.xlu1 %v3476_v53, 256  ;;  %3471 = vbcast.lane.b32.xlu0 %v3469_v31, 256 }
0x1b1d   :  { %3641 = vperm.xlu0 %5206, %v6020_v12  }
0x1b21   :  { %5207 = vset.pattern.permute.xlu0 %v5377_v50 }
0x1b57   :  { %v6483_v22 = vpop.f32.mrb[32].mxu1 }
0x1b58   :  { %v6485_v57 = vpop.f32.mrb[33].mxu1 }
0x1b7f   :  { %v3437_v52 = vpop.permute.xlu1 %3436  ;;  %v3430_v20 = vpop.permute.xlu0 %3429 }
0x1b80   :  { %v3481_v24 = vadd.f32 %v6288_v33, %v3437_v52  ;;  %v3480_v61 = vadd.f32 %v6288_v33, %v3430_v20 }
0x1b82   :  { %v3495_v5 = vsel %vm2494_vm14, %v3481_v24, -inf  ;;  %v3488_v23 = vsel %vm2494_vm14, %v3480_v61, -inf }
0x1b83   :  { %v3496_v45 = vrot.slane %v3495_v5, 4  ;;  %v3489_v48 = vrot.slane %v3488_v23, 4  ;;  %v3451_v3 = vpop.permute.xlu1 %3450  ;;  %v3444_v42 = vpop.permute.xlu0 %3443 }
0x1b84   :  { %v3483_v50 = vadd.f32 %v6288_v33, %v3451_v3  ;;  %v3482_v19 = vadd.f32 %v6288_v33, %v3444_v42 }
0x1b85   :  { %v3497_v46 = vmax.f32 %v3495_v5, %v3496_v45  ;;  %v3490_v10 = vmax.f32 %v3488_v23, %v3489_v48 }
0x1b86   :  { %v3509_v39 = vsel %vm2494_vm14, %v3483_v50, -inf  ;;  %v3502_v32 = vsel %vm2494_vm14, %v3482_v19, -inf }
0x1b87   :  { %v3498_v55 = vrot.slane %v3497_v46, 2  ;;  %v3491_v35 = vrot.slane %v3490_v10, 2  ;;  %v3510_v0 = vrot.slane %v3509_v39, 4  ;;  %v3503_v62 = vrot.slane %v3502_v32, 4  ;;  %v3465_v51 = vpop.permute.xlu1 %3464  ;;  %v3458_v58 = vpop.permute.xlu0 %3457 }
0x1b88   :  { %v6496_v9 = vadd.f32 %v6288_v33, %v3465_v51  ;;  %v6499_v47 = vadd.f32 %v6288_v33, %v3458_v58 }
0x1b89   :  { %v3499_v34 = vmax.f32 %v3497_v46, %v3498_v55  ;;  %v3492_v49 = vmax.f32 %v3490_v10, %v3491_v35  ;;  %v3511_v27 = vmax.f32 %v3509_v39, %v3510_v0  ;;  %v3504_v44 = vmax.f32 %v3502_v32, %v3503_v62 }
0x1b8a   :  { %v3523_v6 = vsel %vm2494_vm14, %v6496_v9, -inf  ;;  %v3516_v41 = vsel %vm2494_vm14, %v6499_v47, -inf }
0x1b8b   :  { %v3500_v21 = vrot.slane %v3499_v34, 1  ;;  %v3493_v11 = vrot.slane %v3492_v49, 1  ;;  %v3512_v26 = vrot.slane %v3511_v27, 2  ;;  %v3505_v43 = vrot.slane %v3504_v44, 2  ;;  %v3479_v59 = vpop.permute.xlu1 %3478  ;;  %v3472_v45 = vpop.permute.xlu0 %3471 }
0x1b8c   :  { %v3524_v8 = vrot.slane %v3523_v6, 4  ;;  %v3517_v7 = vrot.slane %v3516_v41, 4  ;;  %v6512_v23 = vadd.f32 %v6288_v33, %v3479_v59  ;;  %v6523_v0 = vadd.f32 %v6288_v33, %v3472_v45 }
0x1b8d   :  { %v6505_v37 = vmax.f32 %v3499_v34, %v3500_v21  ;;  %v6507_v18 = vmax.f32 %v3492_v49, %v3493_v11  ;;  %v3513_v53 = vmax.f32 %v3511_v27, %v3512_v26  ;;  %v3506_v31 = vmax.f32 %v3504_v44, %v3505_v43 }
0x1b8e   :  { %v3525_v52 = vmax.f32 %v3523_v6, %v3524_v8  ;;  %v3518_v20 = vmax.f32 %v3516_v41, %v3517_v7  ;;  %v3537_v58 = vsel %vm2494_vm14, %v6512_v23, -inf  ;;  %v3530_v8 = vsel %vm2494_vm14, %v6523_v0, -inf }
0x1b8f   :  { %vm3545_vm15 = vcmp.eq.f32.partialorder %v3481_v24, %v6505_v37  ;;  %vm3544_vm3 = vcmp.eq.f32.partialorder %v3480_v61, %v6507_v18  ;;  %v3514_v5 = vrot.slane %v3513_v53, 1  ;;  %v3507_v42 = vrot.slane %v3506_v31, 1 }
0x1b90   :  { %v3553_v48 = vsel %vm3545_vm15, %v5625_v14, 8  ;;  %v3552_v3 = vsel %vm3544_vm3, %v5625_v14, 8  ;;  %v3526_v46 = vrot.slane %v3525_v52, 2  ;;  %v3519_v24 = vrot.slane %v3518_v20, 2 }
0x1b91   :  { %v3570_v10 = vsel %vm2494_vm14, %v3553_v48, 2147483647  ;;  %v3560_v39 = vsel %vm2494_vm14, %v3552_v3, 2147483647  ;;  %v6518_v32 = vmax.f32 %v3513_v53, %v3514_v5  ;;  %v6520_v35 = vmax.f32 %v3506_v31, %v3507_v42 }
0x1b92   :  { %v3571_v55 = vrot.slane %v3570_v10, 4  ;;  %v3561_v61 = vrot.slane %v3560_v39, 4  ;;  %v3527_v62 = vmax.f32 %v3525_v52, %v3526_v46  ;;  %v3520_v51 = vmax.f32 %v3518_v20, %v3519_v24 }
0x1b93   :  { %vm3547_vm7 = vcmp.eq.f32.partialorder %v3483_v50, %v6518_v32  ;;  %vm3546_vm12 = vcmp.eq.f32.partialorder %v3482_v19, %v6520_v35  ;;  %v3538_v19 = vrot.slane %v3537_v58, 4  ;;  %v3531_v42 = vrot.slane %v3530_v8, 4 }
0x1b94   :  { %vm3572_vm10 = vcmp.lt.s32.totalorder %v3570_v10, %v3571_v55  ;;  %vm3562_vm6 = vcmp.lt.s32.totalorder %v3560_v39, %v3561_v61  ;;  %v3555_v34 = vsel %vm3547_vm7, %v5625_v14, 8  ;;  %v3554_v33 = vsel %vm3546_vm12, %v5625_v14, 8 }
0x1b95   :  { %v3573_v49 = vsel %vm3572_vm10, %v3570_v10, %v3571_v55  ;;  %v3563_v27 = vsel %vm3562_vm6, %v3560_v39, %v3561_v61  ;;  %v3590_v44 = vsel %vm2494_vm14, %v3555_v34, 2147483647  ;;  %v3580_v21 = vsel %vm2494_vm14, %v3554_v33, 2147483647 }
0x1b96   :  { %v3574_v6 = vrot.slane %v3573_v49, 2  ;;  %v3564_v41 = vrot.slane %v3563_v27, 2  ;;  %v3591_v50 = vrot.slane %v3590_v44, 4  ;;  %v3581_v11 = vrot.slane %v3580_v21, 4 }
0x1b97   :  { %v3528_v26 = vrot.slane %v3527_v62, 1  ;;  %v3521_v43 = vrot.slane %v3520_v51, 1  ;;  %v3539_v46 = vmax.f32 %v3537_v58, %v3538_v19 }
0x1b98   :  { %vm3575_vm8 = vcmp.lt.s32.totalorder %v3573_v49, %v3574_v6  ;;  %vm3565_vm2 = vcmp.lt.s32.totalorder %v3563_v27, %v3564_v41  ;;  %vm3592_vm15 = vcmp.lt.s32.totalorder %v3590_v44, %v3591_v50  ;;  %vm3582_vm3 = vcmp.lt.s32.totalorder %v3580_v21, %v3581_v11 }
0x1b99   :  { %v3576_v7 = vsel %vm3575_vm8, %v3573_v49, %v3574_v6  ;;  %v3566_v59 = vsel %vm3565_vm2, %v3563_v27, %v3564_v41  ;;  %v3593_v53 = vsel %vm3592_vm15, %v3590_v44, %v3591_v50  ;;  %v3583_v5 = vsel %vm3582_vm3, %v3580_v21, %v3581_v11 }
0x1b9a   :  { %v3577_v31 = vrot.slane %v3576_v7, 1  ;;  %v3567_v52 = vrot.slane %v3566_v59, 1  ;;  %v3594_v20 = vrot.slane %v3593_v53, 2  ;;  %v3584_v45 = vrot.slane %v3583_v5, 2 }
0x1b9b   :  { %v3529_v48 = vmax.f32 %v3527_v62, %v3528_v26  ;;  %v3522_v3 = vmax.f32 %v3520_v51, %v3521_v43  ;;  %v3532_v62 = vmax.f32 %v3530_v8, %v3531_v42  ;;  %v3540_v44 = vrot.slane %v3539_v46, 2 }
0x1b9c   :  { %vm3578_vm7 = vcmp.lt.s32.totalorder %v3576_v7, %v3577_v31  ;;  %vm3568_vm10 = vcmp.lt.s32.totalorder %v3566_v59, %v3567_v52  ;;  %vm3595_vm6 = vcmp.lt.s32.totalorder %v3593_v53, %v3594_v20  ;;  %vm3585_vm12 = vcmp.lt.s32.totalorder %v3583_v5, %v3584_v45 }
0x1b9d   :  { %v3579_v10 = vsel %vm3578_vm7, %v3576_v7, %v3577_v31  ;;  %v3569_v39 = vsel %vm3568_vm10, %v3566_v59, %v3567_v52  ;;  %v3596_v24 = vsel %vm3595_vm6, %v3593_v53, %v3594_v20  ;;  %v3586_v34 = vsel %vm3585_vm12, %v3583_v5, %v3584_v45 }
0x1b9e   :  { %v3644_v55 = vsel %vm2653_vm5, %v3579_v10, %v3569_v39  ;;  %v3597_v61 = vrot.slane %v3596_v24, 1  ;;  %vm3549_vm8 = vcmp.eq.f32.partialorder %v6496_v9, %v3529_v48  ;;  %v3587_v49 = vrot.slane %v3586_v34, 1 }
0x1b9f   :  { %v3557_v27 = vsel %vm3549_vm8, %v5625_v14, 8  ;;  %vm3548_vm2 = vcmp.eq.f32.partialorder %v6499_v47, %v3522_v3  ;;  %v3660_v9 = vsel %vm2653_vm5, %v6505_v37, %v6507_v18  ;;  %v3541_v11 = vmax.f32 %v3539_v46, %v3540_v44 }
0x1ba0   :  { %vm3598_vm15 = vcmp.lt.s32.totalorder %v3596_v24, %v3597_v61  ;;  %v3610_v51 = vsel %vm2494_vm14, %v3557_v27, 2147483647  ;;  %v3556_v58 = vsel %vm3548_vm2, %v5625_v14, 8  ;;  %vm3588_vm3 = vcmp.lt.s32.totalorder %v3586_v34, %v3587_v49 }
0x1ba1   :  { %v3599_v33 = vsel %vm3598_vm15, %v3596_v24, %v3597_v61  ;;  %v3611_v6 = vrot.slane %v3610_v51, 4  ;;  %v3600_v41 = vsel %vm2494_vm14, %v3556_v58, 2147483647  ;;  %v3589_v50 = vsel %vm3588_vm3, %v3586_v34, %v3587_v49 }
0x1ba2   :  { %v3601_v21 = vrot.slane %v3600_v41, 4  ;;  %v3645_v47 = vsel %vm2655_vm9, %v3589_v50, %v3644_v55  ;;  %v3661_v26 = vsel %vm2655_vm9, %v6520_v35, %v3660_v9  ;;  %v3533_v43 = vrot.slane %v3532_v62, 2  ;;  %v3642_v35 = vpop.permute.xlu0 %3641 }
0x1ba3   :  { %vm3612_vm7 = vcmp.lt.s32.totalorder %v3610_v51, %v3611_v6  ;;  %v3542_v19 = vrot.slane %v3541_v11, 1  ;;  %v3646_v7 = vsel %vm2657_vm11, %v3599_v33, %v3645_v47  ;;  %v3662_v37 = vsel %vm2657_vm11, %v6518_v32, %v3661_v26 }
0x1ba4   :  { %v3613_v8 = vsel %vm3612_vm7, %v3610_v51, %v3611_v6  ;;  %vm3602_vm10 = vcmp.lt.s32.totalorder %v3600_v41, %v3601_v21  ;;  %v3534_v31 = vmax.f32 %v3532_v62, %v3533_v43  ;;  %v3663_v20 = vsel %vm2659_vm1, %v3522_v3, %v3662_v37 }
0x1ba5   :  { %v3614_v59 = vrot.slane %v3613_v8, 2  ;;  %v3603_v53 = vsel %vm3602_vm10, %v3600_v41, %v3601_v21  ;;  %v3543_v52 = vmax.f32 %v3541_v11, %v3542_v19  ;;  %v2419_v45 = vadd.f32 %v6334_v4, %v5991_v16 }
0x1ba6   :  { %v3604_v18 = vrot.slane %v3603_v53, 2  ;;  %v3535_v5 = vrot.slane %v3534_v31, 1  ;;  %v3664_v61 = vsel %vm2661_vm13, %v3529_v48, %v3663_v20  ;;  %vm3643_vm2 = vcmp.eq.s32.totalorder %v3642_v35, 1  ;;  %v6595_v35 = vld [vmem:[%s6946_s7] sm:$0xff] }
0x1ba7   :  { %vm3615_vm6 = vcmp.lt.s32.totalorder %v3613_v8, %v3614_v59  ;;  %vm3551_vm8 = vcmp.eq.f32.partialorder %v6512_v23, %v3543_v52 }
0x1ba8   :  { %v3616_v42 = vsel %vm3615_vm6, %v3613_v8, %v3614_v59  ;;  %vm3605_vm12 = vcmp.lt.s32.totalorder %v3603_v53, %v3604_v18  ;;  %v3559_v39 = vsel %vm3551_vm8, %v5625_v14, 8  ;;  %v3536_v24 = vmax.f32 %v3534_v31, %v3535_v5 }
0x1ba9   :  { %v3617_v46 = vrot.slane %v3616_v42, 1  ;;  %v3606_v10 = vsel %vm3605_vm12, %v3603_v53, %v3604_v18  ;;  %v3630_v55 = vsel %vm2494_vm14, %v3559_v39, 2147483647 }
0x1baa   :  { %v3607_v32 = vrot.slane %v3606_v10, 1  ;;  %v3631_v3 = vrot.slane %v3630_v55, 4  ;;  %vm3550_vm3 = vcmp.eq.f32.partialorder %v6523_v0, %v3536_v24  ;;  %v3665_v16 = vsel %vm2663_vm0, %v3536_v24, %v3664_v61 }
0x1bab   :  { %vm3618_vm15 = vcmp.lt.s32.totalorder %v3616_v42, %v3617_v46  ;;  %v3558_v4 = vsel %vm3550_vm3, %v5625_v14, 8  ;;  %v3666_v34 = vsel %vm2665_vm4, %v3543_v52, %v3665_v16 }
0x1bac   :  { %vm3608_vm7 = vcmp.lt.s32.totalorder %v3606_v10, %v3607_v32  ;;  %v3619_v23 = vsel %vm3618_vm15, %v3616_v42, %v3617_v46  ;;  %vm3632_vm10 = vcmp.lt.s32.totalorder %v3630_v55, %v3631_v3  ;;  %v3620_v27 = vsel %vm2494_vm14, %v3558_v4, 2147483647 }
0x1bad   :  { %v3609_v49 = vsel %vm3608_vm7, %v3606_v10, %v3607_v32  ;;  %v3668_v62 = vadd.f32 %v3666_v34, %v2419_v45  ;;  %v3633_v51 = vsel %vm3632_vm10, %v3630_v55, %v3631_v3  ;;  %v3621_v48 = vrot.slane %v3620_v27, 4 }
0x1bae   :  { %v3647_v58 = vsel %vm2659_vm1, %v3609_v49, %v3646_v7  ;;  %v3634_v44 = vrot.slane %v3633_v51, 2 }
0x1baf   :  { %v3648_v0 = vsel %vm2661_vm13, %v3619_v23, %v3647_v58  ;;  %v6567_v33 = vsel %vm3643_vm2, %v3668_v62, %v6458_v40  ;;  %vm3622_vm6 = vcmp.lt.s32.totalorder %v3620_v27, %v3621_v48 }
0x1bb0   :  { %v3687_v6 = vrot.slane %v6567_v33, %v5989_v1  ;;  %v3673_v41 = vrot.slane %v6567_v33, %v5634_v17  ;;  %vm3635_vm12 = vcmp.lt.s32.totalorder %v3633_v51, %v3634_v44  ;;  %v3623_v9 = vsel %vm3622_vm6, %v3620_v27, %v3621_v48 }
0x1bb1   :  { %v3624_v50 = vrot.slane %v3623_v9, 2  ;;  %v3636_v21 = vsel %vm3635_vm12, %v3633_v51, %v3634_v44  ;;  %v3701_v47 = vrot.slane %v6567_v33, %v6003_v30  ;;  %v3680_v40 = vrot.slane %v6567_v33, %v5628_v15 }
0x1bb2   :  { %3689 = vbcast.lane.b32.xlu0 %v3687_v6, 256  ;;  %3675 = vbcast.lane.b32.xlu1 %v3673_v41, 256  ;;  %v3637_v11 = vrot.slane %v3636_v21, 1  ;;  %v3715_v19 = vrot.slane %v6567_v33, %v5958_v56  ;;  %v3694_v7 = vrot.slane %v6567_v33, %v5986_v28  ;;  %v3708_v18 = vrot.slane %v6567_v33, %v6000_v29 }
0x1bb3   :  { %vm3625_vm8 = vcmp.lt.s32.totalorder %v3623_v9, %v3624_v50  ;;  %v3722_v52 = vrot.slane %v6567_v33, %v6010_v38 }
0x1bb4   :  { %v3626_v26 = vsel %vm3625_vm8, %v3623_v9, %v3624_v50  ;;  %vm3638_vm15 = vcmp.lt.s32.totalorder %v3636_v21, %v3637_v11 }
0x1bb5   :  { %v3627_v43 = vrot.slane %v3626_v26, 1  ;;  %v3639_v8 = vsel %vm3638_vm15, %v3636_v21, %v3637_v11 }
0x1bb6   :  { %3703 = vbcast.lane.b32.xlu0 %v3701_v47, 256  ;;  %3682 = vbcast.lane.b32.xlu1 %v3680_v40, 256 }
0x1bb7   :  { %vm3628_vm3 = vcmp.lt.s32.totalorder %v3626_v26, %v3627_v43 }
0x1bb8   :  { %v3629_v59 = vsel %vm3628_vm3, %v3626_v26, %v3627_v43 }
0x1bb9   :  { %v3649_v53 = vsel %vm2663_vm0, %v3629_v59, %v3648_v0 }
0x1bba   :  { %3717 = vbcast.lane.b32.xlu0 %v3715_v19, 256  ;;  %3696 = vbcast.lane.b32.xlu1 %v3694_v7, 256  ;;  %v3650_v31 = vsel %vm2665_vm4, %v3639_v8, %v3649_v53 }
0x1bbb   :  { %v6584_v37 = vsel %vm3643_vm2, %v3650_v31, 0 }
0x1bbe   :  { %3710 = vbcast.lane.b32.xlu1 %v3708_v18, 256  ;;  %3887 = vperm.xlu0 %5207, %v6020_v12  }
0x1bc2   :  { %3724 = vbcast.lane.b32.xlu1 %v3722_v52, 256  ;;  %5208 = vset.pattern.permute.xlu0 %v5374_v13 }
0x1c24   :  { %v3690_v20 = vpop.permute.xlu0 %3689  ;;  %v3676_v5 = vpop.permute.xlu1 %3675 }
0x1c25   :  { %v3728_v45 = vadd.f32 %v6595_v35, %v3690_v20  ;;  %v3726_v42 = vadd.f32 %v6595_v35, %v3676_v5 }
0x1c27   :  { %v3748_v46 = vsel %vm2494_vm14, %v3728_v45, -inf  ;;  %v3734_v10 = vsel %vm2494_vm14, %v3726_v42, -inf }
0x1c28   :  { %v3749_v39 = vrot.slane %v3748_v46, 4  ;;  %v3735_v24 = vrot.slane %v3734_v10, 4  ;;  %v3704_v32 = vpop.permute.xlu0 %3703  ;;  %v3683_v55 = vpop.permute.xlu1 %3682 }
0x1c29   :  { %v3730_v13 = vadd.f32 %v6595_v35, %v3704_v32  ;;  %v3727_v61 = vadd.f32 %v6595_v35, %v3683_v55 }
0x1c2a   :  { %v3750_v3 = vmax.f32 %v3748_v46, %v3749_v39  ;;  %v3736_v16 = vmax.f32 %v3734_v10, %v3735_v24 }
0x1c2b   :  { %v3762_v4 = vsel %vm2494_vm14, %v3730_v13, -inf  ;;  %v3741_v23 = vsel %vm2494_vm14, %v3727_v61, -inf }
0x1c2c   :  { %v3751_v34 = vrot.slane %v3750_v3, 2  ;;  %v3737_v49 = vrot.slane %v3736_v16, 2  ;;  %v3763_v27 = vrot.slane %v3762_v4, 4  ;;  %v3742_v62 = vrot.slane %v3741_v23, 4  ;;  %v3718_v51 = vpop.permute.xlu0 %3717  ;;  %v3697_v48 = vpop.permute.xlu1 %3696 }
0x1c2d   :  { %v6606_v58 = vadd.f32 %v6595_v35, %v3718_v51  ;;  %v6609_v44 = vadd.f32 %v6595_v35, %v3697_v48 }
0x1c2e   :  { %v3752_v0 = vmax.f32 %v3750_v3, %v3751_v34  ;;  %v3738_v6 = vmax.f32 %v3736_v16, %v3737_v49  ;;  %v3764_v41 = vmax.f32 %v3762_v4, %v3763_v27  ;;  %v3743_v9 = vmax.f32 %v3741_v23, %v3742_v62 }
0x1c2f   :  { %v3776_v50 = vsel %vm2494_vm14, %v6606_v58, -inf  ;;  %v3755_v21 = vsel %vm2494_vm14, %v6609_v44, -inf }
0x1c30   :  { %v3753_v11 = vrot.slane %v3752_v0, 1  ;;  %v3739_v47 = vrot.slane %v3738_v6, 1  ;;  %v3765_v40 = vrot.slane %v3764_v41, 2  ;;  %v3744_v26 = vrot.slane %v3743_v9, 2  ;;  %v3711_v43 = vpop.permute.xlu1 %3710 }
0x1c31   :  { %v3777_v8 = vrot.slane %v3776_v50, 4  ;;  %v3756_v19 = vrot.slane %v3755_v21, 4  ;;  %v6616_v7 = vadd.f32 %v6595_v35, %v3711_v43 }
0x1c32   :  { %v6618_v59 = vmax.f32 %v3752_v0, %v3753_v11  ;;  %v3740_v53 = vmax.f32 %v3738_v6, %v3739_v47  ;;  %v3766_v31 = vmax.f32 %v3764_v41, %v3765_v40  ;;  %v3745_v18 = vmax.f32 %v3743_v9, %v3744_v26 }
0x1c33   :  { %v3778_v52 = vmax.f32 %v3776_v50, %v3777_v8  ;;  %v3757_v20 = vmax.f32 %v3755_v21, %v3756_v19  ;;  %v3769_v5 = vsel %vm2494_vm14, %v6616_v7, -inf }
0x1c34   :  { %vm3792_vm2 = vcmp.eq.f32.partialorder %v3728_v45, %v6618_v59  ;;  %vm3790_vm7 = vcmp.eq.f32.partialorder %v3726_v42, %v3740_v53  ;;  %v3767_v46 = vrot.slane %v3766_v31, 1  ;;  %v3746_v10 = vrot.slane %v3745_v18, 1 }
0x1c35   :  { %v3800_v39 = vsel %vm3792_vm2, %v5625_v14, 8  ;;  %v3798_v24 = vsel %vm3790_vm7, %v5625_v14, 8  ;;  %v3779_v32 = vrot.slane %v3778_v52, 2  ;;  %v3758_v55 = vrot.slane %v3757_v20, 2 }
0x1c36   :  { %v3826_v3 = vsel %vm2494_vm14, %v3800_v39, 2147483647  ;;  %v3806_v16 = vsel %vm2494_vm14, %v3798_v24, 2147483647  ;;  %v6627_v4 = vmax.f32 %v3766_v31, %v3767_v46  ;;  %v3747_v23 = vmax.f32 %v3745_v18, %v3746_v10  ;;  %v3725_v18 = vpop.permute.xlu1 %3724 }
0x1c37   :  { %v3827_v34 = vrot.slane %v3826_v3, 4  ;;  %v3807_v49 = vrot.slane %v3806_v16, 4  ;;  %v3780_v27 = vmax.f32 %v3778_v52, %v3779_v32  ;;  %v3759_v45 = vmax.f32 %v3757_v20, %v3758_v55 }
0x1c38   :  { %vm3794_vm10 = vcmp.eq.f32.partialorder %v3730_v13, %v6627_v4  ;;  %vm3791_vm6 = vcmp.eq.f32.partialorder %v3727_v61, %v3747_v23  ;;  %v3770_v42 = vrot.slane %v3769_v5, 4  ;;  %v6638_v32 = vadd.f32 %v6595_v35, %v3725_v18 }
0x1c39   :  { %vm3828_vm12 = vcmp.lt.s32.totalorder %v3826_v3, %v3827_v34  ;;  %vm3808_vm8 = vcmp.lt.s32.totalorder %v3806_v16, %v3807_v49  ;;  %v3802_v62 = vsel %vm3794_vm10, %v5625_v14, 8  ;;  %v3799_v51 = vsel %vm3791_vm6, %v5625_v14, 8 }
0x1c3a   :  { %v3829_v48 = vsel %vm3828_vm12, %v3826_v3, %v3827_v34  ;;  %v3809_v0 = vsel %vm3808_vm8, %v3806_v16, %v3807_v49  ;;  %v3846_v6 = vsel %vm2494_vm14, %v3802_v62, 2147483647  ;;  %v3816_v41 = vsel %vm2494_vm14, %v3799_v51, 2147483647 }
0x1c3b   :  { %v3830_v9 = vrot.slane %v3829_v48, 2  ;;  %v3810_v50 = vrot.slane %v3809_v0, 2  ;;  %v3847_v21 = vrot.slane %v3846_v6, 4  ;;  %v3817_v11 = vrot.slane %v3816_v41, 4 }
0x1c3c   :  { %v3781_v13 = vrot.slane %v3780_v27, 1  ;;  %v3760_v61 = vrot.slane %v3759_v45, 1  ;;  %v3771_v47 = vmax.f32 %v3769_v5, %v3770_v42  ;;  %v3906_v5 = vsel %vm2653_vm5, %v3747_v23, %v3740_v53 }
0x1c3d   :  { %vm3831_vm15 = vcmp.lt.s32.totalorder %v3829_v48, %v3830_v9  ;;  %vm3811_vm3 = vcmp.lt.s32.totalorder %v3809_v0, %v3810_v50  ;;  %vm3848_vm2 = vcmp.lt.s32.totalorder %v3846_v6, %v3847_v21  ;;  %vm3818_vm7 = vcmp.lt.s32.totalorder %v3816_v41, %v3817_v11 }
0x1c3e   :  { %v3832_v40 = vsel %vm3831_vm15, %v3829_v48, %v3830_v9  ;;  %v3812_v26 = vsel %vm3811_vm3, %v3809_v0, %v3810_v50  ;;  %v3849_v43 = vsel %vm3848_vm2, %v3846_v6, %v3847_v21  ;;  %v3819_v8 = vsel %vm3818_vm7, %v3816_v41, %v3817_v11 }
0x1c3f   :  { %v3813_v19 = vrot.slane %v3812_v26, 1  ;;  %v3820_v31 = vrot.slane %v3819_v8, 2  ;;  %v3833_v52 = vrot.slane %v3832_v40, 1  ;;  %v6634_v20 = vmax.f32 %v3780_v27, %v3781_v13 }
0x1c40   :  { %v3761_v46 = vmax.f32 %v3759_v45, %v3760_v61  ;;  %v3772_v10 = vrot.slane %v3771_v47, 2  ;;  %v3850_v39 = vrot.slane %v3849_v43, 2  ;;  %v3783_v51 = vsel %vm2494_vm14, %v6638_v32, -inf }
0x1c41   :  { %vm3821_vm10 = vcmp.lt.s32.totalorder %v3819_v8, %v3820_v31  ;;  %vm3814_vm6 = vcmp.lt.s32.totalorder %v3812_v26, %v3813_v19  ;;  %vm3796_vm12 = vcmp.eq.f32.partialorder %v6606_v58, %v6634_v20  ;;  %vm3834_vm15 = vcmp.lt.s32.totalorder %v3832_v40, %v3833_v52 }
0x1c42   :  { %v3822_v24 = vsel %vm3821_vm10, %v3819_v8, %v3820_v31  ;;  %vm3793_vm8 = vcmp.eq.f32.partialorder %v6609_v44, %v3761_v46  ;;  %v3804_v3 = vsel %vm3796_vm12, %v5625_v14, 8  ;;  %v3773_v34 = vmax.f32 %v3771_v47, %v3772_v10 }
0x1c43   :  { %v3823_v55 = vrot.slane %v3822_v24, 1  ;;  %v3801_v16 = vsel %vm3793_vm8, %v5625_v14, 8  ;;  %vm3851_vm3 = vcmp.lt.s32.totalorder %v3849_v43, %v3850_v39  ;;  %v3866_v53 = vsel %vm2494_vm14, %v3804_v3, 2147483647 }
0x1c44   :  { %v3836_v23 = vsel %vm2494_vm14, %v3801_v16, 2147483647  ;;  %v3815_v49 = vsel %vm3814_vm6, %v3812_v26, %v3813_v19  ;;  %v3867_v45 = vrot.slane %v3866_v53, 4  ;;  %v3835_v62 = vsel %vm3834_vm15, %v3832_v40, %v3833_v52 }
0x1c45   :  { %vm3824_vm2 = vcmp.lt.s32.totalorder %v3822_v24, %v3823_v55  ;;  %v3837_v42 = vrot.slane %v3836_v23, 4  ;;  %v3774_v44 = vrot.slane %v3773_v34, 1  ;;  %v3852_v48 = vsel %vm3851_vm3, %v3849_v43, %v3850_v39 }
0x1c46   :  { %v3825_v27 = vsel %vm3824_vm2, %v3822_v24, %v3823_v55  ;;  %vm3868_vm7 = vcmp.lt.s32.totalorder %v3866_v53, %v3867_v45  ;;  %v3784_v0 = vrot.slane %v3783_v51, 4  ;;  %v3907_v11 = vsel %vm2655_vm9, %v6618_v59, %v3906_v5  ;;  %v3888_v5 = vpop.permute.xlu0 %3887 }
0x1c47   :  { %v3890_v58 = vsel %vm2653_vm5, %v3825_v27, %v3815_v49  ;;  %vm3838_vm10 = vcmp.lt.s32.totalorder %v3836_v23, %v3837_v42  ;;  %v3869_v6 = vsel %vm3868_vm7, %v3866_v53, %v3867_v45  ;;  %v3775_v9 = vmax.f32 %v3773_v34, %v3774_v44 }
0x1c48   :  { %v3839_v41 = vsel %vm3838_vm10, %v3836_v23, %v3837_v42  ;;  %v3891_v50 = vsel %vm2655_vm9, %v3835_v62, %v3890_v58  ;;  %v3870_v21 = vrot.slane %v3869_v6, 2  ;;  %v3785_v61 = vmax.f32 %v3783_v51, %v3784_v0 }
0x1c49   :  { %v3840_v13 = vrot.slane %v3839_v41, 2  ;;  %v3853_v47 = vrot.slane %v3852_v48, 1  ;;  %v3908_v40 = vsel %vm2657_vm11, %v3761_v46, %v3907_v11  ;;  %vm3795_vm6 = vcmp.eq.f32.partialorder %v6616_v7, %v3775_v9 }
0x1c4a   :  { %v3803_v26 = vsel %vm3795_vm6, %v5625_v14, 8  ;;  %v3786_v43 = vrot.slane %v3785_v61, 2  ;;  %vm3871_vm8 = vcmp.lt.s32.totalorder %v3869_v6, %v3870_v21  ;;  %v3909_v18 = vsel %vm2659_vm1, %v6627_v4, %v3908_v40  ;;  %v6664_v4 = vld [vmem:[%s6946_s7 + $0x8] ss:$0 sm:$0xff] }
0x1c4b   :  { %vm3841_vm12 = vcmp.lt.s32.totalorder %v3839_v41, %v3840_v13  ;;  %v3856_v19 = vsel %vm2494_vm14, %v3803_v26, 2147483647  ;;  %vm3854_vm15 = vcmp.lt.s32.totalorder %v3852_v48, %v3853_v47  ;;  %v3910_v10 = vsel %vm2661_vm13, %v3775_v9, %v3909_v18 }
0x1c4c   :  { %v3842_v8 = vsel %vm3841_vm12, %v3839_v41, %v3840_v13  ;;  %v3857_v59 = vrot.slane %v3856_v19, 4  ;;  %v3787_v52 = vmax.f32 %v3785_v61, %v3786_v43  ;;  %v3872_v46 = vsel %vm3871_vm8, %v3869_v6, %v3870_v21 }
0x1c4d   :  { %v3843_v31 = vrot.slane %v3842_v8, 1  ;;  %v3855_v55 = vsel %vm3854_vm15, %v3852_v48, %v3853_v47  ;;  %v2420_v53 = vadd.f32 %v6664_v4, %v6485_v57  ;;  %v3873_v23 = vrot.slane %v3872_v46, 1 }
0x1c4e   :  { %vm3858_vm2 = vcmp.lt.s32.totalorder %v3856_v19, %v3857_v59  ;;  %v3788_v7 = vrot.slane %v3787_v52, 1  ;;  %v3911_v27 = vsel %vm2663_vm0, %v6634_v20, %v3910_v10  ;;  %vm3889_vm6 = vcmp.eq.s32.totalorder %v3888_v5, 1 }
0x1c4f   :  { %vm3844_vm3 = vcmp.lt.s32.totalorder %v3842_v8, %v3843_v31  ;;  %v3859_v24 = vsel %vm3858_vm2, %v3856_v19, %v3857_v59  ;;  %vm3874_vm12 = vcmp.lt.s32.totalorder %v3872_v46, %v3873_v23 }
0x1c50   :  { %v3845_v39 = vsel %vm3844_vm3, %v3842_v8, %v3843_v31  ;;  %v3860_v3 = vrot.slane %v3859_v24, 2  ;;  %v3789_v16 = vmax.f32 %v3787_v52, %v3788_v7  ;;  %v3875_v41 = vsel %vm3874_vm12, %v3872_v46, %v3873_v23 }
0x1c51   :  { %v3892_v34 = vsel %vm2657_vm11, %v3845_v39, %v3891_v50 }
0x1c52   :  { %v3893_v49 = vsel %vm2659_vm1, %v3855_v55, %v3892_v34  ;;  %vm3861_vm7 = vcmp.lt.s32.totalorder %v3859_v24, %v3860_v3  ;;  %vm3797_vm10 = vcmp.eq.f32.partialorder %v6638_v32, %v3789_v16  ;;  %v3912_v45 = vsel %vm2665_vm4, %v3789_v16, %v3911_v27 }
0x1c53   :  { %v3862_v42 = vsel %vm3861_vm7, %v3859_v24, %v3860_v3  ;;  %v3805_v62 = vsel %vm3797_vm10, %v5625_v14, 8  ;;  %v3914_v58 = vadd.f32 %v3912_v45, %v2420_v53 }
0x1c54   :  { %v3863_v44 = vrot.slane %v3862_v42, 1  ;;  %v3876_v51 = vsel %vm2494_vm14, %v3805_v62, 2147483647 }
0x1c55   :  { %v3877_v57 = vrot.slane %v3876_v51, 4  ;;  %v6677_v48 = vsel %vm3889_vm6, %v3914_v58, %v6567_v33 }
0x1c56   :  { %vm3864_vm8 = vcmp.lt.s32.totalorder %v3862_v42, %v3863_v44  ;;  %v3933_v20 = vrot.slane %v6677_v48, %v5989_v1  ;;  %v3919_v32 = vrot.slane %v6677_v48, %v5634_v17  ;;  %v3947_v33 = vrot.slane %v6677_v48, %v6003_v30 }
0x1c57   :  { %vm3878_vm15 = vcmp.lt.s32.totalorder %v3876_v51, %v3877_v57  ;;  %v3865_v0 = vsel %vm3864_vm8, %v3862_v42, %v3863_v44  ;;  %v3926_v11 = vrot.slane %v6677_v48, %v5628_v15  ;;  %v3961_v47 = vrot.slane %v6677_v48, %v5958_v56 }
0x1c58   :  { %v3879_v6 = vsel %vm3878_vm15, %v3876_v51, %v3877_v57  ;;  %v3894_v9 = vsel %vm2661_vm13, %v3865_v0, %v3893_v49  ;;  %3935 = vbcast.lane.b32.xlu0 %v3933_v20, 256  ;;  %3921 = vbcast.lane.b32.xlu1 %v3919_v32, 256  ;;  %v3940_v40 = vrot.slane %v6677_v48, %v5986_v28 }
0x1c59   :  { %v3880_v50 = vrot.slane %v3879_v6, 2  ;;  %v3895_v21 = vsel %vm2663_vm0, %v3875_v41, %v3894_v9  ;;  %v3954_v19 = vrot.slane %v6677_v48, %v6000_v29  ;;  %v3968_v31 = vrot.slane %v6677_v48, %v6010_v38 }
0x1c5b   :  { %vm3881_vm3 = vcmp.lt.s32.totalorder %v3879_v6, %v3880_v50 }
0x1c5c   :  { %v3882_v13 = vsel %vm3881_vm3, %v3879_v6, %v3880_v50  ;;  %3949 = vbcast.lane.b32.xlu0 %v3947_v33, 256  ;;  %3928 = vbcast.lane.b32.xlu1 %v3926_v11, 256 }
0x1c5d   :  { %v3883_v61 = vrot.slane %v3882_v13, 1 }
0x1c5f   :  { %vm3884_vm2 = vcmp.lt.s32.totalorder %v3882_v13, %v3883_v61 }
0x1c60   :  { %v3885_v26 = vsel %vm3884_vm2, %v3882_v13, %v3883_v61  ;;  %3963 = vbcast.lane.b32.xlu0 %v3961_v47, 256  ;;  %3942 = vbcast.lane.b32.xlu1 %v3940_v40, 256 }
0x1c61   :  { %v3896_v43 = vsel %vm2665_vm4, %v3885_v26, %v3895_v21 }
0x1c62   :  { %v6695_v8 = vsel %vm3889_vm6, %v3896_v43, 0 }
0x1c64   :  { %3956 = vbcast.lane.b32.xlu1 %v3954_v19, 256  ;;  %4133 = vperm.xlu0 %5208, %v6020_v12  }
0x1c68   :  { %3970 = vbcast.lane.b32.xlu1 %v3968_v31, 256 }
0x1cca   :  { %v3936_v18 = vpop.permute.xlu0 %3935  ;;  %v3922_v59 = vpop.permute.xlu1 %3921 }
0x1ccb   :  { %v3974_v52 = vadd.f32 %v6595_v35, %v3936_v18  ;;  %v3972_v10 = vadd.f32 %v6595_v35, %v3922_v59 }
0x1ccd   :  { %v3994_v46 = vsel %vm2494_vm14, %v3974_v52, -inf  ;;  %v3980_v7 = vsel %vm2494_vm14, %v3972_v10, -inf }
0x1cce   :  { %v3995_v39 = vrot.slane %v3994_v46, 4  ;;  %v3981_v24 = vrot.slane %v3980_v7, 4  ;;  %v3950_v5 = vpop.permute.xlu0 %3949  ;;  %v3929_v55 = vpop.permute.xlu1 %3928 }
0x1ccf   :  { %v3976_v12 = vadd.f32 %v6595_v35, %v3950_v5  ;;  %v3973_v3 = vadd.f32 %v6595_v35, %v3929_v55 }
0x1cd0   :  { %v3996_v16 = vmax.f32 %v3994_v46, %v3995_v39  ;;  %v3982_v34 = vmax.f32 %v3980_v7, %v3981_v24 }
0x1cd1   :  { %v4008_v53 = vsel %vm2494_vm14, %v3976_v12, -inf  ;;  %v3987_v23 = vsel %vm2494_vm14, %v3973_v3, -inf }
0x1cd2   :  { %v3997_v49 = vrot.slane %v3996_v16, 2  ;;  %v3983_v27 = vrot.slane %v3982_v34, 2  ;;  %v4009_v45 = vrot.slane %v4008_v53, 4  ;;  %v3988_v42 = vrot.slane %v3987_v23, 4  ;;  %v3964_v62 = vpop.permute.xlu0 %3963  ;;  %v3943_v58 = vpop.permute.xlu1 %3942 }
0x1cd3   :  { %v6711_v44 = vadd.f32 %v6595_v35, %v3964_v62  ;;  %v6714_v51 = vadd.f32 %v6595_v35, %v3943_v58 }
0x1cd4   :  { %v3998_v57 = vmax.f32 %v3996_v16, %v3997_v49  ;;  %v3984_v20 = vmax.f32 %v3982_v34, %v3983_v27  ;;  %v4010_v32 = vmax.f32 %v4008_v53, %v4009_v45  ;;  %v3989_v0 = vmax.f32 %v3987_v23, %v3988_v42 }
0x1cd5   :  { %v4022_v6 = vsel %vm2494_vm14, %v6711_v44, -inf  ;;  %v4001_v41 = vsel %vm2494_vm14, %v6714_v51, -inf }
0x1cd6   :  { %v3999_v9 = vrot.slane %v3998_v57, 1  ;;  %v3985_v50 = vrot.slane %v3984_v20, 1  ;;  %v4011_v21 = vrot.slane %v4010_v32, 2  ;;  %v3990_v33 = vrot.slane %v3989_v0, 2  ;;  %v3957_v11 = vpop.permute.xlu1 %3956 }
0x1cd7   :  { %v4023_v13 = vrot.slane %v4022_v6, 4  ;;  %v4002_v61 = vrot.slane %v4001_v41, 4  ;;  %v6721_v47 = vadd.f32 %v6595_v35, %v3957_v11 }
0x1cd8   :  { %v6723_v40 = vmax.f32 %v3998_v57, %v3999_v9  ;;  %v3986_v26 = vmax.f32 %v3984_v20, %v3985_v50  ;;  %v4012_v43 = vmax.f32 %v4010_v32, %v4011_v21  ;;  %v3991_v19 = vmax.f32 %v3989_v0, %v3990_v33 }
0x1cd9   :  { %v4024_v31 = vmax.f32 %v4022_v6, %v4023_v13  ;;  %v4003_v18 = vmax.f32 %v4001_v41, %v4002_v61  ;;  %v4015_v59 = vsel %vm2494_vm14, %v6721_v47, -inf }
0x1cda   :  { %vm4038_vm7 = vcmp.eq.f32.partialorder %v3974_v52, %v6723_v40  ;;  %vm4036_vm10 = vcmp.eq.f32.partialorder %v3972_v10, %v3986_v26  ;;  %v4013_v46 = vrot.slane %v4012_v43, 1  ;;  %v3992_v7 = vrot.slane %v3991_v19, 1 }
0x1cdb   :  { %v4046_v39 = vsel %vm4038_vm7, %v5625_v14, 8  ;;  %v4044_v24 = vsel %vm4036_vm10, %v5625_v14, 8  ;;  %v4025_v5 = vrot.slane %v4024_v31, 2  ;;  %v4004_v55 = vrot.slane %v4003_v18, 2 }
0x1cdc   :  { %v4072_v16 = vsel %vm2494_vm14, %v4046_v39, 2147483647  ;;  %v4052_v34 = vsel %vm2494_vm14, %v4044_v24, 2147483647  ;;  %v6732_v53 = vmax.f32 %v4012_v43, %v4013_v46  ;;  %v3993_v23 = vmax.f32 %v3991_v19, %v3992_v7  ;;  %v3971_v19 = vpop.permute.xlu1 %3970 }
0x1cdd   :  { %v4073_v49 = vrot.slane %v4072_v16, 4  ;;  %v4053_v27 = vrot.slane %v4052_v34, 4  ;;  %v4026_v45 = vmax.f32 %v4024_v31, %v4025_v5  ;;  %v4005_v52 = vmax.f32 %v4003_v18, %v4004_v55 }
0x1cde   :  { %vm4040_vm6 = vcmp.eq.f32.partialorder %v3976_v12, %v6732_v53  ;;  %vm4037_vm12 = vcmp.eq.f32.partialorder %v3973_v3, %v3993_v23  ;;  %v4016_v10 = vrot.slane %v4015_v59, 4  ;;  %v6743_v5 = vadd.f32 %v6595_v35, %v3971_v19 }
0x1cdf   :  { %vm4074_vm8 = vcmp.lt.s32.totalorder %v4072_v16, %v4073_v49  ;;  %vm4054_vm15 = vcmp.lt.s32.totalorder %v4052_v34, %v4053_v27  ;;  %v4048_v42 = vsel %vm4040_vm6, %v5625_v14, 8  ;;  %v4045_v62 = vsel %vm4037_vm12, %v5625_v14, 8 }
0x1ce0   :  { %v4075_v58 = vsel %vm4074_vm8, %v4072_v16, %v4073_v49  ;;  %v4055_v57 = vsel %vm4054_vm15, %v4052_v34, %v4053_v27  ;;  %v4092_v20 = vsel %vm2494_vm14, %v4048_v42, 2147483647  ;;  %v4062_v32 = vsel %vm2494_vm14, %v4045_v62, 2147483647 }
0x1ce1   :  { %v4076_v0 = vrot.slane %v4075_v58, 2  ;;  %v4056_v6 = vrot.slane %v4055_v57, 2  ;;  %v4093_v41 = vrot.slane %v4092_v20, 4  ;;  %v4063_v9 = vrot.slane %v4062_v32, 4 }
0x1ce2   :  { %v4027_v12 = vrot.slane %v4026_v45, 1  ;;  %v4006_v3 = vrot.slane %v4005_v52, 1  ;;  %v4017_v50 = vmax.f32 %v4015_v59, %v4016_v10  ;;  %v4152_v59 = vsel %vm2653_vm5, %v3993_v23, %v3986_v26 }
0x1ce3   :  { %vm4077_vm3 = vcmp.lt.s32.totalorder %v4075_v58, %v4076_v0  ;;  %vm4057_vm2 = vcmp.lt.s32.totalorder %v4055_v57, %v4056_v6  ;;  %vm4094_vm7 = vcmp.lt.s32.totalorder %v4092_v20, %v4093_v41  ;;  %vm4064_vm10 = vcmp.lt.s32.totalorder %v4062_v32, %v4063_v9 }
0x1ce4   :  { %v4078_v21 = vsel %vm4077_vm3, %v4075_v58, %v4076_v0  ;;  %v4058_v33 = vsel %vm4057_vm2, %v4055_v57, %v4056_v6  ;;  %v4095_v11 = vsel %vm4094_vm7, %v4092_v20, %v4093_v41  ;;  %v4065_v13 = vsel %vm4064_vm10, %v4062_v32, %v4063_v9 }
0x1ce5   :  { %v4059_v61 = vrot.slane %v4058_v33, 1  ;;  %v4066_v43 = vrot.slane %v4065_v13, 2  ;;  %v4079_v31 = vrot.slane %v4078_v21, 1  ;;  %v6739_v18 = vmax.f32 %v4026_v45, %v4027_v12 }
0x1ce6   :  { %v4007_v46 = vmax.f32 %v4005_v52, %v4006_v3  ;;  %v4018_v7 = vrot.slane %v4017_v50, 2  ;;  %v4096_v39 = vrot.slane %v4095_v11, 2  ;;  %v4029_v62 = vsel %vm2494_vm14, %v6743_v5, -inf }
0x1ce7   :  { %vm4067_vm6 = vcmp.lt.s32.totalorder %v4065_v13, %v4066_v43  ;;  %vm4060_vm12 = vcmp.lt.s32.totalorder %v4058_v33, %v4059_v61  ;;  %vm4042_vm8 = vcmp.eq.f32.partialorder %v6711_v44, %v6739_v18  ;;  %vm4080_vm3 = vcmp.lt.s32.totalorder %v4078_v21, %v4079_v31 }
0x1ce8   :  { %v4068_v24 = vsel %vm4067_vm6, %v4065_v13, %v4066_v43  ;;  %vm4039_vm15 = vcmp.eq.f32.partialorder %v6714_v51, %v4007_v46  ;;  %v4050_v16 = vsel %vm4042_vm8, %v5625_v14, 8  ;;  %v4019_v49 = vmax.f32 %v4017_v50, %v4018_v7 }
0x1ce9   :  { %v4069_v55 = vrot.slane %v4068_v24, 1  ;;  %v4047_v34 = vsel %vm4039_vm15, %v5625_v14, 8  ;;  %vm4097_vm2 = vcmp.lt.s32.totalorder %v4095_v11, %v4096_v39  ;;  %v4112_v26 = vsel %vm2494_vm14, %v4050_v16, 2147483647 }
0x1cea   :  { %v4082_v23 = vsel %vm2494_vm14, %v4047_v34, 2147483647  ;;  %v4061_v27 = vsel %vm4060_vm12, %v4058_v33, %v4059_v61  ;;  %v4113_v52 = vrot.slane %v4112_v26, 4  ;;  %v4081_v42 = vsel %vm4080_vm3, %v4078_v21, %v4079_v31 }
0x1ceb   :  { %vm4070_vm7 = vcmp.lt.s32.totalorder %v4068_v24, %v4069_v55  ;;  %v4083_v10 = vrot.slane %v4082_v23, 4  ;;  %v4020_v51 = vrot.slane %v4019_v49, 1  ;;  %v4098_v58 = vsel %vm4097_vm2, %v4095_v11, %v4096_v39 }
0x1cec   :  { %v4071_v45 = vsel %vm4070_vm7, %v4068_v24, %v4069_v55  ;;  %vm4114_vm10 = vcmp.lt.s32.totalorder %v4112_v26, %v4113_v52  ;;  %v4030_v57 = vrot.slane %v4029_v62, 4  ;;  %v4153_v9 = vsel %vm2655_vm9, %v6723_v40, %v4152_v59  ;;  %v4134_v59 = vpop.permute.xlu0 %4133 }
0x1ced   :  { %v4136_v44 = vsel %vm2653_vm5, %v4071_v45, %v4061_v27  ;;  %vm4084_vm6 = vcmp.lt.s32.totalorder %v4082_v23, %v4083_v10  ;;  %v4115_v20 = vsel %vm4114_vm10, %v4112_v26, %v4113_v52  ;;  %v4021_v0 = vmax.f32 %v4019_v49, %v4020_v51 }
0x1cee   :  { %v4085_v32 = vsel %vm4084_vm6, %v4082_v23, %v4083_v10  ;;  %v4137_v6 = vsel %vm2655_vm9, %v4081_v42, %v4136_v44  ;;  %v4116_v41 = vrot.slane %v4115_v20, 2  ;;  %v4031_v3 = vmax.f32 %v4029_v62, %v4030_v57 }
0x1cef   :  { %v4086_v12 = vrot.slane %v4085_v32, 2  ;;  %v4099_v50 = vrot.slane %v4098_v58, 1  ;;  %v4154_v21 = vsel %vm2657_vm11, %v4007_v46, %v4153_v9  ;;  %vm4041_vm12 = vcmp.eq.f32.partialorder %v6721_v47, %v4021_v0 }
0x1cf0   :  { %v4049_v33 = vsel %vm4041_vm12, %v5625_v14, 8  ;;  %v4032_v11 = vrot.slane %v4031_v3, 2  ;;  %vm4117_vm15 = vcmp.lt.s32.totalorder %v4115_v20, %v4116_v41  ;;  %v4155_v19 = vsel %vm2659_vm1, %v6732_v53, %v4154_v21 }
0x1cf1   :  { %vm4087_vm8 = vcmp.lt.s32.totalorder %v4085_v32, %v4086_v12  ;;  %v4102_v61 = vsel %vm2494_vm14, %v4049_v33, 2147483647  ;;  %vm4100_vm3 = vcmp.lt.s32.totalorder %v4098_v58, %v4099_v50  ;;  %v4156_v7 = vsel %vm2661_vm13, %v4021_v0, %v4155_v19 }
0x1cf2   :  { %v4088_v13 = vsel %vm4087_vm8, %v4085_v32, %v4086_v12  ;;  %v4103_v40 = vrot.slane %v4102_v61, 4  ;;  %v4033_v31 = vmax.f32 %v4031_v3, %v4032_v11  ;;  %v4118_v46 = vsel %vm4117_vm15, %v4115_v20, %v4116_v41 }
0x1cf3   :  { %v4089_v43 = vrot.slane %v4088_v13, 1  ;;  %v4101_v55 = vsel %vm4100_vm3, %v4098_v58, %v4099_v50  ;;  %v2421_v53 = vadd.f32 %v6664_v4, %v6483_v22  ;;  %v4119_v26 = vrot.slane %v4118_v46, 1 }
0x1cf4   :  { %vm4104_vm7 = vcmp.lt.s32.totalorder %v4102_v61, %v4103_v40  ;;  %v4034_v47 = vrot.slane %v4033_v31, 1  ;;  %v4157_v27 = vsel %vm2663_vm0, %v6739_v18, %v4156_v7  ;;  %vm4135_vm12 = vcmp.eq.s32.totalorder %v4134_v59, 1 }
0x1cf5   :  { %vm4090_vm2 = vcmp.lt.s32.totalorder %v4088_v13, %v4089_v43  ;;  %v4105_v24 = vsel %vm4104_vm7, %v4102_v61, %v4103_v40  ;;  %vm4120_vm8 = vcmp.lt.s32.totalorder %v4118_v46, %v4119_v26 }
0x1cf6   :  { %v4091_v39 = vsel %vm4090_vm2, %v4088_v13, %v4089_v43  ;;  %v4106_v16 = vrot.slane %v4105_v24, 2  ;;  %v4035_v34 = vmax.f32 %v4033_v31, %v4034_v47  ;;  %v4121_v57 = vsel %vm4120_vm8, %v4118_v46, %v4119_v26 }
0x1cf7   :  { %v4138_v49 = vsel %vm2657_vm11, %v4091_v39, %v4137_v6 }
0x1cf8   :  { %v4139_v23 = vsel %vm2659_vm1, %v4101_v55, %v4138_v49  ;;  %vm4107_vm10 = vcmp.lt.s32.totalorder %v4105_v24, %v4106_v16  ;;  %vm4043_vm6 = vcmp.eq.f32.partialorder %v6743_v5, %v4035_v34  ;;  %v4158_v45 = vsel %vm2665_vm4, %v4035_v34, %v4157_v27 }
0x1cf9   :  { %v4108_v52 = vsel %vm4107_vm10, %v4105_v24, %v4106_v16  ;;  %v4051_v10 = vsel %vm4043_vm6, %v5625_v14, 8  ;;  %v4160_v42 = vadd.f32 %v4158_v45, %v2421_v53 }
0x1cfa   :  { %v4109_v44 = vrot.slane %v4108_v52, 1  ;;  %v4122_v51 = vsel %vm2494_vm14, %v4051_v10, 2147483647 }
0x1cfb   :  { %v4123_v22 = vrot.slane %v4122_v51, 4  ;;  %v4161_v4 = vsel %vm4135_vm12, %v4160_v42, %v6677_v48 }
0x1cfc   :  { %vm4110_vm15 = vcmp.lt.s32.totalorder %v4108_v52, %v4109_v44  ;;  %v4179_v18 = vrot.slane %v4161_v4, %v5989_v1  ;;  %v4165_v5 = vrot.slane %v4161_v4, %v5634_v17  ;;  %v4193_v6 = vrot.slane %v4161_v4, %v6003_v30 }
0x1cfd   :  { %vm4124_vm3 = vcmp.lt.s32.totalorder %v4122_v51, %v4123_v22  ;;  %v4111_v62 = vsel %vm4110_vm15, %v4108_v52, %v4109_v44  ;;  %v4172_v48 = vrot.slane %v4161_v4, %v5628_v15  ;;  %v4207_v1 = vrot.slane %v4161_v4, %v5958_v56 }
0x1cfe   :  { %v4125_v58 = vsel %vm4124_vm3, %v4122_v51, %v4123_v22  ;;  %v4140_v20 = vsel %vm2661_vm13, %v4111_v62, %v4139_v23  ;;  %4181 = vbcast.lane.b32.xlu0 %v4179_v18, 256  ;;  %4167 = vbcast.lane.b32.xlu1 %v4165_v5, 256  ;;  %v4186_v9 = vrot.slane %v4161_v4, %v5986_v28 }
0x1cff   :  { %v4126_v32 = vrot.slane %v4125_v58, 2  ;;  %v4141_v0 = vsel %vm2663_vm0, %v4121_v57, %v4140_v20  ;;  %v4200_v15 = vrot.slane %v4161_v4, %v6000_v29  ;;  %v4214_v30 = vrot.slane %v4161_v4, %v6010_v38 }
0x1d01   :  { %vm4127_vm2 = vcmp.lt.s32.totalorder %v4125_v58, %v4126_v32 }
0x1d02   :  { %v4128_v41 = vsel %vm4127_vm2, %v4125_v58, %v4126_v32  ;;  %4195 = vbcast.lane.b32.xlu0 %v4193_v6, 256  ;;  %4174 = vbcast.lane.b32.xlu1 %v4172_v48, 256 }
0x1d03   :  { %v4129_v17 = vrot.slane %v4128_v41, 1 }
0x1d05   :  { %vm4130_vm7 = vcmp.lt.s32.totalorder %v4128_v41, %v4129_v17 }
0x1d06   :  { %v4131_v12 = vsel %vm4130_vm7, %v4128_v41, %v4129_v17  ;;  %4209 = vbcast.lane.b32.xlu0 %v4207_v1, 256  ;;  %4188 = vbcast.lane.b32.xlu1 %v4186_v9, 256 }
0x1d07   :  { %v4142_v3 = vsel %vm2665_vm4, %v4131_v12, %v4141_v0 }
0x1d08   :  { %v6787_v50 = vsel %vm4135_vm12, %v4142_v3, 0 }
0x1d0a   :  { %4202 = vbcast.lane.b32.xlu1 %v4200_v15, 256 }
0x1d0e   :  { %4216 = vbcast.lane.b32.xlu1 %v4214_v30, 256 }
0x1d70   :  { %v4182_v21 = vpop.permute.xlu0 %4181  ;;  %v4168_v33 = vpop.permute.xlu1 %4167 }
0x1d71   :  { %v4220_v56 = vadd.f32 %v6595_v35, %v4182_v21  ;;  %v4218_v28 = vadd.f32 %v6595_v35, %v4168_v33 }
0x1d73   :  { %v4240_v11 = vsel %vm2494_vm14, %v4220_v56, -inf  ;;  %v4226_v13 = vsel %vm2494_vm14, %v4218_v28, -inf }
0x1d74   :  { %v4241_v61 = vrot.slane %v4240_v11, 4  ;;  %v4227_v43 = vrot.slane %v4226_v13, 4  ;;  %v4196_v19 = vpop.permute.xlu0 %4195  ;;  %v4175_v40 = vpop.permute.xlu1 %4174 }
0x1d75   :  { %v4222_v29 = vadd.f32 %v6595_v35, %v4196_v19  ;;  %v4219_v31 = vadd.f32 %v6595_v35, %v4175_v40 }
0x1d76   :  { %v4242_v38 = vmax.f32 %v4240_v11, %v4241_v61  ;;  %v4228_v7 = vmax.f32 %v4226_v13, %v4227_v43 }
0x1d77   :  { %v4254_v46 = vsel %vm2494_vm14, %v4222_v29, -inf  ;;  %v4233_v47 = vsel %vm2494_vm14, %v4219_v31, -inf }
0x1d78   :  { %v4243_v39 = vrot.slane %v4242_v38, 2  ;;  %v4229_v24 = vrot.slane %v4228_v7, 2  ;;  %v4255_v59 = vrot.slane %v4254_v46, 4  ;;  %v4234_v55 = vrot.slane %v4233_v47, 4  ;;  %v4210_v16 = vpop.permute.xlu0 %4209  ;;  %v4189_v34 = vpop.permute.xlu1 %4188 }
0x1d79   :  { %v6800_v49 = vadd.f32 %v6595_v35, %v4210_v16  ;;  %v6803_v53 = vadd.f32 %v6595_v35, %v4189_v34 }
0x1d7a   :  { %v4244_v26 = vmax.f32 %v4242_v38, %v4243_v39  ;;  %v4230_v23 = vmax.f32 %v4228_v7, %v4229_v24  ;;  %v4256_v27 = vmax.f32 %v4254_v46, %v4255_v59  ;;  %v4235_v45 = vmax.f32 %v4233_v47, %v4234_v55 }
0x1d7b   :  { %v4268_v52 = vsel %vm2494_vm14, %v6800_v49, -inf  ;;  %v4247_v10 = vsel %vm2494_vm14, %v6803_v53, -inf }
0x1d7c   :  { %v4245_v42 = vrot.slane %v4244_v26, 1  ;;  %v4231_v44 = vrot.slane %v4230_v23, 1  ;;  %v4257_v51 = vrot.slane %v4256_v27, 2  ;;  %v4236_v22 = vrot.slane %v4235_v45, 2  ;;  %v4203_v4 = vpop.permute.xlu1 %4202 }
0x1d7d   :  { %v4269_v18 = vrot.slane %v4268_v52, 4  ;;  %v4248_v5 = vrot.slane %v4247_v10, 4  ;;  %v6810_v62 = vadd.f32 %v6595_v35, %v4203_v4 }
0x1d7e   :  { %v4246_v58 = vmax.f32 %v4244_v26, %v4245_v42  ;;  %v4232_v57 = vmax.f32 %v4230_v23, %v4231_v44  ;;  %v4258_v20 = vmax.f32 %v4256_v27, %v4257_v51  ;;  %v4237_v32 = vmax.f32 %v4235_v45, %v4236_v22 }
0x1d7f   :  { %v4270_v0 = vmax.f32 %v4268_v52, %v4269_v18  ;;  %v4249_v6 = vmax.f32 %v4247_v10, %v4248_v5  ;;  %v4261_v48 = vsel %vm2494_vm14, %v6810_v62, -inf }
0x1d80   :  { %vm4284_vm10 = vcmp.eq.f32.partialorder %v4220_v56, %v4246_v58  ;;  %vm4282_vm6 = vcmp.eq.f32.partialorder %v4218_v28, %v4232_v57  ;;  %v4259_v41 = vrot.slane %v4258_v20, 1  ;;  %v4238_v17 = vrot.slane %v4237_v32, 1  ;;  %v4217_v15 = vpop.permute.xlu1 %4216 }
0x1d81   :  { %v4292_v1 = vsel %vm4284_vm10, %v5625_v14, 8  ;;  %v4290_v9 = vsel %vm4282_vm6, %v5625_v14, 8  ;;  %v4271_v12 = vrot.slane %v4270_v0, 2  ;;  %v4250_v3 = vrot.slane %v4249_v6, 2 }
0x1d82   :  { %v4318_v30 = vsel %vm2494_vm14, %v4292_v1, 2147483647  ;;  %v4298_v21 = vsel %vm2494_vm14, %v4290_v9, 2147483647  ;;  %v4260_v33 = vmax.f32 %v4258_v20, %v4259_v41  ;;  %v4239_v11 = vmax.f32 %v4237_v32, %v4238_v17 }
0x1d83   :  { %v4319_v13 = vrot.slane %v4318_v30, 4  ;;  %v4299_v61 = vrot.slane %v4298_v21, 4  ;;  %v4272_v43 = vmax.f32 %v4270_v0, %v4271_v12  ;;  %v4251_v56 = vmax.f32 %v4249_v6, %v4250_v3 }
0x1d84   :  { %vm4286_vm12 = vcmp.eq.f32.partialorder %v4222_v29, %v4260_v33  ;;  %vm4283_vm8 = vcmp.eq.f32.partialorder %v4219_v31, %v4239_v11  ;;  %v4262_v28 = vrot.slane %v4261_v48, 4  ;;  %v6819_v19 = vadd.f32 %v6595_v35, %v4217_v15 }
0x1d85   :  { %vm4320_vm15 = vcmp.lt.s32.totalorder %v4318_v30, %v4319_v13  ;;  %vm4300_vm3 = vcmp.lt.s32.totalorder %v4298_v21, %v4299_v61  ;;  %v4294_v40 = vsel %vm4286_vm12, %v5625_v14, 8  ;;  %v4291_v38 = vsel %vm4283_vm8, %v5625_v14, 8 }
0x1d86   :  { %v4321_v7 = vsel %vm4320_vm15, %v4318_v30, %v4319_v13  ;;  %v4301_v46 = vsel %vm4300_vm3, %v4298_v21, %v4299_v61  ;;  %v4338_v47 = vsel %vm2494_vm14, %v4294_v40, 2147483647  ;;  %v4308_v39 = vsel %vm2494_vm14, %v4291_v38, 2147483647 }
0x1d87   :  { %v4322_v24 = vrot.slane %v4321_v7, 2  ;;  %v4302_v59 = vrot.slane %v4301_v46, 2  ;;  %v4339_v29 = vrot.slane %v4338_v47, 4  ;;  %v4309_v31 = vrot.slane %v4308_v39, 4 }
0x1d88   :  { %v4273_v55 = vrot.slane %v4272_v43, 1  ;;  %v4252_v16 = vrot.slane %v4251_v56, 1  ;;  %v4263_v35 = vmax.f32 %v4261_v48, %v4262_v28  ;;  %v4275_v34 = vsel %vm2494_vm14, %v6819_v19, -inf }
0x1d89   :  { %vm4340_vm2 = vcmp.lt.s32.totalorder %v4338_v47, %v4339_v29  ;;  %vm4310_vm7 = vcmp.lt.s32.totalorder %v4308_v39, %v4309_v31  ;;  %v4276_v26 = vrot.slane %v4275_v34, 4  ;;  %vm4303_vm10 = vcmp.lt.s32.totalorder %v4301_v46, %v4302_v59 }
0x1d8a   :  { %v4341_v23 = vsel %vm4340_vm2, %v4338_v47, %v4339_v29  ;;  %v4311_v27 = vsel %vm4310_vm7, %v4308_v39, %v4309_v31  ;;  %v4274_v45 = vmax.f32 %v4272_v43, %v4273_v55  ;;  %v4253_v52 = vmax.f32 %v4251_v56, %v4252_v16 }
0x1d8b   :  { %v4342_v10 = vrot.slane %v4341_v23, 2  ;;  %v4312_v42 = vrot.slane %v4311_v27, 2  ;;  %v4264_v44 = vrot.slane %v4263_v35, 2  ;;  %v4277_v51 = vmax.f32 %v4275_v34, %v4276_v26 }
0x1d8c   :  { %vm4288_vm6 = vcmp.eq.f32.partialorder %v6800_v49, %v4274_v45  ;;  %vm4285_vm12 = vcmp.eq.f32.partialorder %v6803_v53, %v4253_v52  ;;  %v4304_v22 = vsel %vm4303_vm10, %v4301_v46, %v4302_v59  ;;  %vm4323_vm8 = vcmp.lt.s32.totalorder %v4321_v7, %v4322_v24 }
0x1d8d   :  { %v4296_v4 = vsel %vm4288_vm6, %v5625_v14, 8  ;;  %v4293_v18 = vsel %vm4285_vm12, %v5625_v14, 8  ;;  %v4265_v5 = vmax.f32 %v4263_v35, %v4264_v44  ;;  %v4278_v58 = vrot.slane %v4277_v51, 2 }
0x1d8e   :  { %v4358_v57 = vsel %vm2494_vm14, %v4296_v4, 2147483647  ;;  %v4328_v20 = vsel %vm2494_vm14, %v4293_v18, 2147483647  ;;  %v4305_v32 = vrot.slane %v4304_v22, 1  ;;  %v4324_v0 = vsel %vm4323_vm8, %v4321_v7, %v4322_v24 }
0x1d8f   :  { %v4359_v6 = vrot.slane %v4358_v57, 4  ;;  %v4329_v48 = vrot.slane %v4328_v20, 4  ;;  %v4266_v41 = vrot.slane %v4265_v5, 1  ;;  %v4279_v49 = vmax.f32 %v4277_v51, %v4278_v58 }
0x1d90   :  { %vm4306_vm15 = vcmp.lt.s32.totalorder %v4304_v22, %v4305_v32  ;;  %v4325_v53 = vrot.slane %v4324_v0, 1  ;;  %vm6833_vm3 = vcmp.lt.s32.totalorder %v4311_v27, %v4312_v42  ;;  %vm6837_vm2 = vcmp.lt.s32.totalorder %v4341_v23, %v4342_v10 }
0x1d91   :  { %vm4360_vm7 = vcmp.lt.s32.totalorder %v4358_v57, %v4359_v6  ;;  %vm4330_vm10 = vcmp.lt.s32.totalorder %v4328_v20, %v4329_v48  ;;  %v4267_v9 = vmax.f32 %v4265_v5, %v4266_v41  ;;  %v4280_v12 = vrot.slane %v4279_v49, 1 }
0x1d92   :  { %v4361_v3 = vsel %vm4360_vm7, %v4358_v57, %v4359_v6  ;;  %v4331_v15 = vsel %vm4330_vm10, %v4328_v20, %v4329_v48  ;;  %v4307_v30 = vsel %vm4306_vm15, %v4304_v22, %v4305_v32  ;;  %vm4326_vm6 = vcmp.lt.s32.totalorder %v4324_v0, %v4325_v53  ;;  %v5345_v57 = vld [vmem:[%s6940_s1] sm:$0xff]  ;;  %s5384_s1 = smov 121  }
0x1d93   :  { %v4362_v21 = vrot.slane %v4361_v3, 2  ;;  %v4332_v33 = vrot.slane %v4331_v15, 2  ;;  %vm4287_vm12 = vcmp.eq.f32.partialorder %v6810_v62, %v4267_v9  ;;  %v4281_v11 = vmax.f32 %v4279_v49, %v4280_v12  ;;  %4383 = vperm.xlu0 %5208, %v4307_v30  }
0x1d94   :  { %v4295_v13 = vsel %vm4287_vm12, %v5625_v14, 8  ;;  %v4327_v61 = vsel %vm4326_vm6, %v4324_v0, %v4325_v53  ;;  %v4314_v43 = vsel %vm6833_vm3, %v4311_v27, %v4312_v42  ;;  %v4344_v56 = vsel %vm6837_vm2, %v4341_v23, %v4342_v10 }
0x1d95   :  { %v4348_v28 = vsel %vm2494_vm14, %v4295_v13, 2147483647  ;;  %vm4289_vm8 = vcmp.eq.f32.partialorder %v6819_v19, %v4281_v11  ;;  %v4315_v40 = vrot.slane %v4314_v43, 1  ;;  %v4345_v38 = vrot.slane %v4344_v56, 1 }
0x1d96   :  { %v4349_v7 = vrot.slane %v4348_v28, 4  ;;  %v4297_v62 = vsel %vm4289_vm8, %v5625_v14, 8  ;;  %vm4333_vm15 = vcmp.lt.s32.totalorder %v4331_v15, %v4332_v33  ;;  %vm4363_vm7 = vcmp.lt.s32.totalorder %v4361_v3, %v4362_v21 }
0x1d97   :  { %v4368_v46 = vsel %vm2494_vm14, %v4297_v62, 2147483647  ;;  %4389 = vperm.xlu0 %5208, %v4327_v61   ;;  %vm4316_vm10 = vcmp.lt.s32.totalorder %v4314_v43, %v4315_v40  ;;  %vm4346_vm6 = vcmp.lt.s32.totalorder %v4344_v56, %v4345_v38  ;;  %v4334_v47 = vsel %vm4333_vm15, %v4331_v15, %v4332_v33 }
0x1d98   :  { %vm4350_vm3 = vcmp.lt.s32.totalorder %v4348_v28, %v4349_v7  ;;  %v4369_v39 = vrot.slane %v4368_v46, 4  ;;  %v4317_v24 = vsel %vm4316_vm10, %v4314_v43, %v4315_v40  ;;  %v4347_v59 = vsel %vm4346_vm6, %v4344_v56, %v4345_v38 }
0x1d99   :  { %v4351_v29 = vsel %vm4350_vm3, %v4348_v28, %v4349_v7  ;;  %4386 = vperm.xlu1 %5209, %v4317_v24   ;;  %v4429_v19 = vsel %vm2653_vm5, %v4317_v24, %v4307_v30  ;;  %v4335_v31 = vrot.slane %v4334_v47, 1  ;;  %v4364_v55 = vsel %vm4363_vm7, %v4361_v3, %v4362_v21 }
0x1d9a   :  { %v4352_v16 = vrot.slane %v4351_v29, 2  ;;  %vm4370_vm2 = vcmp.lt.s32.totalorder %v4368_v46, %v4369_v39  ;;  %v4430_v14 = vsel %vm2655_vm9, %v4327_v61, %v4429_v19  ;;  %v4365_v35 = vrot.slane %v4364_v55, 1 }
0x1d9b   :  { %v4371_v34 = vsel %vm4370_vm2, %v4368_v46, %v4369_v39  ;;  %4395 = vperm.xlu0 %5208, %v4347_v59   ;;  %vm4336_vm12 = vcmp.lt.s32.totalorder %v4334_v47, %v4335_v31  ;;  %v4378_v20 = vsel %vm2494_vm14, %v5345_v57, 0.0 }
0x1d9c   :  { %v4372_v26 = vrot.slane %v4371_v34, 2  ;;  %v4337_v23 = vsel %vm4336_vm12, %v4334_v47, %v4335_v31  ;;  %vm4366_vm8 = vcmp.lt.s32.totalorder %v4364_v55, %v4365_v35  ;;  %vm4353_vm15 = vcmp.lt.s32.totalorder %v4351_v29, %v4352_v16 }
0x1d9d   :  { %4392 = vperm.xlu1 %5209, %v4337_v23   ;;  %v4431_v27 = vsel %vm2657_vm11, %v4337_v23, %v4430_v14  ;;  %v4354_v45 = vsel %vm4353_vm15, %v4351_v29, %v4352_v16  ;;  %v4367_v52 = vsel %vm4366_vm8, %v4364_v55, %v4365_v35 }
0x1d9e   :  { %v4355_v10 = vrot.slane %v4354_v45, 1  ;;  %v4432_v42 = vsel %vm2659_vm1, %v4347_v59, %v4431_v27  ;;  %vm4373_vm7 = vcmp.lt.s32.totalorder %v4371_v34, %v4372_v26 }
0x1d9f   :  { %4401 = vperm.xlu0 %5208, %v4367_v52   ;;  %v4374_v44 = vsel %vm4373_vm7, %v4371_v34, %v4372_v26 }
0x1da0   :  { %vm4356_vm10 = vcmp.lt.s32.totalorder %v4354_v45, %v4355_v10  ;;  %v4375_v51 = vrot.slane %v4374_v44, 1 }
0x1da1   :  { %v4357_v22 = vsel %vm4356_vm10, %v4354_v45, %v4355_v10  ;;  %vm4571_vm10 = vcmask 7168  }
0x1da2   :  { %4398 = vperm.xlu1 %5209, %v4357_v22   ;;  %v4433_v4 = vsel %vm2661_vm13, %v4357_v22, %v4432_v42  ;;  %vm4376_vm6 = vcmp.lt.s32.totalorder %v4374_v44, %v4375_v51 }
0x1da3   :  { %v4377_v18 = vsel %vm4376_vm6, %v4374_v44, %v4375_v51  ;;  %v4434_v5 = vsel %vm2663_vm0, %v4367_v52, %v4433_v4  ;;  %5211 = vset.pattern.permute.xlu0 %v5370_v2 }
0x1da4   :  { %v6859_v58 = vsel %vm2665_vm4, %v4377_v18, %v4434_v5 }
0x1da6   :  { %4404 = vperm.xlu1 %5209, %v4377_v18  }
0x1daa   :  { %5210 = vset.pattern.permute.xlu1 %v5370_v2 }
0x1dca   :  { %4379 = vadd.xlane.f32.xlu1 %v4378_v20 }
0x1e12   :  { %v4384_v32 = vpop.permute.xlu0 %4383 }
0x1e16   :  { %v4390_v0 = vpop.permute.xlu0 %4389 }
0x1e18   :  { %v4387_v6 = vpop.permute.xlu1 %4386 }
0x1e19   :  { %v4406_v48 = vsel %vm2653_vm5, %v4387_v6, %v4384_v32 }
0x1e1a   :  { %v4396_v41 = vpop.permute.xlu0 %4395  ;;  %v4407_v53 = vsel %vm2655_vm9, %v4390_v0, %v4406_v48 }
0x1e1c   :  { %v4393_v49 = vpop.permute.xlu1 %4392 }
0x1e1d   :  { %v4408_v17 = vsel %vm2657_vm11, %v4393_v49, %v4407_v53 }
0x1e1e   :  { %v4409_v2 = vsel %vm2659_vm1, %v4396_v41, %v4408_v17  ;;  %v4402_v9 = vpop.permute.xlu0 %4401 }
0x1e21   :  { %v4399_v1 = vpop.permute.xlu1 %4398 }
0x1e22   :  { %v4410_v12 = vsel %vm2661_vm13, %v4399_v1, %v4409_v2 }
0x1e23   :  { %v4411_v3 = vsel %vm2663_vm0, %v4402_v9, %v4410_v12 }
0x1e25   :  { %v4405_v15 = vpop.permute.xlu1 %4404 }
0x1e26   :  { %v4412_v30 = vsel %vm2665_vm4, %v4405_v15, %v4411_v3 }
0x1e27   :  { %vm4413_vm3 = vcmp.eq.s32.totalorder %v5516_v36, %v4412_v30 }
0x1e28   :  { %v4414_v21 = vsel %vm4413_vm3, %v6787_v50, 0  ;;  %vm4573_vm3 = vcmask 15360  }
0x1e29   :  { %v4415_v33 = vsel %vm2494_vm14, %v4414_v21, 0 }
0x1e2a   :  { %v4417_v11 = vshrl.u32 %v4415_v33, 16  ;;  %v4416_v61 = vand.u32 65535, %v4415_v33 }
0x1e2c   :  { %v4419_v13 = vcvt.s32.f32 %v4417_v11  ;;  %v4418_v43 = vcvt.s32.f32 %v4416_v61 }
0x1e2e   :  { %4422 = vadd.xlane.f32.xlu0 %v4419_v13 }
0x1e32   :  { %4420 = vadd.xlane.f32.xlu0 %v4418_v43 }
0x1e48   :  { %4436 = vrot.lane.b32.xlu0 %v6859_v58, %s5384_s1 }
0x1e57   :  { %v4380_v56 = vpop.xlane.xlu1 %4379 }
0x1e58   :  { %v5169_v28 = vtrunc.f32 %v4380_v56 }
0x1e5a   :  { %v6877_v7 = vcvt.f32.s32 %v5169_v28 }
0x1e5c   :  { %vm4428_vm5 = vcmp.eq.s32.totalorder %v6877_v7, 7  ;;  %vm4457_vm11 = vcmp.eq.s32.totalorder %v6877_v7, 6  ;;  %vm4477_vm13 = vcmp.eq.s32.totalorder %v6877_v7, 5  ;;  %vm4497_vm4 = vcmp.eq.s32.totalorder %v6877_v7, 4 }
0x1e5d   :  { %vm4517_vm12 = vcmp.eq.s32.totalorder %v6877_v7, 3  ;;  %vm4537_vm15 = vcmp.eq.s32.totalorder %v6877_v7, 2  ;;  %vm4557_vm6 = vcmp.eq.s32.totalorder %v6877_v7, 1 }
0x1ebb   :  { %v4423_v40 = vpop.xlane.xlu0 %4422 }
0x1ebc   :  { %v4425_v38 = vcvt.f32.s32 %v4423_v40 }
0x1ebe   :  { %v4426_v46 = vshll.u32 %v4425_v38, 16 }
0x1ebf   :  { %v4421_v62 = vpop.xlane.xlu0 %4420 }
0x1ec0   :  { %v4424_v50 = vcvt.f32.s32 %v4421_v62 }
0x1ec2   :  { %v4427_v47 = vadd.s32 %v4426_v46, %v4424_v50 }
0x1ec3   :  { %v6880_v39 = vpop.permute.xlu0 %4436 }
0x1ec4   :  { %v6883_v24 = vsel %vm4428_vm5, %v6880_v39, %v4427_v47  ;;  %vm4575_vm5 = vcmask 23552  }
0x1ec5   :  { %4440 = vperm.xlu1 %5210, %v6883_v24  }
0x1f44   :  { %v4441_v59 = vpop.permute.xlu1 %4440 }
0x1f45   :  { %vm4442_vm9 = vcmp.eq.s32.totalorder %v5516_v36, %v4441_v59 }
0x1f46   :  { %v4443_v29 = vsel %vm4442_vm9, %v6695_v8, 0  ;;  %vm4577_vm9 = vcmask 31744  }
0x1f47   :  { %v4444_v19 = vsel %vm2494_vm14, %v4443_v29, 0 }
0x1f48   :  { %v4445_v31 = vand.u32 65535, %v4444_v19  ;;  %v4446_v55 = vshrl.u32 %v4444_v19, 16 }
0x1f4a   :  { %v4448_v16 = vcvt.s32.f32 %v4446_v55  ;;  %v4447_v14 = vcvt.s32.f32 %v4445_v31 }
0x1f4c   :  { %4451 = vadd.xlane.f32.xlu1 %v4448_v16  ;;  %4449 = vadd.xlane.f32.xlu0 %v4447_v14 }
0x1fd9   :  { %v4452_v35 = vpop.xlane.xlu1 %4451  ;;  %v4450_v34 = vpop.xlane.xlu0 %4449 }
0x1fda   :  { %v4454_v26 = vcvt.f32.s32 %v4452_v35  ;;  %v4453_v27 = vcvt.f32.s32 %v4450_v34 }
0x1fdc   :  { %v4455_v23 = vshll.u32 %v4454_v26, 16 }
0x1fde   :  { %v4456_v45 = vadd.s32 %v4455_v23, %v4453_v27 }
0x1fe0   :  { %v6891_v52 = vsel %vm4457_vm11, %v6880_v39, %v4456_v45  ;;  %vm4579_vm11 = vcmask 39936  }
0x1fe1   :  { %4460 = vperm.xlu0 %5211, %v6891_v52  }
0x2060   :  { %v4461_v8 = vpop.permute.xlu0 %4460 }
0x2061   :  { %vm4462_vm1 = vcmp.eq.s32.totalorder %v5516_v36, %v4461_v8 }
0x2062   :  { %v4463_v10 = vsel %vm4462_vm1, %v6584_v37, 0  ;;  %vm4581_vm1 = vcmask 48128  }
0x2063   :  { %v4464_v42 = vsel %vm2494_vm14, %v4463_v10, 0 }
0x2064   :  { %v4466_v44 = vshrl.u32 %v4464_v42, 16  ;;  %v4465_v51 = vand.u32 65535, %v4464_v42 }
0x2066   :  { %v4468_v22 = vcvt.s32.f32 %v4466_v44  ;;  %v4467_v4 = vcvt.s32.f32 %v4465_v51 }
0x2068   :  { %4471 = vadd.xlane.f32.xlu1 %v4468_v22 }
0x206c   :  { %4469 = vadd.xlane.f32.xlu1 %v4467_v4 }
0x20f5   :  { %v4472_v18 = vpop.xlane.xlu1 %4471 }
0x20f6   :  { %v4474_v5 = vcvt.f32.s32 %v4472_v18 }
0x20f8   :  { %v4475_v20 = vshll.u32 %v4474_v5, 16 }
0x20f9   :  { %v4470_v57 = vpop.xlane.xlu1 %4469 }
0x20fa   :  { %v4473_v32 = vcvt.f32.s32 %v4470_v57 }
0x20fc   :  { %v4476_v0 = vadd.s32 %v4475_v20, %v4473_v32 }
0x20fe   :  { %v6899_v6 = vsel %vm4477_vm13, %v6880_v39, %v4476_v0  ;;  %vm4583_vm13 = vcmask 56320  }
0x20ff   :  { %4480 = vperm.xlu1 %5210, %v6899_v6  }
0x217e   :  { %v4481_v37 = vpop.permute.xlu1 %4480 }
0x217f   :  { %vm4482_vm0 = vcmp.eq.s32.totalorder %v5516_v36, %v4481_v37 }
0x2180   :  { %v4483_v48 = vsel %vm4482_vm0, %v6475_v54, 0 }
0x2181   :  { %v4484_v41 = vsel %vm2494_vm14, %v4483_v48, 0 }
0x2182   :  { %v4485_v49 = vand.u32 65535, %v4484_v41  ;;  %v4486_v53 = vshrl.u32 %v4484_v41, 16 }
0x2184   :  { %v4488_v17 = vcvt.s32.f32 %v4486_v53  ;;  %v4487_v2 = vcvt.s32.f32 %v4485_v49 }
0x2186   :  { %4491 = vadd.xlane.f32.xlu1 %v4488_v17  ;;  %4489 = vadd.xlane.f32.xlu0 %v4487_v2 }
0x2213   :  { %v4492_v1 = vpop.xlane.xlu1 %4491  ;;  %v4490_v9 = vpop.xlane.xlu0 %4489 }
0x2214   :  { %v4494_v12 = vcvt.f32.s32 %v4492_v1  ;;  %v4493_v15 = vcvt.f32.s32 %v4490_v9 }
0x2216   :  { %v4495_v3 = vshll.u32 %v4494_v12, 16 }
0x2218   :  { %v4496_v30 = vadd.s32 %v4495_v3, %v4493_v15 }
0x221a   :  { %v4498_v21 = vsel %vm4497_vm4, %v6880_v39, %v4496_v30 }
0x221b   :  { %4500 = vperm.xlu1 %5210, %v4498_v21  }
0x229a   :  { %v4501_v54 = vpop.permute.xlu1 %4500 }
0x229b   :  { %vm4502_vm2 = vcmp.eq.s32.totalorder %v5516_v36, %v4501_v54 }
0x229c   :  { %v4503_v33 = vsel %vm4502_vm2, %v6368_v63, 0 }
0x229d   :  { %v4504_v11 = vsel %vm2494_vm14, %v4503_v33, 0 }
0x229e   :  { %v4506_v13 = vshrl.u32 %v4504_v11, 16  ;;  %v4505_v61 = vand.u32 65535, %v4504_v11 }
0x22a0   :  { %v4508_v43 = vcvt.s32.f32 %v4506_v13  ;;  %v4507_v56 = vcvt.s32.f32 %v4505_v61 }
0x22a2   :  { %4511 = vadd.xlane.f32.xlu0 %v4508_v43 }
0x22a6   :  { %4509 = vadd.xlane.f32.xlu0 %v4507_v56 }
0x232f   :  { %v4512_v28 = vpop.xlane.xlu0 %4511 }
0x2330   :  { %v4514_v40 = vcvt.f32.s32 %v4512_v28 }
0x2332   :  { %v4515_v62 = vshll.u32 %v4514_v40, 16 }
0x2333   :  { %v4510_v38 = vpop.xlane.xlu0 %4509 }
0x2334   :  { %v4513_v46 = vcvt.f32.s32 %v4510_v38 }
0x2336   :  { %v4516_v50 = vadd.s32 %v4515_v62, %v4513_v46 }
0x2338   :  { %v4518_v47 = vsel %vm4517_vm12, %v6880_v39, %v4516_v50 }
0x2339   :  { %4520 = vperm.xlu1 %5210, %v4518_v47  }
0x23b8   :  { %v4521_v63 = vpop.permute.xlu1 %4520 }
0x23b9   :  { %vm4522_vm8 = vcmp.eq.s32.totalorder %v5516_v36, %v4521_v63 }
0x23ba   :  { %v4523_v59 = vsel %vm4522_vm8, %v6250_v60, 0 }
0x23bb   :  { %v4524_v29 = vsel %vm2494_vm14, %v4523_v59, 0 }
0x23bc   :  { %v4525_v19 = vand.u32 65535, %v4524_v29  ;;  %v4526_v31 = vshrl.u32 %v4524_v29, 16 }
0x23be   :  { %v4528_v55 = vcvt.s32.f32 %v4526_v31  ;;  %v4527_v16 = vcvt.s32.f32 %v4525_v19 }
0x23c0   :  { %4531 = vadd.xlane.f32.xlu0 %v4528_v55  ;;  %4529 = vadd.xlane.f32.xlu1 %v4527_v16 }
0x244d   :  { %v4532_v14 = vpop.xlane.xlu0 %4531  ;;  %v4530_v35 = vpop.xlane.xlu1 %4529 }
0x244e   :  { %v4534_v34 = vcvt.f32.s32 %v4532_v14  ;;  %v4533_v23 = vcvt.f32.s32 %v4530_v35 }
0x2450   :  { %v4535_v26 = vshll.u32 %v4534_v34, 16 }
0x2452   :  { %v4536_v27 = vadd.s32 %v4535_v26, %v4533_v23 }
0x2454   :  { %v4538_v45 = vsel %vm4537_vm15, %v6880_v39, %v4536_v27 }
0x2455   :  { %4559 = vrot.lane.b32.xlu1 %v4538_v45, %s5385_s20  ;;  %4540 = vperm.xlu0 %5211, %v4538_v45  }
0x2459   :  { %4563 = vrot.lane.b32.xlu1 %v4498_v21, %s5386_s0 }
0x245d   :  { %4565 = vrot.lane.b32.xlu1 %v6899_v6, %s5387_s21 }
0x2461   :  { %4567 = vrot.lane.b32.xlu1 %v6891_v52, %s5388_s22 }
0x24c7   :  { %v4560_v4 = vpop.permute.xlu1 %4559 }
0x24cb   :  { %v4564_v52 = vpop.permute.xlu1 %4563 }
0x24cf   :  { %v4566_v18 = vpop.permute.xlu1 %4565 }
0x24d3   :  { %v4568_v5 = vpop.permute.xlu1 %4567 }
0x24d4   :  { %v4541_v60 = vpop.permute.xlu0 %4540 }
0x24d5   :  { %vm4542_vm7 = vcmp.eq.s32.totalorder %v5516_v36, %v4541_v60 }
0x24d6   :  { %v4543_v8 = vsel %vm4542_vm7, %v6139_v25, 0 }
0x24d7   :  { %v4544_v10 = vsel %vm2494_vm14, %v4543_v8, 0 }
0x24d8   :  { %v4545_v42 = vand.u32 65535, %v4544_v10  ;;  %v4546_v44 = vshrl.u32 %v4544_v10, 16 }
0x24da   :  { %v4548_v51 = vcvt.s32.f32 %v4546_v44  ;;  %v4547_v22 = vcvt.s32.f32 %v4545_v42 }
0x24dc   :  { %4551 = vadd.xlane.f32.xlu0 %v4548_v51  ;;  %4549 = vadd.xlane.f32.xlu1 %v4547_v22 }
0x24ed   :  { %4569 = vrot.lane.b32.xlu1 %v6883_v24, %s5389_s4 }
0x24f2   :  { %4561 = vrot.lane.b32.xlu0 %v4518_v47, %s5390_s23 }
0x2569   :  { %v4552_v36 = vpop.xlane.xlu0 %4551  ;;  %v4550_v57 = vpop.xlane.xlu1 %4549 }
0x256a   :  { %v4554_v25 = vcvt.f32.s32 %v4552_v36  ;;  %v4553_v32 = vcvt.f32.s32 %v4550_v57 }
0x256c   :  { %v4555_v20 = vshll.u32 %v4554_v25, 16 }
0x256d   :  { %v4562_v24 = vpop.permute.xlu0 %4561  ;;  %v4570_v17 = vpop.permute.xlu1 %4569 }
0x256e   :  { %v4556_v0 = vadd.s32 %v4555_v20, %v4553_v32 }
0x2570   :  { %v4558_v6 = vsel %vm4557_vm6, %v6880_v39, %v4556_v0 }
0x2571   :  { %v4572_v37 = vsel %vm4571_vm10, %v4558_v6, %v4560_v4 }
0x2572   :  { %v4574_v48 = vsel %vm4573_vm3, %v4572_v37, %v4562_v24 }
0x2573   :  { %v4576_v41 = vsel %vm4575_vm5, %v4574_v48, %v4564_v52 }
0x2574   :  { %v4578_v49 = vsel %vm4577_vm9, %v4576_v41, %v4566_v18 }
0x2575   :  { %v4580_v53 = vsel %vm4579_vm11, %v4578_v49, %v4568_v5 }
0x2576   :  { %v4582_v2 = vsel %vm4581_vm1, %v4580_v53, %v4570_v17 }
0x2577   :  { %v4584_v7 = vsel %vm4583_vm13, %v4582_v2, %v6859_v58 }
0x2578   :  { %4585 = vst.msk [vmem:[#allocation5] sm:$0xff] %vm2494_vm14, %v4584_v7 }
0x2579   :  { %5357 = shalt.err (!%p5354_p4)
}
0x257a   :  { %s5358_s28 = scalar_lea.hbm %s6947_s8, 128 }
0x257b   :  { %p5359_p5 = scmp.ne.s32.totalorder %s6947_s8, %s5358_s28  ;;  %p5362_p6 = scmp.lt.u32.totalorder %s5358_s28, %s6947_s8 }
0x257d   :  { %p5364_p7 = pnand %p5362_p6, %p5359_p5 }
0x257f   :  { %5367 = shalt.err (!%p5364_p7)
}
0x2580   :  { %4595 = dma.vmem_to_hbm [thread:$0]  %s4593_s25, 128, %s6947_s8, [#allocation6]  }
0x2581   :  { %5368 = dma.done.wait [#allocation6], 128  }
0x2582   :  { %5369 = vsyncadd [#allocation6], 4294967168 }
0x2583   :  { %4599 = vsyncpa [#allocation6], 1 }

</bundles_post_ra>
